<compile_context>
chip_gen: v7x
topology: tpu7x:2x2x1
jax: 0.10.0
libtpu: 0.0.40
codegen_flags: <defaults>
</compile_context>

<pallas_src>
import jax
import jax.numpy as jnp
from jax import lax
from jax.experimental import pallas as pl
from jax.experimental.pallas import tpu as pltpu

N_NODES = 22          # 2 teams x 11 players
NODE_FEAT = 3
HID = 8
HEADS = 2
EDGE_DIM = 2
POOL_IN = HID * HEADS        # 16
POOL_HIDDEN = 64
META_IN = 6
META_OUT = 8
FC1 = 24
FC2 = 8
N_CLASSES = 3

# --------------------------- parameter slab layout ---------------------------
# Every tensor starts on an 8-row (sublane) aligned offset; lanes 0..c-1 hold
# the real data.  The per-layer GATv2 left/right projections are fused into a
# single [in, 2*heads*hid] matrix so one MXU matmul produces both transforms.
_PARAM_SPECS = (
    ("wft1", (NODE_FEAT, HID)), ("bft1", (1, HID)),
    ("wft2", (HID, HID)), ("bft2", (1, HID)),
    ("wlr1", (HID, 2 * HEADS * HID)), ("we1", (HEADS * EDGE_DIM, HID)),
    ("att1", (HEADS, HID)), ("bg1", (1, HEADS * HID)),
    ("wlr2", (HEADS * HID, 2 * HEADS * HID)), ("we2", (HEADS * EDGE_DIM, HID)),
    ("att2", (HEADS, HID)), ("bg2", (1, HEADS * HID)),
    ("wp1", (POOL_IN, POOL_HIDDEN)), ("bp1", (1, POOL_HIDDEN)),
    ("wp2", (POOL_HIDDEN, POOL_IN)), ("bp2", (1, POOL_IN)),
    ("wm", (META_IN, META_OUT)), ("bm", (1, META_OUT)),
    ("wf1", (FC1, FC1)), ("bf1", (1, FC1)),
    ("wf2", (FC1, FC2)), ("bf2", (1, FC2)),
    ("wf3", (FC2, N_CLASSES)), ("bf3", (1, N_CLASSES)),
)


def _build_offsets():
    offs, off = {}, 0
    for name, (r, c) in _PARAM_SPECS:
        offs[name] = (off, r, c)
        off += ((r + 7) // 8) * 8      # keep every tensor 8-row aligned
    return offs, off


_PARAM_OFFSETS, PARAM_ROWS = _build_offsets()        # PARAM_ROWS == 296


def _p(p_ref, name):
    off, r, c = _PARAM_OFFSETS[name]
    return p_ref[off:off + r, 0:c]


def _lrelu(v, slope):
    return jnp.where(v > 0, v, slope * v)


def _linear(v, w, b):
    return jnp.dot(v, w, preferred_element_type=jnp.float32) + b


def _gatv2_layer(x, ea0, ea1, neg, eye, p_ref, wlr_name, we_name, att_name, b_name):
    """Dense GATv2Conv (PyG semantics, edge features, concat heads).

    The [N, N, D] attention intermediate of the naive formulation is never
    materialized: the score is accumulated per feature d over [N, N] slabs
      s += att[h, d] * lrelu(xr[:, d] + xl[:, d]^T + ea0*we0[d] + ea1*we1[d])
    which keeps only a few (24, 128)-padded vregs live and replaces the
    128-lane-padded cross-lane reduce with plain VPU FMAs.
    """
    wlr = _p(p_ref, wlr_name)                       # [in, 2*H*D]  fused l/r projection
    we = _p(p_ref, we_name)                         # [H*E, D] rows (2h, 2h+1) = head h
    att = _p(p_ref, att_name)                       # [H, D]
    bias = _p(p_ref, b_name)                        # [1, H*D]

    proj = jnp.dot(x, wlr, preferred_element_type=jnp.float32)   # [N, 2*H*D]
    xl_all = proj[:, :HEADS * HID]                  # [N, H*D]  source transform
    xr_all = proj[:, HEADS * HID:]                  # [N, H*D]  target transform
    # xl transposed to [H*D, N] via an identity matmul (MXU) so xl[j, d] can be
    # row-broadcast along sublanes in the per-d accumulation.
    xlT_all = lax.dot_general(xl_all, eye, (((0,), (0,)), ((), ())),
                              preferred_element_type=jnp.float32)  # [H*D, N]

    alphas, xls = [], []
    for h in range(HEADS):
        base = h * HID
        xl = xl_all[:, base:base + HID]             # [N, D]
        xr = xr_all[:, base:base + HID]             # [N, D]
        s = neg                                     # hoisted mask bias (-1e30 where adj==0)
        for d in range(HID):
            col = xr[:, d:d + 1]                        # [N, 1] target feature d
            row = xlT_all[base + d:base + d + 1, :]     # [1, N] source feature d
            e = (ea0 * we[2 * h:2 * h + 1, d:d + 1]
                 + ea1 * we[2 * h + 1:2 * h + 2, d:d + 1])
            s = s + att[h:h + 1, d:d + 1] * _lrelu(col + row + e, 0.2)
        m = jnp.max(s, axis=-1, keepdims=True)
        p = jnp.exp(s - m)                          # masked entries underflow to exact 0
        denom = jnp.sum(p, axis=-1, keepdims=True)
        # guard: a node with zero in-neighbours would give denom==0 (adj must
        # include self-loops to match PyG's add_self_loops behaviour).
        alpha = p * pl.reciprocal(jnp.maximum(denom, 1e-30), approx=True)
        alphas.append(alpha)
        xls.append(xl)

    # keep the two tiny aggregation matmuls adjacent so their MXU pushes pipeline
    outs = [jnp.dot(alphas[h], xls[h], preferred_element_type=jnp.float32)
            for h in range(HEADS)]
    return jnp.concatenate(outs, axis=-1) + bias    # [N, H*D]


def sports_gnn_kernel(x_ref, ea_ref, adj_ref, meta_ref, dmask_ref, p_ref, out_ref):
    x = x_ref[...]                                  # [N, 3]
    adj = adj_ref[...]                              # [N, N]
    ea0 = ea_ref[0]                                 # [N, N]
    ea1 = ea_ref[1]                                 # [N, N]

    # hoisted masked-softmax bias and identity matrix (shared by both GAT layers)
    neg = (1.0 - adj) * (-1e30)
    ri = lax.broadcasted_iota(jnp.int32, (N_NODES, N_NODES), 0)
    ci = lax.broadcasted_iota(jnp.int32, (N_NODES, N_NODES), 1)
    eye = (ri == ci).astype(jnp.float32)

    # feature_transformers1/2 + LeakyReLU(0.1)
    x = _lrelu(_linear(x, _p(p_ref, "wft1"), _p(p_ref, "bft1")), 0.1)   # [N, 8]
    x = _lrelu(_linear(x, _p(p_ref, "wft2"), _p(p_ref, "bft2")), 0.1)   # [N, 8]

    # GATv2Block: 2 layers, 2 heads (concat) -> [N, 16]
    x = _gatv2_layer(x, ea0, ea1, neg, eye, p_ref, "wlr1", "we1", "att1", "bg1")
    x = _lrelu(x, 0.1)   # TODO(synk): inter-layer activation of GATv2Block is inferred
    x = _gatv2_layer(x, ea0, ea1, neg, eye, p_ref, "wlr2", "we2", "att2", "bg2")

    # SumPool: global sum over nodes + MLP 16 -> 64 -> 16
    pooled = jnp.sum(x, axis=0, keepdims=True)                                  # [1, 16]
    hp = jnp.maximum(_linear(pooled, _p(p_ref, "wp1"), _p(p_ref, "bp1")), 0.0)  # [1, 64]
    graph_emb = _linear(hp, _p(p_ref, "wp2"), _p(p_ref, "bp2"))                 # [1, 16]

    # MetaDataEncoder: Linear(6, 8) + ReLU
    meta = jnp.maximum(_linear(meta_ref[...], _p(p_ref, "wm"), _p(p_ref, "bm")), 0.0)

    # torch.cat((x, meta), dim=0) of two 1-D vectors == feature concat of [1, F] rows
    feat = jnp.concatenate([graph_emb, meta], axis=-1)                          # [1, 24]

    y = _lrelu(_linear(feat, _p(p_ref, "wf1"), _p(p_ref, "bf1")), 0.1)          # [1, 24]
    y = _lrelu(_linear(y, _p(p_ref, "wf2"), _p(p_ref, "bf2")), 0.1)             # [1, 8]
    y = y * dmask_ref[...]        # F.dropout(p=0.5) via precomputed scaled keep-mask
    logits = _linear(y, _p(p_ref, "wf3"), _p(p_ref, "bf3"))                     # [1, 3]

    # unsqueeze(0) + Softmax(dim=1)  (exact division so probabilities sum to 1)
    m = jnp.max(logits, axis=-1, keepdims=True)
    p = jnp.exp(logits - m)
    out_ref[...] = p / jnp.sum(p, axis=-1, keepdims=True)


@jax.jit
def sports_gnn_forward(x, edge_attr, adj, meta, dmask, param_slab):
    """Batched forward: one grid step per graph, sharded across TensorCores."""
    batch = x.shape[0]
    grid_spec = pltpu.PrefetchScalarGridSpec(
        num_scalar_prefetch=0,
        grid=(batch,),
        in_specs=[
            pl.BlockSpec((None, N_NODES, NODE_FEAT), lambda b: (b, 0, 0)),
            pl.BlockSpec((None, EDGE_DIM, N_NODES, N_NODES), lambda b: (b, 0, 0, 0)),
            pl.BlockSpec((None, N_NODES, N_NODES), lambda b: (b, 0, 0)),
            pl.BlockSpec((None, 1, META_IN), lambda b: (b, 0, 0)),
            pl.BlockSpec((None, 1, FC2), lambda b: (b, 0, 0)),
            pl.BlockSpec((PARAM_ROWS, 128), lambda b: (0, 0)),   # shared param slab
        ],
        out_specs=pl.BlockSpec((None, 1, N_CLASSES), lambda b: (b, 0, 0)),
    )
    return pl.pallas_call(
        sports_gnn_kernel,
        out_shape=jax.ShapeDtypeStruct((batch, 1, N_CLASSES), jnp.float32),
        grid_spec=grid_spec,
        compiler_params=pltpu.CompilerParams(dimension_semantics=("parallel",)),
    )(x, edge_attr, adj, meta, dmask, param_slab)


# ------------------------- deterministic parameter init -------------------------

def _uniform(key, shape, fan_in):
    bound = 1.0 / (fan_in ** 0.5)
    return jax.random.uniform(key, shape, jnp.float32, -bound, bound)


def _linear_params(key, fan_in, fan_out):
    k1, k2 = jax.random.split(key)
    return _uniform(k1, (fan_in, fan_out), fan_in), _uniform(k2, (1, fan_out), fan_in)


def _gat_params(key, fan_in):
    ks = jax.random.split(key, 5)
    wl_t = _uniform(ks[0], (fan_in, HEADS * HID), fan_in)
    wr_t = _uniform(ks[1], (fan_in, HEADS * HID), fan_in)
    wlr = jnp.concatenate([wl_t, wr_t], axis=1)          # fused [in, 2*H*D]
    we_t = _uniform(ks[2], (HEADS * EDGE_DIM, HID), EDGE_DIM)
    att = _uniform(ks[3], (HEADS, HID), HID)
    bias = _uniform(ks[4], (1, HEADS * HID), HID)
    return wlr, we_t, att, bias


def init_params(key):
    ks = jax.random.split(key, 10)
    p = {}
    p["wft1"], p["bft1"] = _linear_params(ks[0], NODE_FEAT, HID)
    p["wft2"], p["bft2"] = _linear_params(ks[1], HID, HID)
    p["wlr1"], p["we1"], p["att1"], p["bg1"] = _gat_params(ks[2], HID)          # in = 8
    p["wlr2"], p["we2"], p["att2"], p["bg2"] = _gat_params(ks[3], HEADS * HID)  # in = 16
    p["wp1"], p["bp1"] = _linear_params(ks[4], POOL_IN, POOL_HIDDEN)
    p["wp2"], p["bp2"] = _linear_params(ks[5], POOL_HIDDEN, POOL_IN)
    p["wm"], p["bm"] = _linear_params(ks[6], META_IN, META_OUT)
    p["wf1"], p["bf1"] = _linear_params(ks[7], FC1, FC1)
    p["wf2"], p["bf2"] = _linear_params(ks[8], FC1, FC2)
    p["wf3"], p["bf3"] = _linear_params(ks[9], FC2, N_CLASSES)
    return p


def pack_params(p):
    slab = jnp.zeros((PARAM_ROWS, 128), jnp.float32)
    for name, (r, c) in _PARAM_SPECS:
        off = _PARAM_OFFSETS[name][0]
        slab = slab.at[off:off + r, 0:c].set(p[name].astype(jnp.float32))
    return slab


if __name__ == "__main__":
    B = 2          # batch of graphs; parallel grid axis -> both TCs on v7x
    key = jax.random.PRNGKey(0)
    k_param, k_x, k_ea, k_meta, k_drop = jax.random.split(key, 5)
    param_slab = pack_params(init_params(k_param))

    # graph_data: 22 players/graph, dense intra-team connectivity (incl. self-loops)
    x = jax.random.normal(k_x, (B, N_NODES, NODE_FEAT), jnp.float32)
    team = (jnp.arange(N_NODES) >= N_NODES // 2).astype(jnp.int32)
    adj1 = (team[:, None] == team[None, :]).astype(jnp.float32)           # [N, N]
    adj = jnp.broadcast_to(adj1, (B, N_NODES, N_NODES))
    edge_attr = (jax.random.normal(k_ea, (B, EDGE_DIM, N_NODES, N_NODES), jnp.float32)
                 * adj[:, None, :, :])
    meta = jax.random.normal(k_meta, (B, 1, META_IN), jnp.float32)        # [B, 1, 6]

    # F.dropout(x, p=0.5) defaults to training=True in PyTorch; emulate with a
    # deterministic precomputed keep-mask scaled by 1/(1-p).
    keep = jax.random.bernoulli(k_drop, 0.5, (B, 1, FC2)).astype(jnp.float32)
    dmask = keep / 0.5

    out = sports_gnn_forward(x, edge_attr, adj, meta, dmask, param_slab)
    out = jax.block_until_ready(out)
    assert out.shape == (B, 1, N_CLASSES)
    assert bool(jnp.isfinite(out).all())
    sums = jnp.sum(out, axis=-1)
    assert bool(jnp.all(jnp.abs(sums - 1.0) < 1e-4))
    print("KERNEL_OK")
</pallas_src>

<mosaic_0001>
module attributes {stable_mosaic.version = 11 : i64} {
  func.func @sports_gnn_kernel(%arg0: i32, %arg1: memref<1x22x3xf32, #tpu.memory_space<vmem>>, %arg2: memref<1x2x22x22xf32, #tpu.memory_space<vmem>>, %arg3: memref<1x22x22xf32, #tpu.memory_space<vmem>>, %arg4: memref<1x1x6xf32, #tpu.memory_space<vmem>>, %arg5: memref<1x1x8xf32, #tpu.memory_space<vmem>>, %arg6: memref<296x128xf32, #tpu.memory_space<vmem>>, %arg7: memref<1x1x3xf32, #tpu.memory_space<vmem>>) attributes {dimension_semantics = [#tpu.dimension_semantics<parallel>], iteration_bounds = array<i64: 2>, scalar_prefetch = 0 : i64, scratch_operands = 0 : i64, tpu.core_type = #tpu.core_type<tc>, window_params = [{transform_indices = @transform_0, window_bounds = array<i64: 1, 22, 3>}, {transform_indices = @transform_1, window_bounds = array<i64: 1, 2, 22, 22>}, {transform_indices = @transform_2, window_bounds = array<i64: 1, 22, 22>}, {transform_indices = @transform_3, window_bounds = array<i64: 1, 1, 6>}, {transform_indices = @transform_4, window_bounds = array<i64: 1, 1, 8>}, {pipeline_mode = #tpu.pipeline_mode<synchronous>, transform_indices = @transform_5, window_bounds = array<i64: 296, 128>}, {transform_indices = @transform_6, window_bounds = array<i64: 1, 1, 3>}]} {
    %c0 = arith.constant 0 : index
    %c0_0 = arith.constant 0 : index
    %c0_1 = arith.constant 0 : index
    %0 = vector.load %arg1[%c0, %c0_0, %c0_1] : memref<1x22x3xf32, #tpu.memory_space<vmem>>, vector<1x22x3xf32>
    %1 = vector.shape_cast %0 : vector<1x22x3xf32> to vector<22x3xf32>
    %c0_2 = arith.constant 0 : index
    %c0_3 = arith.constant 0 : index
    %c0_4 = arith.constant 0 : index
    %2 = vector.load %arg3[%c0_2, %c0_3, %c0_4] : memref<1x22x22xf32, #tpu.memory_space<vmem>>, vector<1x22x22xf32>
    %3 = vector.shape_cast %2 : vector<1x22x22xf32> to vector<22x22xf32>
    %c0_5 = arith.constant 0 : index
    %c0_6 = arith.constant 0 : index
    %c0_7 = arith.constant 0 : index
    %c0_8 = arith.constant 0 : index
    %4 = vector.load %arg2[%c0_5, %c0_6, %c0_7, %c0_8] : memref<1x2x22x22xf32, #tpu.memory_space<vmem>>, vector<1x1x22x22xf32>
    %5 = vector.shape_cast %4 : vector<1x1x22x22xf32> to vector<22x22xf32>
    %c0_9 = arith.constant 0 : index
    %c1 = arith.constant 1 : index
    %c0_10 = arith.constant 0 : index
    %c0_11 = arith.constant 0 : index
    %6 = vector.load %arg2[%c0_9, %c1, %c0_10, %c0_11] : memref<1x2x22x22xf32, #tpu.memory_space<vmem>>, vector<1x1x22x22xf32>
    %7 = vector.shape_cast %6 : vector<1x1x22x22xf32> to vector<22x22xf32>
    %cst = arith.constant 1.000000e+00 : f32
    %8 = vector.broadcast %cst : f32 to vector<22x22xf32>
    %9 = arith.subf %8, %3 : vector<22x22xf32>
    %cst_12 = arith.constant -1.000000e+30 : f32
    %10 = vector.broadcast %cst_12 : f32 to vector<22x22xf32>
    %11 = arith.mulf %9, %10 : vector<22x22xf32>
    %12 = tpu.iota {dimensions = array<i32: 0>} : vector<22x22xi32>
    %13 = tpu.iota {dimensions = array<i32: 1>} : vector<22x22xi32>
    %14 = arith.cmpi eq, %12, %13 : vector<22x22xi32>
    %15 = arith.extui %14 : vector<22x22xi1> to vector<22x22xi32>
    %16 = arith.sitofp %15 : vector<22x22xi32> to vector<22x22xf32>
    %c0_13 = arith.constant 0 : index
    %c0_14 = arith.constant 0 : index
    %17 = vector.load %arg6[%c0_13, %c0_14] : memref<296x128xf32, #tpu.memory_space<vmem>>, vector<3x8xf32>
    %c8 = arith.constant 8 : index
    %c0_15 = arith.constant 0 : index
    %18 = vector.load %arg6[%c8, %c0_15] : memref<296x128xf32, #tpu.memory_space<vmem>>, vector<1x8xf32>
    %cst_16 = arith.constant dense<0.000000e+00> : vector<22x8xf32>
    %19 = tpu.matmul %1, %17, %cst_16 {dimension_numbers = #tpu.dot_dimension_numbers<[1], [0], [0], [1], [0, 0, 1, 1], [], []>} : vector<22x3xf32>, vector<3x8xf32>, vector<22x8xf32> -> vector<22x8xf32>
    %20 = vector.broadcast %18 : vector<1x8xf32> to vector<22x8xf32>
    %21 = arith.addf %19, %20 : vector<22x8xf32>
    %cst_17 = arith.constant 0.000000e+00 : f32
    %22 = vector.broadcast %cst_17 : f32 to vector<22x8xf32>
    %23 = arith.cmpf ogt, %21, %22 : vector<22x8xf32>
    %cst_18 = arith.constant 1.000000e-01 : f32
    %24 = vector.broadcast %cst_18 : f32 to vector<22x8xf32>
    %25 = arith.mulf %24, %21 : vector<22x8xf32>
    %26 = arith.select %23, %21, %25 : vector<22x8xi1>, vector<22x8xf32>
    %c16 = arith.constant 16 : index
    %c0_19 = arith.constant 0 : index
    %27 = vector.load %arg6[%c16, %c0_19] : memref<296x128xf32, #tpu.memory_space<vmem>>, vector<8x8xf32>
    %c24 = arith.constant 24 : index
    %c0_20 = arith.constant 0 : index
    %28 = vector.load %arg6[%c24, %c0_20] : memref<296x128xf32, #tpu.memory_space<vmem>>, vector<1x8xf32>
    %cst_21 = arith.constant dense<0.000000e+00> : vector<22x8xf32>
    %29 = tpu.matmul %26, %27, %cst_21 {dimension_numbers = #tpu.dot_dimension_numbers<[1], [0], [0], [1], [0, 0, 1, 1], [], []>} : vector<22x8xf32>, vector<8x8xf32>, vector<22x8xf32> -> vector<22x8xf32>
    %30 = vector.broadcast %28 : vector<1x8xf32> to vector<22x8xf32>
    %31 = arith.addf %29, %30 : vector<22x8xf32>
    %cst_22 = arith.constant 0.000000e+00 : f32
    %32 = vector.broadcast %cst_22 : f32 to vector<22x8xf32>
    %33 = arith.cmpf ogt, %31, %32 : vector<22x8xf32>
    %cst_23 = arith.constant 1.000000e-01 : f32
    %34 = vector.broadcast %cst_23 : f32 to vector<22x8xf32>
    %35 = arith.mulf %34, %31 : vector<22x8xf32>
    %36 = arith.select %33, %31, %35 : vector<22x8xi1>, vector<22x8xf32>
    %c32 = arith.constant 32 : index
    %c0_24 = arith.constant 0 : index
    %37 = vector.load %arg6[%c32, %c0_24] : memref<296x128xf32, #tpu.memory_space<vmem>>, vector<8x32xf32>
    %c40 = arith.constant 40 : index
    %c0_25 = arith.constant 0 : index
    %38 = vector.load %arg6[%c40, %c0_25] : memref<296x128xf32, #tpu.memory_space<vmem>>, vector<4x8xf32>
    %c48 = arith.constant 48 : index
    %c0_26 = arith.constant 0 : index
    %39 = vector.load %arg6[%c48, %c0_26] : memref<296x128xf32, #tpu.memory_space<vmem>>, vector<2x8xf32>
    %c56 = arith.constant 56 : index
    %c0_27 = arith.constant 0 : index
    %40 = vector.load %arg6[%c56, %c0_27] : memref<296x128xf32, #tpu.memory_space<vmem>>, vector<1x16xf32>
    %cst_28 = arith.constant dense<0.000000e+00> : vector<22x32xf32>
    %41 = tpu.matmul %36, %37, %cst_28 {dimension_numbers = #tpu.dot_dimension_numbers<[1], [0], [0], [1], [0, 0, 1, 1], [], []>} : vector<22x8xf32>, vector<8x32xf32>, vector<22x32xf32> -> vector<22x32xf32>
    %42 = vector.extract_strided_slice %41 {offsets = [0, 0], sizes = [22, 16], strides = [1, 1]} : vector<22x32xf32> to vector<22x16xf32>
    %43 = vector.extract_strided_slice %41 {offsets = [0, 16], sizes = [22, 16], strides = [1, 1]} : vector<22x32xf32> to vector<22x16xf32>
    %cst_29 = arith.constant dense<0.000000e+00> : vector<16x22xf32>
    %44 = tpu.matmul %42, %16, %cst_29 {dimension_numbers = #tpu.dot_dimension_numbers<[0], [0], [1], [1], [0, 1, 1, 1], [], []>} : vector<22x16xf32>, vector<22x22xf32>, vector<16x22xf32> -> vector<16x22xf32>
    %45 = vector.extract_strided_slice %42 {offsets = [0, 0], sizes = [22, 8], strides = [1, 1]} : vector<22x16xf32> to vector<22x8xf32>
    %46 = vector.extract_strided_slice %43 {offsets = [0, 0], sizes = [22, 8], strides = [1, 1]} : vector<22x16xf32> to vector<22x8xf32>
    %47 = vector.extract_strided_slice %46 {offsets = [0, 0], sizes = [22, 1], strides = [1, 1]} : vector<22x8xf32> to vector<22x1xf32>
    %48 = vector.extract_strided_slice %44 {offsets = [0, 0], sizes = [1, 22], strides = [1, 1]} : vector<16x22xf32> to vector<1x22xf32>
    %49 = vector.extract_strided_slice %38 {offsets = [0, 0], sizes = [1, 1], strides = [1, 1]} : vector<4x8xf32> to vector<1x1xf32>
    %50 = vector.broadcast %49 : vector<1x1xf32> to vector<22x22xf32>
    %51 = arith.mulf %5, %50 : vector<22x22xf32>
    %52 = vector.extract_strided_slice %38 {offsets = [1, 0], sizes = [1, 1], strides = [1, 1]} : vector<4x8xf32> to vector<1x1xf32>
    %53 = vector.broadcast %52 : vector<1x1xf32> to vector<22x22xf32>
    %54 = arith.mulf %7, %53 : vector<22x22xf32>
    %55 = arith.addf %51, %54 : vector<22x22xf32>
    %56 = vector.extract_strided_slice %39 {offsets = [0, 0], sizes = [1, 1], strides = [1, 1]} : vector<2x8xf32> to vector<1x1xf32>
    %57 = vector.broadcast %47 : vector<22x1xf32> to vector<22x22xf32>
    %58 = vector.broadcast %48 : vector<1x22xf32> to vector<22x22xf32>
    %59 = arith.addf %57, %58 : vector<22x22xf32>
    %60 = arith.addf %59, %55 : vector<22x22xf32>
    %cst_30 = arith.constant 0.000000e+00 : f32
    %61 = vector.broadcast %cst_30 : f32 to vector<22x22xf32>
    %62 = arith.cmpf ogt, %60, %61 : vector<22x22xf32>
    %cst_31 = arith.constant 2.000000e-01 : f32
    %63 = vector.broadcast %cst_31 : f32 to vector<22x22xf32>
    %64 = arith.mulf %63, %60 : vector<22x22xf32>
    %65 = arith.select %62, %60, %64 : vector<22x22xi1>, vector<22x22xf32>
    %66 = vector.broadcast %56 : vector<1x1xf32> to vector<22x22xf32>
    %67 = arith.mulf %66, %65 : vector<22x22xf32>
    %68 = arith.addf %11, %67 : vector<22x22xf32>
    %69 = vector.extract_strided_slice %46 {offsets = [0, 1], sizes = [22, 1], strides = [1, 1]} : vector<22x8xf32> to vector<22x1xf32>
    %70 = vector.extract_strided_slice %44 {offsets = [1, 0], sizes = [1, 22], strides = [1, 1]} : vector<16x22xf32> to vector<1x22xf32>
    %71 = vector.extract_strided_slice %38 {offsets = [0, 1], sizes = [1, 1], strides = [1, 1]} : vector<4x8xf32> to vector<1x1xf32>
    %72 = vector.broadcast %71 : vector<1x1xf32> to vector<22x22xf32>
    %73 = arith.mulf %5, %72 : vector<22x22xf32>
    %74 = vector.extract_strided_slice %38 {offsets = [1, 1], sizes = [1, 1], strides = [1, 1]} : vector<4x8xf32> to vector<1x1xf32>
    %75 = vector.broadcast %74 : vector<1x1xf32> to vector<22x22xf32>
    %76 = arith.mulf %7, %75 : vector<22x22xf32>
    %77 = arith.addf %73, %76 : vector<22x22xf32>
    %78 = vector.extract_strided_slice %39 {offsets = [0, 1], sizes = [1, 1], strides = [1, 1]} : vector<2x8xf32> to vector<1x1xf32>
    %79 = vector.broadcast %69 : vector<22x1xf32> to vector<22x22xf32>
    %80 = vector.broadcast %70 : vector<1x22xf32> to vector<22x22xf32>
    %81 = arith.addf %79, %80 : vector<22x22xf32>
    %82 = arith.addf %81, %77 : vector<22x22xf32>
    %cst_32 = arith.constant 0.000000e+00 : f32
    %83 = vector.broadcast %cst_32 : f32 to vector<22x22xf32>
    %84 = arith.cmpf ogt, %82, %83 : vector<22x22xf32>
    %cst_33 = arith.constant 2.000000e-01 : f32
    %85 = vector.broadcast %cst_33 : f32 to vector<22x22xf32>
    %86 = arith.mulf %85, %82 : vector<22x22xf32>
    %87 = arith.select %84, %82, %86 : vector<22x22xi1>, vector<22x22xf32>
    %88 = vector.broadcast %78 : vector<1x1xf32> to vector<22x22xf32>
    %89 = arith.mulf %88, %87 : vector<22x22xf32>
    %90 = arith.addf %68, %89 : vector<22x22xf32>
    %91 = vector.extract_strided_slice %46 {offsets = [0, 2], sizes = [22, 1], strides = [1, 1]} : vector<22x8xf32> to vector<22x1xf32>
    %92 = vector.extract_strided_slice %44 {offsets = [2, 0], sizes = [1, 22], strides = [1, 1]} : vector<16x22xf32> to vector<1x22xf32>
    %93 = vector.extract_strided_slice %38 {offsets = [0, 2], sizes = [1, 1], strides = [1, 1]} : vector<4x8xf32> to vector<1x1xf32>
    %94 = vector.broadcast %93 : vector<1x1xf32> to vector<22x22xf32>
    %95 = arith.mulf %5, %94 : vector<22x22xf32>
    %96 = vector.extract_strided_slice %38 {offsets = [1, 2], sizes = [1, 1], strides = [1, 1]} : vector<4x8xf32> to vector<1x1xf32>
    %97 = vector.broadcast %96 : vector<1x1xf32> to vector<22x22xf32>
    %98 = arith.mulf %7, %97 : vector<22x22xf32>
    %99 = arith.addf %95, %98 : vector<22x22xf32>
    %100 = vector.extract_strided_slice %39 {offsets = [0, 2], sizes = [1, 1], strides = [1, 1]} : vector<2x8xf32> to vector<1x1xf32>
    %101 = vector.broadcast %91 : vector<22x1xf32> to vector<22x22xf32>
    %102 = vector.broadcast %92 : vector<1x22xf32> to vector<22x22xf32>
    %103 = arith.addf %101, %102 : vector<22x22xf32>
    %104 = arith.addf %103, %99 : vector<22x22xf32>
    %cst_34 = arith.constant 0.000000e+00 : f32
    %105 = vector.broadcast %cst_34 : f32 to vector<22x22xf32>
    %106 = arith.cmpf ogt, %104, %105 : vector<22x22xf32>
    %cst_35 = arith.constant 2.000000e-01 : f32
    %107 = vector.broadcast %cst_35 : f32 to vector<22x22xf32>
    %108 = arith.mulf %107, %104 : vector<22x22xf32>
    %109 = arith.select %106, %104, %108 : vector<22x22xi1>, vector<22x22xf32>
    %110 = vector.broadcast %100 : vector<1x1xf32> to vector<22x22xf32>
    %111 = arith.mulf %110, %109 : vector<22x22xf32>
    %112 = arith.addf %90, %111 : vector<22x22xf32>
    %113 = vector.extract_strided_slice %46 {offsets = [0, 3], sizes = [22, 1], strides = [1, 1]} : vector<22x8xf32> to vector<22x1xf32>
    %114 = vector.extract_strided_slice %44 {offsets = [3, 0], sizes = [1, 22], strides = [1, 1]} : vector<16x22xf32> to vector<1x22xf32>
    %115 = vector.extract_strided_slice %38 {offsets = [0, 3], sizes = [1, 1], strides = [1, 1]} : vector<4x8xf32> to vector<1x1xf32>
    %116 = vector.broadcast %115 : vector<1x1xf32> to vector<22x22xf32>
    %117 = arith.mulf %5, %116 : vector<22x22xf32>
    %118 = vector.extract_strided_slice %38 {offsets = [1, 3], sizes = [1, 1], strides = [1, 1]} : vector<4x8xf32> to vector<1x1xf32>
    %119 = vector.broadcast %118 : vector<1x1xf32> to vector<22x22xf32>
    %120 = arith.mulf %7, %119 : vector<22x22xf32>
    %121 = arith.addf %117, %120 : vector<22x22xf32>
    %122 = vector.extract_strided_slice %39 {offsets = [0, 3], sizes = [1, 1], strides = [1, 1]} : vector<2x8xf32> to vector<1x1xf32>
    %123 = vector.broadcast %113 : vector<22x1xf32> to vector<22x22xf32>
    %124 = vector.broadcast %114 : vector<1x22xf32> to vector<22x22xf32>
    %125 = arith.addf %123, %124 : vector<22x22xf32>
    %126 = arith.addf %125, %121 : vector<22x22xf32>
    %cst_36 = arith.constant 0.000000e+00 : f32
    %127 = vector.broadcast %cst_36 : f32 to vector<22x22xf32>
    %128 = arith.cmpf ogt, %126, %127 : vector<22x22xf32>
    %cst_37 = arith.constant 2.000000e-01 : f32
    %129 = vector.broadcast %cst_37 : f32 to vector<22x22xf32>
    %130 = arith.mulf %129, %126 : vector<22x22xf32>
    %131 = arith.select %128, %126, %130 : vector<22x22xi1>, vector<22x22xf32>
    %132 = vector.broadcast %122 : vector<1x1xf32> to vector<22x22xf32>
    %133 = arith.mulf %132, %131 : vector<22x22xf32>
    %134 = arith.addf %112, %133 : vector<22x22xf32>
    %135 = vector.extract_strided_slice %46 {offsets = [0, 4], sizes = [22, 1], strides = [1, 1]} : vector<22x8xf32> to vector<22x1xf32>
    %136 = vector.extract_strided_slice %44 {offsets = [4, 0], sizes = [1, 22], strides = [1, 1]} : vector<16x22xf32> to vector<1x22xf32>
    %137 = vector.extract_strided_slice %38 {offsets = [0, 4], sizes = [1, 1], strides = [1, 1]} : vector<4x8xf32> to vector<1x1xf32>
    %138 = vector.broadcast %137 : vector<1x1xf32> to vector<22x22xf32>
    %139 = arith.mulf %5, %138 : vector<22x22xf32>
    %140 = vector.extract_strided_slice %38 {offsets = [1, 4], sizes = [1, 1], strides = [1, 1]} : vector<4x8xf32> to vector<1x1xf32>
    %141 = vector.broadcast %140 : vector<1x1xf32> to vector<22x22xf32>
    %142 = arith.mulf %7, %141 : vector<22x22xf32>
    %143 = arith.addf %139, %142 : vector<22x22xf32>
    %144 = vector.extract_strided_slice %39 {offsets = [0, 4], sizes = [1, 1], strides = [1, 1]} : vector<2x8xf32> to vector<1x1xf32>
    %145 = vector.broadcast %135 : vector<22x1xf32> to vector<22x22xf32>
    %146 = vector.broadcast %136 : vector<1x22xf32> to vector<22x22xf32>
    %147 = arith.addf %145, %146 : vector<22x22xf32>
    %148 = arith.addf %147, %143 : vector<22x22xf32>
    %cst_38 = arith.constant 0.000000e+00 : f32
    %149 = vector.broadcast %cst_38 : f32 to vector<22x22xf32>
    %150 = arith.cmpf ogt, %148, %149 : vector<22x22xf32>
    %cst_39 = arith.constant 2.000000e-01 : f32
    %151 = vector.broadcast %cst_39 : f32 to vector<22x22xf32>
    %152 = arith.mulf %151, %148 : vector<22x22xf32>
    %153 = arith.select %150, %148, %152 : vector<22x22xi1>, vector<22x22xf32>
    %154 = vector.broadcast %144 : vector<1x1xf32> to vector<22x22xf32>
    %155 = arith.mulf %154, %153 : vector<22x22xf32>
    %156 = arith.addf %134, %155 : vector<22x22xf32>
    %157 = vector.extract_strided_slice %46 {offsets = [0, 5], sizes = [22, 1], strides = [1, 1]} : vector<22x8xf32> to vector<22x1xf32>
    %158 = vector.extract_strided_slice %44 {offsets = [5, 0], sizes = [1, 22], strides = [1, 1]} : vector<16x22xf32> to vector<1x22xf32>
    %159 = vector.extract_strided_slice %38 {offsets = [0, 5], sizes = [1, 1], strides = [1, 1]} : vector<4x8xf32> to vector<1x1xf32>
    %160 = vector.broadcast %159 : vector<1x1xf32> to vector<22x22xf32>
    %161 = arith.mulf %5, %160 : vector<22x22xf32>
    %162 = vector.extract_strided_slice %38 {offsets = [1, 5], sizes = [1, 1], strides = [1, 1]} : vector<4x8xf32> to vector<1x1xf32>
    %163 = vector.broadcast %162 : vector<1x1xf32> to vector<22x22xf32>
    %164 = arith.mulf %7, %163 : vector<22x22xf32>
    %165 = arith.addf %161, %164 : vector<22x22xf32>
    %166 = vector.extract_strided_slice %39 {offsets = [0, 5], sizes = [1, 1], strides = [1, 1]} : vector<2x8xf32> to vector<1x1xf32>
    %167 = vector.broadcast %157 : vector<22x1xf32> to vector<22x22xf32>
    %168 = vector.broadcast %158 : vector<1x22xf32> to vector<22x22xf32>
    %169 = arith.addf %167, %168 : vector<22x22xf32>
    %170 = arith.addf %169, %165 : vector<22x22xf32>
    %cst_40 = arith.constant 0.000000e+00 : f32
    %171 = vector.broadcast %cst_40 : f32 to vector<22x22xf32>
    %172 = arith.cmpf ogt, %170, %171 : vector<22x22xf32>
    %cst_41 = arith.constant 2.000000e-01 : f32
    %173 = vector.broadcast %cst_41 : f32 to vector<22x22xf32>
    %174 = arith.mulf %173, %170 : vector<22x22xf32>
    %175 = arith.select %172, %170, %174 : vector<22x22xi1>, vector<22x22xf32>
    %176 = vector.broadcast %166 : vector<1x1xf32> to vector<22x22xf32>
    %177 = arith.mulf %176, %175 : vector<22x22xf32>
    %178 = arith.addf %156, %177 : vector<22x22xf32>
    %179 = vector.extract_strided_slice %46 {offsets = [0, 6], sizes = [22, 1], strides = [1, 1]} : vector<22x8xf32> to vector<22x1xf32>
    %180 = vector.extract_strided_slice %44 {offsets = [6, 0], sizes = [1, 22], strides = [1, 1]} : vector<16x22xf32> to vector<1x22xf32>
    %181 = vector.extract_strided_slice %38 {offsets = [0, 6], sizes = [1, 1], strides = [1, 1]} : vector<4x8xf32> to vector<1x1xf32>
    %182 = vector.broadcast %181 : vector<1x1xf32> to vector<22x22xf32>
    %183 = arith.mulf %5, %182 : vector<22x22xf32>
    %184 = vector.extract_strided_slice %38 {offsets = [1, 6], sizes = [1, 1], strides = [1, 1]} : vector<4x8xf32> to vector<1x1xf32>
    %185 = vector.broadcast %184 : vector<1x1xf32> to vector<22x22xf32>
    %186 = arith.mulf %7, %185 : vector<22x22xf32>
    %187 = arith.addf %183, %186 : vector<22x22xf32>
    %188 = vector.extract_strided_slice %39 {offsets = [0, 6], sizes = [1, 1], strides = [1, 1]} : vector<2x8xf32> to vector<1x1xf32>
    %189 = vector.broadcast %179 : vector<22x1xf32> to vector<22x22xf32>
    %190 = vector.broadcast %180 : vector<1x22xf32> to vector<22x22xf32>
    %191 = arith.addf %189, %190 : vector<22x22xf32>
    %192 = arith.addf %191, %187 : vector<22x22xf32>
    %cst_42 = arith.constant 0.000000e+00 : f32
    %193 = vector.broadcast %cst_42 : f32 to vector<22x22xf32>
    %194 = arith.cmpf ogt, %192, %193 : vector<22x22xf32>
    %cst_43 = arith.constant 2.000000e-01 : f32
    %195 = vector.broadcast %cst_43 : f32 to vector<22x22xf32>
    %196 = arith.mulf %195, %192 : vector<22x22xf32>
    %197 = arith.select %194, %192, %196 : vector<22x22xi1>, vector<22x22xf32>
    %198 = vector.broadcast %188 : vector<1x1xf32> to vector<22x22xf32>
    %199 = arith.mulf %198, %197 : vector<22x22xf32>
    %200 = arith.addf %178, %199 : vector<22x22xf32>
    %201 = vector.extract_strided_slice %46 {offsets = [0, 7], sizes = [22, 1], strides = [1, 1]} : vector<22x8xf32> to vector<22x1xf32>
    %202 = vector.extract_strided_slice %44 {offsets = [7, 0], sizes = [1, 22], strides = [1, 1]} : vector<16x22xf32> to vector<1x22xf32>
    %203 = vector.extract_strided_slice %38 {offsets = [0, 7], sizes = [1, 1], strides = [1, 1]} : vector<4x8xf32> to vector<1x1xf32>
    %204 = vector.broadcast %203 : vector<1x1xf32> to vector<22x22xf32>
    %205 = arith.mulf %5, %204 : vector<22x22xf32>
    %206 = vector.extract_strided_slice %38 {offsets = [1, 7], sizes = [1, 1], strides = [1, 1]} : vector<4x8xf32> to vector<1x1xf32>
    %207 = vector.broadcast %206 : vector<1x1xf32> to vector<22x22xf32>
    %208 = arith.mulf %7, %207 : vector<22x22xf32>
    %209 = arith.addf %205, %208 : vector<22x22xf32>
    %210 = vector.extract_strided_slice %39 {offsets = [0, 7], sizes = [1, 1], strides = [1, 1]} : vector<2x8xf32> to vector<1x1xf32>
    %211 = vector.broadcast %201 : vector<22x1xf32> to vector<22x22xf32>
    %212 = vector.broadcast %202 : vector<1x22xf32> to vector<22x22xf32>
    %213 = arith.addf %211, %212 : vector<22x22xf32>
    %214 = arith.addf %213, %209 : vector<22x22xf32>
    %cst_44 = arith.constant 0.000000e+00 : f32
    %215 = vector.broadcast %cst_44 : f32 to vector<22x22xf32>
    %216 = arith.cmpf ogt, %214, %215 : vector<22x22xf32>
    %cst_45 = arith.constant 2.000000e-01 : f32
    %217 = vector.broadcast %cst_45 : f32 to vector<22x22xf32>
    %218 = arith.mulf %217, %214 : vector<22x22xf32>
    %219 = arith.select %216, %214, %218 : vector<22x22xi1>, vector<22x22xf32>
    %220 = vector.broadcast %210 : vector<1x1xf32> to vector<22x22xf32>
    %221 = arith.mulf %220, %219 : vector<22x22xf32>
    %222 = arith.addf %200, %221 : vector<22x22xf32>
    %cst_46 = arith.constant dense<0xFF800000> : vector<22xf32>
    %223 = vector.multi_reduction <maximumf>, %222, %cst_46 [1] : vector<22x22xf32> to vector<22xf32>
    %224 = vector.shape_cast %223 : vector<22xf32> to vector<22x1xf32>
    %225 = vector.broadcast %224 : vector<22x1xf32> to vector<22x22xf32>
    %226 = arith.subf %222, %225 : vector<22x22xf32>
    %227 = math.exp %226 : vector<22x22xf32>
    %cst_47 = arith.constant dense<0.000000e+00> : vector<22xf32>
    %228 = vector.multi_reduction <add>, %227, %cst_47 [1] : vector<22x22xf32> to vector<22xf32>
    %229 = vector.shape_cast %228 : vector<22xf32> to vector<22x1xf32>
    %cst_48 = arith.constant 1.000000e-30 : f32
    %230 = vector.broadcast %cst_48 : f32 to vector<22x1xf32>
    %231 = arith.maximumf %229, %230 : vector<22x1xf32>
    %232 = tpu.reciprocal %231 {approx = true} : vector<22x1xf32> -> vector<22x1xf32>
    %233 = vector.broadcast %232 : vector<22x1xf32> to vector<22x22xf32>
    %234 = arith.mulf %227, %233 : vector<22x22xf32>
    %235 = vector.extract_strided_slice %42 {offsets = [0, 8], sizes = [22, 8], strides = [1, 1]} : vector<22x16xf32> to vector<22x8xf32>
    %236 = vector.extract_strided_slice %43 {offsets = [0, 8], sizes = [22, 8], strides = [1, 1]} : vector<22x16xf32> to vector<22x8xf32>
    %237 = vector.extract_strided_slice %236 {offsets = [0, 0], sizes = [22, 1], strides = [1, 1]} : vector<22x8xf32> to vector<22x1xf32>
    %238 = vector.extract_strided_slice %44 {offsets = [8, 0], sizes = [1, 22], strides = [1, 1]} : vector<16x22xf32> to vector<1x22xf32>
    %239 = vector.extract_strided_slice %38 {offsets = [2, 0], sizes = [1, 1], strides = [1, 1]} : vector<4x8xf32> to vector<1x1xf32>
    %240 = vector.broadcast %239 : vector<1x1xf32> to vector<22x22xf32>
    %241 = arith.mulf %5, %240 : vector<22x22xf32>
    %242 = vector.extract_strided_slice %38 {offsets = [3, 0], sizes = [1, 1], strides = [1, 1]} : vector<4x8xf32> to vector<1x1xf32>
    %243 = vector.broadcast %242 : vector<1x1xf32> to vector<22x22xf32>
    %244 = arith.mulf %7, %243 : vector<22x22xf32>
    %245 = arith.addf %241, %244 : vector<22x22xf32>
    %246 = vector.extract_strided_slice %39 {offsets = [1, 0], sizes = [1, 1], strides = [1, 1]} : vector<2x8xf32> to vector<1x1xf32>
    %247 = vector.broadcast %237 : vector<22x1xf32> to vector<22x22xf32>
    %248 = vector.broadcast %238 : vector<1x22xf32> to vector<22x22xf32>
    %249 = arith.addf %247, %248 : vector<22x22xf32>
    %250 = arith.addf %249, %245 : vector<22x22xf32>
    %cst_49 = arith.constant 0.000000e+00 : f32
    %251 = vector.broadcast %cst_49 : f32 to vector<22x22xf32>
    %252 = arith.cmpf ogt, %250, %251 : vector<22x22xf32>
    %cst_50 = arith.constant 2.000000e-01 : f32
    %253 = vector.broadcast %cst_50 : f32 to vector<22x22xf32>
    %254 = arith.mulf %253, %250 : vector<22x22xf32>
    %255 = arith.select %252, %250, %254 : vector<22x22xi1>, vector<22x22xf32>
    %256 = vector.broadcast %246 : vector<1x1xf32> to vector<22x22xf32>
    %257 = arith.mulf %256, %255 : vector<22x22xf32>
    %258 = arith.addf %11, %257 : vector<22x22xf32>
    %259 = vector.extract_strided_slice %236 {offsets = [0, 1], sizes = [22, 1], strides = [1, 1]} : vector<22x8xf32> to vector<22x1xf32>
    %260 = vector.extract_strided_slice %44 {offsets = [9, 0], sizes = [1, 22], strides = [1, 1]} : vector<16x22xf32> to vector<1x22xf32>
    %261 = vector.extract_strided_slice %38 {offsets = [2, 1], sizes = [1, 1], strides = [1, 1]} : vector<4x8xf32> to vector<1x1xf32>
    %262 = vector.broadcast %261 : vector<1x1xf32> to vector<22x22xf32>
    %263 = arith.mulf %5, %262 : vector<22x22xf32>
    %264 = vector.extract_strided_slice %38 {offsets = [3, 1], sizes = [1, 1], strides = [1, 1]} : vector<4x8xf32> to vector<1x1xf32>
    %265 = vector.broadcast %264 : vector<1x1xf32> to vector<22x22xf32>
    %266 = arith.mulf %7, %265 : vector<22x22xf32>
    %267 = arith.addf %263, %266 : vector<22x22xf32>
    %268 = vector.extract_strided_slice %39 {offsets = [1, 1], sizes = [1, 1], strides = [1, 1]} : vector<2x8xf32> to vector<1x1xf32>
    %269 = vector.broadcast %259 : vector<22x1xf32> to vector<22x22xf32>
    %270 = vector.broadcast %260 : vector<1x22xf32> to vector<22x22xf32>
    %271 = arith.addf %269, %270 : vector<22x22xf32>
    %272 = arith.addf %271, %267 : vector<22x22xf32>
    %cst_51 = arith.constant 0.000000e+00 : f32
    %273 = vector.broadcast %cst_51 : f32 to vector<22x22xf32>
    %274 = arith.cmpf ogt, %272, %273 : vector<22x22xf32>
    %cst_52 = arith.constant 2.000000e-01 : f32
    %275 = vector.broadcast %cst_52 : f32 to vector<22x22xf32>
    %276 = arith.mulf %275, %272 : vector<22x22xf32>
    %277 = arith.select %274, %272, %276 : vector<22x22xi1>, vector<22x22xf32>
    %278 = vector.broadcast %268 : vector<1x1xf32> to vector<22x22xf32>
    %279 = arith.mulf %278, %277 : vector<22x22xf32>
    %280 = arith.addf %258, %279 : vector<22x22xf32>
    %281 = vector.extract_strided_slice %236 {offsets = [0, 2], sizes = [22, 1], strides = [1, 1]} : vector<22x8xf32> to vector<22x1xf32>
    %282 = vector.extract_strided_slice %44 {offsets = [10, 0], sizes = [1, 22], strides = [1, 1]} : vector<16x22xf32> to vector<1x22xf32>
    %283 = vector.extract_strided_slice %38 {offsets = [2, 2], sizes = [1, 1], strides = [1, 1]} : vector<4x8xf32> to vector<1x1xf32>
    %284 = vector.broadcast %283 : vector<1x1xf32> to vector<22x22xf32>
    %285 = arith.mulf %5, %284 : vector<22x22xf32>
    %286 = vector.extract_strided_slice %38 {offsets = [3, 2], sizes = [1, 1], strides = [1, 1]} : vector<4x8xf32> to vector<1x1xf32>
    %287 = vector.broadcast %286 : vector<1x1xf32> to vector<22x22xf32>
    %288 = arith.mulf %7, %287 : vector<22x22xf32>
    %289 = arith.addf %285, %288 : vector<22x22xf32>
    %290 = vector.extract_strided_slice %39 {offsets = [1, 2], sizes = [1, 1], strides = [1, 1]} : vector<2x8xf32> to vector<1x1xf32>
    %291 = vector.broadcast %281 : vector<22x1xf32> to vector<22x22xf32>
    %292 = vector.broadcast %282 : vector<1x22xf32> to vector<22x22xf32>
    %293 = arith.addf %291, %292 : vector<22x22xf32>
    %294 = arith.addf %293, %289 : vector<22x22xf32>
    %cst_53 = arith.constant 0.000000e+00 : f32
    %295 = vector.broadcast %cst_53 : f32 to vector<22x22xf32>
    %296 = arith.cmpf ogt, %294, %295 : vector<22x22xf32>
    %cst_54 = arith.constant 2.000000e-01 : f32
    %297 = vector.broadcast %cst_54 : f32 to vector<22x22xf32>
    %298 = arith.mulf %297, %294 : vector<22x22xf32>
    %299 = arith.select %296, %294, %298 : vector<22x22xi1>, vector<22x22xf32>
    %300 = vector.broadcast %290 : vector<1x1xf32> to vector<22x22xf32>
    %301 = arith.mulf %300, %299 : vector<22x22xf32>
    %302 = arith.addf %280, %301 : vector<22x22xf32>
    %303 = vector.extract_strided_slice %236 {offsets = [0, 3], sizes = [22, 1], strides = [1, 1]} : vector<22x8xf32> to vector<22x1xf32>
    %304 = vector.extract_strided_slice %44 {offsets = [11, 0], sizes = [1, 22], strides = [1, 1]} : vector<16x22xf32> to vector<1x22xf32>
    %305 = vector.extract_strided_slice %38 {offsets = [2, 3], sizes = [1, 1], strides = [1, 1]} : vector<4x8xf32> to vector<1x1xf32>
    %306 = vector.broadcast %305 : vector<1x1xf32> to vector<22x22xf32>
    %307 = arith.mulf %5, %306 : vector<22x22xf32>
    %308 = vector.extract_strided_slice %38 {offsets = [3, 3], sizes = [1, 1], strides = [1, 1]} : vector<4x8xf32> to vector<1x1xf32>
    %309 = vector.broadcast %308 : vector<1x1xf32> to vector<22x22xf32>
    %310 = arith.mulf %7, %309 : vector<22x22xf32>
    %311 = arith.addf %307, %310 : vector<22x22xf32>
    %312 = vector.extract_strided_slice %39 {offsets = [1, 3], sizes = [1, 1], strides = [1, 1]} : vector<2x8xf32> to vector<1x1xf32>
    %313 = vector.broadcast %303 : vector<22x1xf32> to vector<22x22xf32>
    %314 = vector.broadcast %304 : vector<1x22xf32> to vector<22x22xf32>
    %315 = arith.addf %313, %314 : vector<22x22xf32>
    %316 = arith.addf %315, %311 : vector<22x22xf32>
    %cst_55 = arith.constant 0.000000e+00 : f32
    %317 = vector.broadcast %cst_55 : f32 to vector<22x22xf32>
    %318 = arith.cmpf ogt, %316, %317 : vector<22x22xf32>
    %cst_56 = arith.constant 2.000000e-01 : f32
    %319 = vector.broadcast %cst_56 : f32 to vector<22x22xf32>
    %320 = arith.mulf %319, %316 : vector<22x22xf32>
    %321 = arith.select %318, %316, %320 : vector<22x22xi1>, vector<22x22xf32>
    %322 = vector.broadcast %312 : vector<1x1xf32> to vector<22x22xf32>
    %323 = arith.mulf %322, %321 : vector<22x22xf32>
    %324 = arith.addf %302, %323 : vector<22x22xf32>
    %325 = vector.extract_strided_slice %236 {offsets = [0, 4], sizes = [22, 1], strides = [1, 1]} : vector<22x8xf32> to vector<22x1xf32>
    %326 = vector.extract_strided_slice %44 {offsets = [12, 0], sizes = [1, 22], strides = [1, 1]} : vector<16x22xf32> to vector<1x22xf32>
    %327 = vector.extract_strided_slice %38 {offsets = [2, 4], sizes = [1, 1], strides = [1, 1]} : vector<4x8xf32> to vector<1x1xf32>
    %328 = vector.broadcast %327 : vector<1x1xf32> to vector<22x22xf32>
    %329 = arith.mulf %5, %328 : vector<22x22xf32>
    %330 = vector.extract_strided_slice %38 {offsets = [3, 4], sizes = [1, 1], strides = [1, 1]} : vector<4x8xf32> to vector<1x1xf32>
    %331 = vector.broadcast %330 : vector<1x1xf32> to vector<22x22xf32>
    %332 = arith.mulf %7, %331 : vector<22x22xf32>
    %333 = arith.addf %329, %332 : vector<22x22xf32>
    %334 = vector.extract_strided_slice %39 {offsets = [1, 4], sizes = [1, 1], strides = [1, 1]} : vector<2x8xf32> to vector<1x1xf32>
    %335 = vector.broadcast %325 : vector<22x1xf32> to vector<22x22xf32>
    %336 = vector.broadcast %326 : vector<1x22xf32> to vector<22x22xf32>
    %337 = arith.addf %335, %336 : vector<22x22xf32>
    %338 = arith.addf %337, %333 : vector<22x22xf32>
    %cst_57 = arith.constant 0.000000e+00 : f32
    %339 = vector.broadcast %cst_57 : f32 to vector<22x22xf32>
    %340 = arith.cmpf ogt, %338, %339 : vector<22x22xf32>
    %cst_58 = arith.constant 2.000000e-01 : f32
    %341 = vector.broadcast %cst_58 : f32 to vector<22x22xf32>
    %342 = arith.mulf %341, %338 : vector<22x22xf32>
    %343 = arith.select %340, %338, %342 : vector<22x22xi1>, vector<22x22xf32>
    %344 = vector.broadcast %334 : vector<1x1xf32> to vector<22x22xf32>
    %345 = arith.mulf %344, %343 : vector<22x22xf32>
    %346 = arith.addf %324, %345 : vector<22x22xf32>
    %347 = vector.extract_strided_slice %236 {offsets = [0, 5], sizes = [22, 1], strides = [1, 1]} : vector<22x8xf32> to vector<22x1xf32>
    %348 = vector.extract_strided_slice %44 {offsets = [13, 0], sizes = [1, 22], strides = [1, 1]} : vector<16x22xf32> to vector<1x22xf32>
    %349 = vector.extract_strided_slice %38 {offsets = [2, 5], sizes = [1, 1], strides = [1, 1]} : vector<4x8xf32> to vector<1x1xf32>
    %350 = vector.broadcast %349 : vector<1x1xf32> to vector<22x22xf32>
    %351 = arith.mulf %5, %350 : vector<22x22xf32>
    %352 = vector.extract_strided_slice %38 {offsets = [3, 5], sizes = [1, 1], strides = [1, 1]} : vector<4x8xf32> to vector<1x1xf32>
    %353 = vector.broadcast %352 : vector<1x1xf32> to vector<22x22xf32>
    %354 = arith.mulf %7, %353 : vector<22x22xf32>
    %355 = arith.addf %351, %354 : vector<22x22xf32>
    %356 = vector.extract_strided_slice %39 {offsets = [1, 5], sizes = [1, 1], strides = [1, 1]} : vector<2x8xf32> to vector<1x1xf32>
    %357 = vector.broadcast %347 : vector<22x1xf32> to vector<22x22xf32>
    %358 = vector.broadcast %348 : vector<1x22xf32> to vector<22x22xf32>
    %359 = arith.addf %357, %358 : vector<22x22xf32>
    %360 = arith.addf %359, %355 : vector<22x22xf32>
    %cst_59 = arith.constant 0.000000e+00 : f32
    %361 = vector.broadcast %cst_59 : f32 to vector<22x22xf32>
    %362 = arith.cmpf ogt, %360, %361 : vector<22x22xf32>
    %cst_60 = arith.constant 2.000000e-01 : f32
    %363 = vector.broadcast %cst_60 : f32 to vector<22x22xf32>
    %364 = arith.mulf %363, %360 : vector<22x22xf32>
    %365 = arith.select %362, %360, %364 : vector<22x22xi1>, vector<22x22xf32>
    %366 = vector.broadcast %356 : vector<1x1xf32> to vector<22x22xf32>
    %367 = arith.mulf %366, %365 : vector<22x22xf32>
    %368 = arith.addf %346, %367 : vector<22x22xf32>
    %369 = vector.extract_strided_slice %236 {offsets = [0, 6], sizes = [22, 1], strides = [1, 1]} : vector<22x8xf32> to vector<22x1xf32>
    %370 = vector.extract_strided_slice %44 {offsets = [14, 0], sizes = [1, 22], strides = [1, 1]} : vector<16x22xf32> to vector<1x22xf32>
    %371 = vector.extract_strided_slice %38 {offsets = [2, 6], sizes = [1, 1], strides = [1, 1]} : vector<4x8xf32> to vector<1x1xf32>
    %372 = vector.broadcast %371 : vector<1x1xf32> to vector<22x22xf32>
    %373 = arith.mulf %5, %372 : vector<22x22xf32>
    %374 = vector.extract_strided_slice %38 {offsets = [3, 6], sizes = [1, 1], strides = [1, 1]} : vector<4x8xf32> to vector<1x1xf32>
    %375 = vector.broadcast %374 : vector<1x1xf32> to vector<22x22xf32>
    %376 = arith.mulf %7, %375 : vector<22x22xf32>
    %377 = arith.addf %373, %376 : vector<22x22xf32>
    %378 = vector.extract_strided_slice %39 {offsets = [1, 6], sizes = [1, 1], strides = [1, 1]} : vector<2x8xf32> to vector<1x1xf32>
    %379 = vector.broadcast %369 : vector<22x1xf32> to vector<22x22xf32>
    %380 = vector.broadcast %370 : vector<1x22xf32> to vector<22x22xf32>
    %381 = arith.addf %379, %380 : vector<22x22xf32>
    %382 = arith.addf %381, %377 : vector<22x22xf32>
    %cst_61 = arith.constant 0.000000e+00 : f32
    %383 = vector.broadcast %cst_61 : f32 to vector<22x22xf32>
    %384 = arith.cmpf ogt, %382, %383 : vector<22x22xf32>
    %cst_62 = arith.constant 2.000000e-01 : f32
    %385 = vector.broadcast %cst_62 : f32 to vector<22x22xf32>
    %386 = arith.mulf %385, %382 : vector<22x22xf32>
    %387 = arith.select %384, %382, %386 : vector<22x22xi1>, vector<22x22xf32>
    %388 = vector.broadcast %378 : vector<1x1xf32> to vector<22x22xf32>
    %389 = arith.mulf %388, %387 : vector<22x22xf32>
    %390 = arith.addf %368, %389 : vector<22x22xf32>
    %391 = vector.extract_strided_slice %236 {offsets = [0, 7], sizes = [22, 1], strides = [1, 1]} : vector<22x8xf32> to vector<22x1xf32>
    %392 = vector.extract_strided_slice %44 {offsets = [15, 0], sizes = [1, 22], strides = [1, 1]} : vector<16x22xf32> to vector<1x22xf32>
    %393 = vector.extract_strided_slice %38 {offsets = [2, 7], sizes = [1, 1], strides = [1, 1]} : vector<4x8xf32> to vector<1x1xf32>
    %394 = vector.broadcast %393 : vector<1x1xf32> to vector<22x22xf32>
    %395 = arith.mulf %5, %394 : vector<22x22xf32>
    %396 = vector.extract_strided_slice %38 {offsets = [3, 7], sizes = [1, 1], strides = [1, 1]} : vector<4x8xf32> to vector<1x1xf32>
    %397 = vector.broadcast %396 : vector<1x1xf32> to vector<22x22xf32>
    %398 = arith.mulf %7, %397 : vector<22x22xf32>
    %399 = arith.addf %395, %398 : vector<22x22xf32>
    %400 = vector.extract_strided_slice %39 {offsets = [1, 7], sizes = [1, 1], strides = [1, 1]} : vector<2x8xf32> to vector<1x1xf32>
    %401 = vector.broadcast %391 : vector<22x1xf32> to vector<22x22xf32>
    %402 = vector.broadcast %392 : vector<1x22xf32> to vector<22x22xf32>
    %403 = arith.addf %401, %402 : vector<22x22xf32>
    %404 = arith.addf %403, %399 : vector<22x22xf32>
    %cst_63 = arith.constant 0.000000e+00 : f32
    %405 = vector.broadcast %cst_63 : f32 to vector<22x22xf32>
    %406 = arith.cmpf ogt, %404, %405 : vector<22x22xf32>
    %cst_64 = arith.constant 2.000000e-01 : f32
    %407 = vector.broadcast %cst_64 : f32 to vector<22x22xf32>
    %408 = arith.mulf %407, %404 : vector<22x22xf32>
    %409 = arith.select %406, %404, %408 : vector<22x22xi1>, vector<22x22xf32>
    %410 = vector.broadcast %400 : vector<1x1xf32> to vector<22x22xf32>
    %411 = arith.mulf %410, %409 : vector<22x22xf32>
    %412 = arith.addf %390, %411 : vector<22x22xf32>
    %cst_65 = arith.constant dense<0xFF800000> : vector<22xf32>
    %413 = vector.multi_reduction <maximumf>, %412, %cst_65 [1] : vector<22x22xf32> to vector<22xf32>
    %414 = vector.shape_cast %413 : vector<22xf32> to vector<22x1xf32>
    %415 = vector.broadcast %414 : vector<22x1xf32> to vector<22x22xf32>
    %416 = arith.subf %412, %415 : vector<22x22xf32>
    %417 = math.exp %416 : vector<22x22xf32>
    %cst_66 = arith.constant dense<0.000000e+00> : vector<22xf32>
    %418 = vector.multi_reduction <add>, %417, %cst_66 [1] : vector<22x22xf32> to vector<22xf32>
    %419 = vector.shape_cast %418 : vector<22xf32> to vector<22x1xf32>
    %cst_67 = arith.constant 1.000000e-30 : f32
    %420 = vector.broadcast %cst_67 : f32 to vector<22x1xf32>
    %421 = arith.maximumf %419, %420 : vector<22x1xf32>
    %422 = tpu.reciprocal %421 {approx = true} : vector<22x1xf32> -> vector<22x1xf32>
    %423 = vector.broadcast %422 : vector<22x1xf32> to vector<22x22xf32>
    %424 = arith.mulf %417, %423 : vector<22x22xf32>
    %cst_68 = arith.constant dense<0.000000e+00> : vector<22x8xf32>
    %425 = tpu.matmul %234, %45, %cst_68 {dimension_numbers = #tpu.dot_dimension_numbers<[1], [0], [0], [1], [0, 0, 1, 1], [], []>} : vector<22x22xf32>, vector<22x8xf32>, vector<22x8xf32> -> vector<22x8xf32>
    %cst_69 = arith.constant dense<0.000000e+00> : vector<22x8xf32>
    %426 = tpu.matmul %424, %235, %cst_69 {dimension_numbers = #tpu.dot_dimension_numbers<[1], [0], [0], [1], [0, 0, 1, 1], [], []>} : vector<22x22xf32>, vector<22x8xf32>, vector<22x8xf32> -> vector<22x8xf32>
    %427 = tpu.concatenate %425, %426 in 1 : vector<22x8xf32>, vector<22x8xf32> -> vector<22x16xf32>
    %428 = vector.broadcast %40 : vector<1x16xf32> to vector<22x16xf32>
    %429 = arith.addf %427, %428 : vector<22x16xf32>
    %cst_70 = arith.constant 0.000000e+00 : f32
    %430 = vector.broadcast %cst_70 : f32 to vector<22x16xf32>
    %431 = arith.cmpf ogt, %429, %430 : vector<22x16xf32>
    %cst_71 = arith.constant 1.000000e-01 : f32
    %432 = vector.broadcast %cst_71 : f32 to vector<22x16xf32>
    %433 = arith.mulf %432, %429 : vector<22x16xf32>
    %434 = arith.select %431, %429, %433 : vector<22x16xi1>, vector<22x16xf32>
    %c64 = arith.constant 64 : index
    %c0_72 = arith.constant 0 : index
    %435 = vector.load %arg6[%c64, %c0_72] : memref<296x128xf32, #tpu.memory_space<vmem>>, vector<16x32xf32>
    %c80 = arith.constant 80 : index
    %c0_73 = arith.constant 0 : index
    %436 = vector.load %arg6[%c80, %c0_73] : memref<296x128xf32, #tpu.memory_space<vmem>>, vector<4x8xf32>
    %c88 = arith.constant 88 : index
    %c0_74 = arith.constant 0 : index
    %437 = vector.load %arg6[%c88, %c0_74] : memref<296x128xf32, #tpu.memory_space<vmem>>, vector<2x8xf32>
    %c96 = arith.constant 96 : index
    %c0_75 = arith.constant 0 : index
    %438 = vector.load %arg6[%c96, %c0_75] : memref<296x128xf32, #tpu.memory_space<vmem>>, vector<1x16xf32>
    %cst_76 = arith.constant dense<0.000000e+00> : vector<22x32xf32>
    %439 = tpu.matmul %434, %435, %cst_76 {dimension_numbers = #tpu.dot_dimension_numbers<[1], [0], [0], [1], [0, 0, 1, 1], [], []>} : vector<22x16xf32>, vector<16x32xf32>, vector<22x32xf32> -> vector<22x32xf32>
    %440 = vector.extract_strided_slice %439 {offsets = [0, 0], sizes = [22, 16], strides = [1, 1]} : vector<22x32xf32> to vector<22x16xf32>
    %441 = vector.extract_strided_slice %439 {offsets = [0, 16], sizes = [22, 16], strides = [1, 1]} : vector<22x32xf32> to vector<22x16xf32>
    %cst_77 = arith.constant dense<0.000000e+00> : vector<16x22xf32>
    %442 = tpu.matmul %440, %16, %cst_77 {dimension_numbers = #tpu.dot_dimension_numbers<[0], [0], [1], [1], [0, 1, 1, 1], [], []>} : vector<22x16xf32>, vector<22x22xf32>, vector<16x22xf32> -> vector<16x22xf32>
    %443 = vector.extract_strided_slice %440 {offsets = [0, 0], sizes = [22, 8], strides = [1, 1]} : vector<22x16xf32> to vector<22x8xf32>
    %444 = vector.extract_strided_slice %441 {offsets = [0, 0], sizes = [22, 8], strides = [1, 1]} : vector<22x16xf32> to vector<22x8xf32>
    %445 = vector.extract_strided_slice %444 {offsets = [0, 0], sizes = [22, 1], strides = [1, 1]} : vector<22x8xf32> to vector<22x1xf32>
    %446 = vector.extract_strided_slice %442 {offsets = [0, 0], sizes = [1, 22], strides = [1, 1]} : vector<16x22xf32> to vector<1x22xf32>
    %447 = vector.extract_strided_slice %436 {offsets = [0, 0], sizes = [1, 1], strides = [1, 1]} : vector<4x8xf32> to vector<1x1xf32>
    %448 = vector.broadcast %447 : vector<1x1xf32> to vector<22x22xf32>
    %449 = arith.mulf %5, %448 : vector<22x22xf32>
    %450 = vector.extract_strided_slice %436 {offsets = [1, 0], sizes = [1, 1], strides = [1, 1]} : vector<4x8xf32> to vector<1x1xf32>
    %451 = vector.broadcast %450 : vector<1x1xf32> to vector<22x22xf32>
    %452 = arith.mulf %7, %451 : vector<22x22xf32>
    %453 = arith.addf %449, %452 : vector<22x22xf32>
    %454 = vector.extract_strided_slice %437 {offsets = [0, 0], sizes = [1, 1], strides = [1, 1]} : vector<2x8xf32> to vector<1x1xf32>
    %455 = vector.broadcast %445 : vector<22x1xf32> to vector<22x22xf32>
    %456 = vector.broadcast %446 : vector<1x22xf32> to vector<22x22xf32>
    %457 = arith.addf %455, %456 : vector<22x22xf32>
    %458 = arith.addf %457, %453 : vector<22x22xf32>
    %cst_78 = arith.constant 0.000000e+00 : f32
    %459 = vector.broadcast %cst_78 : f32 to vector<22x22xf32>
    %460 = arith.cmpf ogt, %458, %459 : vector<22x22xf32>
    %cst_79 = arith.constant 2.000000e-01 : f32
    %461 = vector.broadcast %cst_79 : f32 to vector<22x22xf32>
    %462 = arith.mulf %461, %458 : vector<22x22xf32>
    %463 = arith.select %460, %458, %462 : vector<22x22xi1>, vector<22x22xf32>
    %464 = vector.broadcast %454 : vector<1x1xf32> to vector<22x22xf32>
    %465 = arith.mulf %464, %463 : vector<22x22xf32>
    %466 = arith.addf %11, %465 : vector<22x22xf32>
    %467 = vector.extract_strided_slice %444 {offsets = [0, 1], sizes = [22, 1], strides = [1, 1]} : vector<22x8xf32> to vector<22x1xf32>
    %468 = vector.extract_strided_slice %442 {offsets = [1, 0], sizes = [1, 22], strides = [1, 1]} : vector<16x22xf32> to vector<1x22xf32>
    %469 = vector.extract_strided_slice %436 {offsets = [0, 1], sizes = [1, 1], strides = [1, 1]} : vector<4x8xf32> to vector<1x1xf32>
    %470 = vector.broadcast %469 : vector<1x1xf32> to vector<22x22xf32>
    %471 = arith.mulf %5, %470 : vector<22x22xf32>
    %472 = vector.extract_strided_slice %436 {offsets = [1, 1], sizes = [1, 1], strides = [1, 1]} : vector<4x8xf32> to vector<1x1xf32>
    %473 = vector.broadcast %472 : vector<1x1xf32> to vector<22x22xf32>
    %474 = arith.mulf %7, %473 : vector<22x22xf32>
    %475 = arith.addf %471, %474 : vector<22x22xf32>
    %476 = vector.extract_strided_slice %437 {offsets = [0, 1], sizes = [1, 1], strides = [1, 1]} : vector<2x8xf32> to vector<1x1xf32>
    %477 = vector.broadcast %467 : vector<22x1xf32> to vector<22x22xf32>
    %478 = vector.broadcast %468 : vector<1x22xf32> to vector<22x22xf32>
    %479 = arith.addf %477, %478 : vector<22x22xf32>
    %480 = arith.addf %479, %475 : vector<22x22xf32>
    %cst_80 = arith.constant 0.000000e+00 : f32
    %481 = vector.broadcast %cst_80 : f32 to vector<22x22xf32>
    %482 = arith.cmpf ogt, %480, %481 : vector<22x22xf32>
    %cst_81 = arith.constant 2.000000e-01 : f32
    %483 = vector.broadcast %cst_81 : f32 to vector<22x22xf32>
    %484 = arith.mulf %483, %480 : vector<22x22xf32>
    %485 = arith.select %482, %480, %484 : vector<22x22xi1>, vector<22x22xf32>
    %486 = vector.broadcast %476 : vector<1x1xf32> to vector<22x22xf32>
    %487 = arith.mulf %486, %485 : vector<22x22xf32>
    %488 = arith.addf %466, %487 : vector<22x22xf32>
    %489 = vector.extract_strided_slice %444 {offsets = [0, 2], sizes = [22, 1], strides = [1, 1]} : vector<22x8xf32> to vector<22x1xf32>
    %490 = vector.extract_strided_slice %442 {offsets = [2, 0], sizes = [1, 22], strides = [1, 1]} : vector<16x22xf32> to vector<1x22xf32>
    %491 = vector.extract_strided_slice %436 {offsets = [0, 2], sizes = [1, 1], strides = [1, 1]} : vector<4x8xf32> to vector<1x1xf32>
    %492 = vector.broadcast %491 : vector<1x1xf32> to vector<22x22xf32>
    %493 = arith.mulf %5, %492 : vector<22x22xf32>
    %494 = vector.extract_strided_slice %436 {offsets = [1, 2], sizes = [1, 1], strides = [1, 1]} : vector<4x8xf32> to vector<1x1xf32>
    %495 = vector.broadcast %494 : vector<1x1xf32> to vector<22x22xf32>
    %496 = arith.mulf %7, %495 : vector<22x22xf32>
    %497 = arith.addf %493, %496 : vector<22x22xf32>
    %498 = vector.extract_strided_slice %437 {offsets = [0, 2], sizes = [1, 1], strides = [1, 1]} : vector<2x8xf32> to vector<1x1xf32>
    %499 = vector.broadcast %489 : vector<22x1xf32> to vector<22x22xf32>
    %500 = vector.broadcast %490 : vector<1x22xf32> to vector<22x22xf32>
    %501 = arith.addf %499, %500 : vector<22x22xf32>
    %502 = arith.addf %501, %497 : vector<22x22xf32>
    %cst_82 = arith.constant 0.000000e+00 : f32
    %503 = vector.broadcast %cst_82 : f32 to vector<22x22xf32>
    %504 = arith.cmpf ogt, %502, %503 : vector<22x22xf32>
    %cst_83 = arith.constant 2.000000e-01 : f32
    %505 = vector.broadcast %cst_83 : f32 to vector<22x22xf32>
    %506 = arith.mulf %505, %502 : vector<22x22xf32>
    %507 = arith.select %504, %502, %506 : vector<22x22xi1>, vector<22x22xf32>
    %508 = vector.broadcast %498 : vector<1x1xf32> to vector<22x22xf32>
    %509 = arith.mulf %508, %507 : vector<22x22xf32>
    %510 = arith.addf %488, %509 : vector<22x22xf32>
    %511 = vector.extract_strided_slice %444 {offsets = [0, 3], sizes = [22, 1], strides = [1, 1]} : vector<22x8xf32> to vector<22x1xf32>
    %512 = vector.extract_strided_slice %442 {offsets = [3, 0], sizes = [1, 22], strides = [1, 1]} : vector<16x22xf32> to vector<1x22xf32>
    %513 = vector.extract_strided_slice %436 {offsets = [0, 3], sizes = [1, 1], strides = [1, 1]} : vector<4x8xf32> to vector<1x1xf32>
    %514 = vector.broadcast %513 : vector<1x1xf32> to vector<22x22xf32>
    %515 = arith.mulf %5, %514 : vector<22x22xf32>
    %516 = vector.extract_strided_slice %436 {offsets = [1, 3], sizes = [1, 1], strides = [1, 1]} : vector<4x8xf32> to vector<1x1xf32>
    %517 = vector.broadcast %516 : vector<1x1xf32> to vector<22x22xf32>
    %518 = arith.mulf %7, %517 : vector<22x22xf32>
    %519 = arith.addf %515, %518 : vector<22x22xf32>
    %520 = vector.extract_strided_slice %437 {offsets = [0, 3], sizes = [1, 1], strides = [1, 1]} : vector<2x8xf32> to vector<1x1xf32>
    %521 = vector.broadcast %511 : vector<22x1xf32> to vector<22x22xf32>
    %522 = vector.broadcast %512 : vector<1x22xf32> to vector<22x22xf32>
    %523 = arith.addf %521, %522 : vector<22x22xf32>
    %524 = arith.addf %523, %519 : vector<22x22xf32>
    %cst_84 = arith.constant 0.000000e+00 : f32
    %525 = vector.broadcast %cst_84 : f32 to vector<22x22xf32>
    %526 = arith.cmpf ogt, %524, %525 : vector<22x22xf32>
    %cst_85 = arith.constant 2.000000e-01 : f32
    %527 = vector.broadcast %cst_85 : f32 to vector<22x22xf32>
    %528 = arith.mulf %527, %524 : vector<22x22xf32>
    %529 = arith.select %526, %524, %528 : vector<22x22xi1>, vector<22x22xf32>
    %530 = vector.broadcast %520 : vector<1x1xf32> to vector<22x22xf32>
    %531 = arith.mulf %530, %529 : vector<22x22xf32>
    %532 = arith.addf %510, %531 : vector<22x22xf32>
    %533 = vector.extract_strided_slice %444 {offsets = [0, 4], sizes = [22, 1], strides = [1, 1]} : vector<22x8xf32> to vector<22x1xf32>
    %534 = vector.extract_strided_slice %442 {offsets = [4, 0], sizes = [1, 22], strides = [1, 1]} : vector<16x22xf32> to vector<1x22xf32>
    %535 = vector.extract_strided_slice %436 {offsets = [0, 4], sizes = [1, 1], strides = [1, 1]} : vector<4x8xf32> to vector<1x1xf32>
    %536 = vector.broadcast %535 : vector<1x1xf32> to vector<22x22xf32>
    %537 = arith.mulf %5, %536 : vector<22x22xf32>
    %538 = vector.extract_strided_slice %436 {offsets = [1, 4], sizes = [1, 1], strides = [1, 1]} : vector<4x8xf32> to vector<1x1xf32>
    %539 = vector.broadcast %538 : vector<1x1xf32> to vector<22x22xf32>
    %540 = arith.mulf %7, %539 : vector<22x22xf32>
    %541 = arith.addf %537, %540 : vector<22x22xf32>
    %542 = vector.extract_strided_slice %437 {offsets = [0, 4], sizes = [1, 1], strides = [1, 1]} : vector<2x8xf32> to vector<1x1xf32>
    %543 = vector.broadcast %533 : vector<22x1xf32> to vector<22x22xf32>
    %544 = vector.broadcast %534 : vector<1x22xf32> to vector<22x22xf32>
    %545 = arith.addf %543, %544 : vector<22x22xf32>
    %546 = arith.addf %545, %541 : vector<22x22xf32>
    %cst_86 = arith.constant 0.000000e+00 : f32
    %547 = vector.broadcast %cst_86 : f32 to vector<22x22xf32>
    %548 = arith.cmpf ogt, %546, %547 : vector<22x22xf32>
    %cst_87 = arith.constant 2.000000e-01 : f32
    %549 = vector.broadcast %cst_87 : f32 to vector<22x22xf32>
    %550 = arith.mulf %549, %546 : vector<22x22xf32>
    %551 = arith.select %548, %546, %550 : vector<22x22xi1>, vector<22x22xf32>
    %552 = vector.broadcast %542 : vector<1x1xf32> to vector<22x22xf32>
    %553 = arith.mulf %552, %551 : vector<22x22xf32>
    %554 = arith.addf %532, %553 : vector<22x22xf32>
    %555 = vector.extract_strided_slice %444 {offsets = [0, 5], sizes = [22, 1], strides = [1, 1]} : vector<22x8xf32> to vector<22x1xf32>
    %556 = vector.extract_strided_slice %442 {offsets = [5, 0], sizes = [1, 22], strides = [1, 1]} : vector<16x22xf32> to vector<1x22xf32>
    %557 = vector.extract_strided_slice %436 {offsets = [0, 5], sizes = [1, 1], strides = [1, 1]} : vector<4x8xf32> to vector<1x1xf32>
    %558 = vector.broadcast %557 : vector<1x1xf32> to vector<22x22xf32>
    %559 = arith.mulf %5, %558 : vector<22x22xf32>
    %560 = vector.extract_strided_slice %436 {offsets = [1, 5], sizes = [1, 1], strides = [1, 1]} : vector<4x8xf32> to vector<1x1xf32>
    %561 = vector.broadcast %560 : vector<1x1xf32> to vector<22x22xf32>
    %562 = arith.mulf %7, %561 : vector<22x22xf32>
    %563 = arith.addf %559, %562 : vector<22x22xf32>
    %564 = vector.extract_strided_slice %437 {offsets = [0, 5], sizes = [1, 1], strides = [1, 1]} : vector<2x8xf32> to vector<1x1xf32>
    %565 = vector.broadcast %555 : vector<22x1xf32> to vector<22x22xf32>
    %566 = vector.broadcast %556 : vector<1x22xf32> to vector<22x22xf32>
    %567 = arith.addf %565, %566 : vector<22x22xf32>
    %568 = arith.addf %567, %563 : vector<22x22xf32>
    %cst_88 = arith.constant 0.000000e+00 : f32
    %569 = vector.broadcast %cst_88 : f32 to vector<22x22xf32>
    %570 = arith.cmpf ogt, %568, %569 : vector<22x22xf32>
    %cst_89 = arith.constant 2.000000e-01 : f32
    %571 = vector.broadcast %cst_89 : f32 to vector<22x22xf32>
    %572 = arith.mulf %571, %568 : vector<22x22xf32>
    %573 = arith.select %570, %568, %572 : vector<22x22xi1>, vector<22x22xf32>
    %574 = vector.broadcast %564 : vector<1x1xf32> to vector<22x22xf32>
    %575 = arith.mulf %574, %573 : vector<22x22xf32>
    %576 = arith.addf %554, %575 : vector<22x22xf32>
    %577 = vector.extract_strided_slice %444 {offsets = [0, 6], sizes = [22, 1], strides = [1, 1]} : vector<22x8xf32> to vector<22x1xf32>
    %578 = vector.extract_strided_slice %442 {offsets = [6, 0], sizes = [1, 22], strides = [1, 1]} : vector<16x22xf32> to vector<1x22xf32>
    %579 = vector.extract_strided_slice %436 {offsets = [0, 6], sizes = [1, 1], strides = [1, 1]} : vector<4x8xf32> to vector<1x1xf32>
    %580 = vector.broadcast %579 : vector<1x1xf32> to vector<22x22xf32>
    %581 = arith.mulf %5, %580 : vector<22x22xf32>
    %582 = vector.extract_strided_slice %436 {offsets = [1, 6], sizes = [1, 1], strides = [1, 1]} : vector<4x8xf32> to vector<1x1xf32>
    %583 = vector.broadcast %582 : vector<1x1xf32> to vector<22x22xf32>
    %584 = arith.mulf %7, %583 : vector<22x22xf32>
    %585 = arith.addf %581, %584 : vector<22x22xf32>
    %586 = vector.extract_strided_slice %437 {offsets = [0, 6], sizes = [1, 1], strides = [1, 1]} : vector<2x8xf32> to vector<1x1xf32>
    %587 = vector.broadcast %577 : vector<22x1xf32> to vector<22x22xf32>
    %588 = vector.broadcast %578 : vector<1x22xf32> to vector<22x22xf32>
    %589 = arith.addf %587, %588 : vector<22x22xf32>
    %590 = arith.addf %589, %585 : vector<22x22xf32>
    %cst_90 = arith.constant 0.000000e+00 : f32
    %591 = vector.broadcast %cst_90 : f32 to vector<22x22xf32>
    %592 = arith.cmpf ogt, %590, %591 : vector<22x22xf32>
    %cst_91 = arith.constant 2.000000e-01 : f32
    %593 = vector.broadcast %cst_91 : f32 to vector<22x22xf32>
    %594 = arith.mulf %593, %590 : vector<22x22xf32>
    %595 = arith.select %592, %590, %594 : vector<22x22xi1>, vector<22x22xf32>
    %596 = vector.broadcast %586 : vector<1x1xf32> to vector<22x22xf32>
    %597 = arith.mulf %596, %595 : vector<22x22xf32>
    %598 = arith.addf %576, %597 : vector<22x22xf32>
    %599 = vector.extract_strided_slice %444 {offsets = [0, 7], sizes = [22, 1], strides = [1, 1]} : vector<22x8xf32> to vector<22x1xf32>
    %600 = vector.extract_strided_slice %442 {offsets = [7, 0], sizes = [1, 22], strides = [1, 1]} : vector<16x22xf32> to vector<1x22xf32>
    %601 = vector.extract_strided_slice %436 {offsets = [0, 7], sizes = [1, 1], strides = [1, 1]} : vector<4x8xf32> to vector<1x1xf32>
    %602 = vector.broadcast %601 : vector<1x1xf32> to vector<22x22xf32>
    %603 = arith.mulf %5, %602 : vector<22x22xf32>
    %604 = vector.extract_strided_slice %436 {offsets = [1, 7], sizes = [1, 1], strides = [1, 1]} : vector<4x8xf32> to vector<1x1xf32>
    %605 = vector.broadcast %604 : vector<1x1xf32> to vector<22x22xf32>
    %606 = arith.mulf %7, %605 : vector<22x22xf32>
    %607 = arith.addf %603, %606 : vector<22x22xf32>
    %608 = vector.extract_strided_slice %437 {offsets = [0, 7], sizes = [1, 1], strides = [1, 1]} : vector<2x8xf32> to vector<1x1xf32>
    %609 = vector.broadcast %599 : vector<22x1xf32> to vector<22x22xf32>
    %610 = vector.broadcast %600 : vector<1x22xf32> to vector<22x22xf32>
    %611 = arith.addf %609, %610 : vector<22x22xf32>
    %612 = arith.addf %611, %607 : vector<22x22xf32>
    %cst_92 = arith.constant 0.000000e+00 : f32
    %613 = vector.broadcast %cst_92 : f32 to vector<22x22xf32>
    %614 = arith.cmpf ogt, %612, %613 : vector<22x22xf32>
    %cst_93 = arith.constant 2.000000e-01 : f32
    %615 = vector.broadcast %cst_93 : f32 to vector<22x22xf32>
    %616 = arith.mulf %615, %612 : vector<22x22xf32>
    %617 = arith.select %614, %612, %616 : vector<22x22xi1>, vector<22x22xf32>
    %618 = vector.broadcast %608 : vector<1x1xf32> to vector<22x22xf32>
    %619 = arith.mulf %618, %617 : vector<22x22xf32>
    %620 = arith.addf %598, %619 : vector<22x22xf32>
    %cst_94 = arith.constant dense<0xFF800000> : vector<22xf32>
    %621 = vector.multi_reduction <maximumf>, %620, %cst_94 [1] : vector<22x22xf32> to vector<22xf32>
    %622 = vector.shape_cast %621 : vector<22xf32> to vector<22x1xf32>
    %623 = vector.broadcast %622 : vector<22x1xf32> to vector<22x22xf32>
    %624 = arith.subf %620, %623 : vector<22x22xf32>
    %625 = math.exp %624 : vector<22x22xf32>
    %cst_95 = arith.constant dense<0.000000e+00> : vector<22xf32>
    %626 = vector.multi_reduction <add>, %625, %cst_95 [1] : vector<22x22xf32> to vector<22xf32>
    %627 = vector.shape_cast %626 : vector<22xf32> to vector<22x1xf32>
    %cst_96 = arith.constant 1.000000e-30 : f32
    %628 = vector.broadcast %cst_96 : f32 to vector<22x1xf32>
    %629 = arith.maximumf %627, %628 : vector<22x1xf32>
    %630 = tpu.reciprocal %629 {approx = true} : vector<22x1xf32> -> vector<22x1xf32>
    %631 = vector.broadcast %630 : vector<22x1xf32> to vector<22x22xf32>
    %632 = arith.mulf %625, %631 : vector<22x22xf32>
    %633 = vector.extract_strided_slice %440 {offsets = [0, 8], sizes = [22, 8], strides = [1, 1]} : vector<22x16xf32> to vector<22x8xf32>
    %634 = vector.extract_strided_slice %441 {offsets = [0, 8], sizes = [22, 8], strides = [1, 1]} : vector<22x16xf32> to vector<22x8xf32>
    %635 = vector.extract_strided_slice %634 {offsets = [0, 0], sizes = [22, 1], strides = [1, 1]} : vector<22x8xf32> to vector<22x1xf32>
    %636 = vector.extract_strided_slice %442 {offsets = [8, 0], sizes = [1, 22], strides = [1, 1]} : vector<16x22xf32> to vector<1x22xf32>
    %637 = vector.extract_strided_slice %436 {offsets = [2, 0], sizes = [1, 1], strides = [1, 1]} : vector<4x8xf32> to vector<1x1xf32>
    %638 = vector.broadcast %637 : vector<1x1xf32> to vector<22x22xf32>
    %639 = arith.mulf %5, %638 : vector<22x22xf32>
    %640 = vector.extract_strided_slice %436 {offsets = [3, 0], sizes = [1, 1], strides = [1, 1]} : vector<4x8xf32> to vector<1x1xf32>
    %641 = vector.broadcast %640 : vector<1x1xf32> to vector<22x22xf32>
    %642 = arith.mulf %7, %641 : vector<22x22xf32>
    %643 = arith.addf %639, %642 : vector<22x22xf32>
    %644 = vector.extract_strided_slice %437 {offsets = [1, 0], sizes = [1, 1], strides = [1, 1]} : vector<2x8xf32> to vector<1x1xf32>
    %645 = vector.broadcast %635 : vector<22x1xf32> to vector<22x22xf32>
    %646 = vector.broadcast %636 : vector<1x22xf32> to vector<22x22xf32>
    %647 = arith.addf %645, %646 : vector<22x22xf32>
    %648 = arith.addf %647, %643 : vector<22x22xf32>
    %cst_97 = arith.constant 0.000000e+00 : f32
    %649 = vector.broadcast %cst_97 : f32 to vector<22x22xf32>
    %650 = arith.cmpf ogt, %648, %649 : vector<22x22xf32>
    %cst_98 = arith.constant 2.000000e-01 : f32
    %651 = vector.broadcast %cst_98 : f32 to vector<22x22xf32>
    %652 = arith.mulf %651, %648 : vector<22x22xf32>
    %653 = arith.select %650, %648, %652 : vector<22x22xi1>, vector<22x22xf32>
    %654 = vector.broadcast %644 : vector<1x1xf32> to vector<22x22xf32>
    %655 = arith.mulf %654, %653 : vector<22x22xf32>
    %656 = arith.addf %11, %655 : vector<22x22xf32>
    %657 = vector.extract_strided_slice %634 {offsets = [0, 1], sizes = [22, 1], strides = [1, 1]} : vector<22x8xf32> to vector<22x1xf32>
    %658 = vector.extract_strided_slice %442 {offsets = [9, 0], sizes = [1, 22], strides = [1, 1]} : vector<16x22xf32> to vector<1x22xf32>
    %659 = vector.extract_strided_slice %436 {offsets = [2, 1], sizes = [1, 1], strides = [1, 1]} : vector<4x8xf32> to vector<1x1xf32>
    %660 = vector.broadcast %659 : vector<1x1xf32> to vector<22x22xf32>
    %661 = arith.mulf %5, %660 : vector<22x22xf32>
    %662 = vector.extract_strided_slice %436 {offsets = [3, 1], sizes = [1, 1], strides = [1, 1]} : vector<4x8xf32> to vector<1x1xf32>
    %663 = vector.broadcast %662 : vector<1x1xf32> to vector<22x22xf32>
    %664 = arith.mulf %7, %663 : vector<22x22xf32>
    %665 = arith.addf %661, %664 : vector<22x22xf32>
    %666 = vector.extract_strided_slice %437 {offsets = [1, 1], sizes = [1, 1], strides = [1, 1]} : vector<2x8xf32> to vector<1x1xf32>
    %667 = vector.broadcast %657 : vector<22x1xf32> to vector<22x22xf32>
    %668 = vector.broadcast %658 : vector<1x22xf32> to vector<22x22xf32>
    %669 = arith.addf %667, %668 : vector<22x22xf32>
    %670 = arith.addf %669, %665 : vector<22x22xf32>
    %cst_99 = arith.constant 0.000000e+00 : f32
    %671 = vector.broadcast %cst_99 : f32 to vector<22x22xf32>
    %672 = arith.cmpf ogt, %670, %671 : vector<22x22xf32>
    %cst_100 = arith.constant 2.000000e-01 : f32
    %673 = vector.broadcast %cst_100 : f32 to vector<22x22xf32>
    %674 = arith.mulf %673, %670 : vector<22x22xf32>
    %675 = arith.select %672, %670, %674 : vector<22x22xi1>, vector<22x22xf32>
    %676 = vector.broadcast %666 : vector<1x1xf32> to vector<22x22xf32>
    %677 = arith.mulf %676, %675 : vector<22x22xf32>
    %678 = arith.addf %656, %677 : vector<22x22xf32>
    %679 = vector.extract_strided_slice %634 {offsets = [0, 2], sizes = [22, 1], strides = [1, 1]} : vector<22x8xf32> to vector<22x1xf32>
    %680 = vector.extract_strided_slice %442 {offsets = [10, 0], sizes = [1, 22], strides = [1, 1]} : vector<16x22xf32> to vector<1x22xf32>
    %681 = vector.extract_strided_slice %436 {offsets = [2, 2], sizes = [1, 1], strides = [1, 1]} : vector<4x8xf32> to vector<1x1xf32>
    %682 = vector.broadcast %681 : vector<1x1xf32> to vector<22x22xf32>
    %683 = arith.mulf %5, %682 : vector<22x22xf32>
    %684 = vector.extract_strided_slice %436 {offsets = [3, 2], sizes = [1, 1], strides = [1, 1]} : vector<4x8xf32> to vector<1x1xf32>
    %685 = vector.broadcast %684 : vector<1x1xf32> to vector<22x22xf32>
    %686 = arith.mulf %7, %685 : vector<22x22xf32>
    %687 = arith.addf %683, %686 : vector<22x22xf32>
    %688 = vector.extract_strided_slice %437 {offsets = [1, 2], sizes = [1, 1], strides = [1, 1]} : vector<2x8xf32> to vector<1x1xf32>
    %689 = vector.broadcast %679 : vector<22x1xf32> to vector<22x22xf32>
    %690 = vector.broadcast %680 : vector<1x22xf32> to vector<22x22xf32>
    %691 = arith.addf %689, %690 : vector<22x22xf32>
    %692 = arith.addf %691, %687 : vector<22x22xf32>
    %cst_101 = arith.constant 0.000000e+00 : f32
    %693 = vector.broadcast %cst_101 : f32 to vector<22x22xf32>
    %694 = arith.cmpf ogt, %692, %693 : vector<22x22xf32>
    %cst_102 = arith.constant 2.000000e-01 : f32
    %695 = vector.broadcast %cst_102 : f32 to vector<22x22xf32>
    %696 = arith.mulf %695, %692 : vector<22x22xf32>
    %697 = arith.select %694, %692, %696 : vector<22x22xi1>, vector<22x22xf32>
    %698 = vector.broadcast %688 : vector<1x1xf32> to vector<22x22xf32>
    %699 = arith.mulf %698, %697 : vector<22x22xf32>
    %700 = arith.addf %678, %699 : vector<22x22xf32>
    %701 = vector.extract_strided_slice %634 {offsets = [0, 3], sizes = [22, 1], strides = [1, 1]} : vector<22x8xf32> to vector<22x1xf32>
    %702 = vector.extract_strided_slice %442 {offsets = [11, 0], sizes = [1, 22], strides = [1, 1]} : vector<16x22xf32> to vector<1x22xf32>
    %703 = vector.extract_strided_slice %436 {offsets = [2, 3], sizes = [1, 1], strides = [1, 1]} : vector<4x8xf32> to vector<1x1xf32>
    %704 = vector.broadcast %703 : vector<1x1xf32> to vector<22x22xf32>
    %705 = arith.mulf %5, %704 : vector<22x22xf32>
    %706 = vector.extract_strided_slice %436 {offsets = [3, 3], sizes = [1, 1], strides = [1, 1]} : vector<4x8xf32> to vector<1x1xf32>
    %707 = vector.broadcast %706 : vector<1x1xf32> to vector<22x22xf32>
    %708 = arith.mulf %7, %707 : vector<22x22xf32>
    %709 = arith.addf %705, %708 : vector<22x22xf32>
    %710 = vector.extract_strided_slice %437 {offsets = [1, 3], sizes = [1, 1], strides = [1, 1]} : vector<2x8xf32> to vector<1x1xf32>
    %711 = vector.broadcast %701 : vector<22x1xf32> to vector<22x22xf32>
    %712 = vector.broadcast %702 : vector<1x22xf32> to vector<22x22xf32>
    %713 = arith.addf %711, %712 : vector<22x22xf32>
    %714 = arith.addf %713, %709 : vector<22x22xf32>
    %cst_103 = arith.constant 0.000000e+00 : f32
    %715 = vector.broadcast %cst_103 : f32 to vector<22x22xf32>
    %716 = arith.cmpf ogt, %714, %715 : vector<22x22xf32>
    %cst_104 = arith.constant 2.000000e-01 : f32
    %717 = vector.broadcast %cst_104 : f32 to vector<22x22xf32>
    %718 = arith.mulf %717, %714 : vector<22x22xf32>
    %719 = arith.select %716, %714, %718 : vector<22x22xi1>, vector<22x22xf32>
    %720 = vector.broadcast %710 : vector<1x1xf32> to vector<22x22xf32>
    %721 = arith.mulf %720, %719 : vector<22x22xf32>
    %722 = arith.addf %700, %721 : vector<22x22xf32>
    %723 = vector.extract_strided_slice %634 {offsets = [0, 4], sizes = [22, 1], strides = [1, 1]} : vector<22x8xf32> to vector<22x1xf32>
    %724 = vector.extract_strided_slice %442 {offsets = [12, 0], sizes = [1, 22], strides = [1, 1]} : vector<16x22xf32> to vector<1x22xf32>
    %725 = vector.extract_strided_slice %436 {offsets = [2, 4], sizes = [1, 1], strides = [1, 1]} : vector<4x8xf32> to vector<1x1xf32>
    %726 = vector.broadcast %725 : vector<1x1xf32> to vector<22x22xf32>
    %727 = arith.mulf %5, %726 : vector<22x22xf32>
    %728 = vector.extract_strided_slice %436 {offsets = [3, 4], sizes = [1, 1], strides = [1, 1]} : vector<4x8xf32> to vector<1x1xf32>
    %729 = vector.broadcast %728 : vector<1x1xf32> to vector<22x22xf32>
    %730 = arith.mulf %7, %729 : vector<22x22xf32>
    %731 = arith.addf %727, %730 : vector<22x22xf32>
    %732 = vector.extract_strided_slice %437 {offsets = [1, 4], sizes = [1, 1], strides = [1, 1]} : vector<2x8xf32> to vector<1x1xf32>
    %733 = vector.broadcast %723 : vector<22x1xf32> to vector<22x22xf32>
    %734 = vector.broadcast %724 : vector<1x22xf32> to vector<22x22xf32>
    %735 = arith.addf %733, %734 : vector<22x22xf32>
    %736 = arith.addf %735, %731 : vector<22x22xf32>
    %cst_105 = arith.constant 0.000000e+00 : f32
    %737 = vector.broadcast %cst_105 : f32 to vector<22x22xf32>
    %738 = arith.cmpf ogt, %736, %737 : vector<22x22xf32>
    %cst_106 = arith.constant 2.000000e-01 : f32
    %739 = vector.broadcast %cst_106 : f32 to vector<22x22xf32>
    %740 = arith.mulf %739, %736 : vector<22x22xf32>
    %741 = arith.select %738, %736, %740 : vector<22x22xi1>, vector<22x22xf32>
    %742 = vector.broadcast %732 : vector<1x1xf32> to vector<22x22xf32>
    %743 = arith.mulf %742, %741 : vector<22x22xf32>
    %744 = arith.addf %722, %743 : vector<22x22xf32>
    %745 = vector.extract_strided_slice %634 {offsets = [0, 5], sizes = [22, 1], strides = [1, 1]} : vector<22x8xf32> to vector<22x1xf32>
    %746 = vector.extract_strided_slice %442 {offsets = [13, 0], sizes = [1, 22], strides = [1, 1]} : vector<16x22xf32> to vector<1x22xf32>
    %747 = vector.extract_strided_slice %436 {offsets = [2, 5], sizes = [1, 1], strides = [1, 1]} : vector<4x8xf32> to vector<1x1xf32>
    %748 = vector.broadcast %747 : vector<1x1xf32> to vector<22x22xf32>
    %749 = arith.mulf %5, %748 : vector<22x22xf32>
    %750 = vector.extract_strided_slice %436 {offsets = [3, 5], sizes = [1, 1], strides = [1, 1]} : vector<4x8xf32> to vector<1x1xf32>
    %751 = vector.broadcast %750 : vector<1x1xf32> to vector<22x22xf32>
    %752 = arith.mulf %7, %751 : vector<22x22xf32>
    %753 = arith.addf %749, %752 : vector<22x22xf32>
    %754 = vector.extract_strided_slice %437 {offsets = [1, 5], sizes = [1, 1], strides = [1, 1]} : vector<2x8xf32> to vector<1x1xf32>
    %755 = vector.broadcast %745 : vector<22x1xf32> to vector<22x22xf32>
    %756 = vector.broadcast %746 : vector<1x22xf32> to vector<22x22xf32>
    %757 = arith.addf %755, %756 : vector<22x22xf32>
    %758 = arith.addf %757, %753 : vector<22x22xf32>
    %cst_107 = arith.constant 0.000000e+00 : f32
    %759 = vector.broadcast %cst_107 : f32 to vector<22x22xf32>
    %760 = arith.cmpf ogt, %758, %759 : vector<22x22xf32>
    %cst_108 = arith.constant 2.000000e-01 : f32
    %761 = vector.broadcast %cst_108 : f32 to vector<22x22xf32>
    %762 = arith.mulf %761, %758 : vector<22x22xf32>
    %763 = arith.select %760, %758, %762 : vector<22x22xi1>, vector<22x22xf32>
    %764 = vector.broadcast %754 : vector<1x1xf32> to vector<22x22xf32>
    %765 = arith.mulf %764, %763 : vector<22x22xf32>
    %766 = arith.addf %744, %765 : vector<22x22xf32>
    %767 = vector.extract_strided_slice %634 {offsets = [0, 6], sizes = [22, 1], strides = [1, 1]} : vector<22x8xf32> to vector<22x1xf32>
    %768 = vector.extract_strided_slice %442 {offsets = [14, 0], sizes = [1, 22], strides = [1, 1]} : vector<16x22xf32> to vector<1x22xf32>
    %769 = vector.extract_strided_slice %436 {offsets = [2, 6], sizes = [1, 1], strides = [1, 1]} : vector<4x8xf32> to vector<1x1xf32>
    %770 = vector.broadcast %769 : vector<1x1xf32> to vector<22x22xf32>
    %771 = arith.mulf %5, %770 : vector<22x22xf32>
    %772 = vector.extract_strided_slice %436 {offsets = [3, 6], sizes = [1, 1], strides = [1, 1]} : vector<4x8xf32> to vector<1x1xf32>
    %773 = vector.broadcast %772 : vector<1x1xf32> to vector<22x22xf32>
    %774 = arith.mulf %7, %773 : vector<22x22xf32>
    %775 = arith.addf %771, %774 : vector<22x22xf32>
    %776 = vector.extract_strided_slice %437 {offsets = [1, 6], sizes = [1, 1], strides = [1, 1]} : vector<2x8xf32> to vector<1x1xf32>
    %777 = vector.broadcast %767 : vector<22x1xf32> to vector<22x22xf32>
    %778 = vector.broadcast %768 : vector<1x22xf32> to vector<22x22xf32>
    %779 = arith.addf %777, %778 : vector<22x22xf32>
    %780 = arith.addf %779, %775 : vector<22x22xf32>
    %cst_109 = arith.constant 0.000000e+00 : f32
    %781 = vector.broadcast %cst_109 : f32 to vector<22x22xf32>
    %782 = arith.cmpf ogt, %780, %781 : vector<22x22xf32>
    %cst_110 = arith.constant 2.000000e-01 : f32
    %783 = vector.broadcast %cst_110 : f32 to vector<22x22xf32>
    %784 = arith.mulf %783, %780 : vector<22x22xf32>
    %785 = arith.select %782, %780, %784 : vector<22x22xi1>, vector<22x22xf32>
    %786 = vector.broadcast %776 : vector<1x1xf32> to vector<22x22xf32>
    %787 = arith.mulf %786, %785 : vector<22x22xf32>
    %788 = arith.addf %766, %787 : vector<22x22xf32>
    %789 = vector.extract_strided_slice %634 {offsets = [0, 7], sizes = [22, 1], strides = [1, 1]} : vector<22x8xf32> to vector<22x1xf32>
    %790 = vector.extract_strided_slice %442 {offsets = [15, 0], sizes = [1, 22], strides = [1, 1]} : vector<16x22xf32> to vector<1x22xf32>
    %791 = vector.extract_strided_slice %436 {offsets = [2, 7], sizes = [1, 1], strides = [1, 1]} : vector<4x8xf32> to vector<1x1xf32>
    %792 = vector.broadcast %791 : vector<1x1xf32> to vector<22x22xf32>
    %793 = arith.mulf %5, %792 : vector<22x22xf32>
    %794 = vector.extract_strided_slice %436 {offsets = [3, 7], sizes = [1, 1], strides = [1, 1]} : vector<4x8xf32> to vector<1x1xf32>
    %795 = vector.broadcast %794 : vector<1x1xf32> to vector<22x22xf32>
    %796 = arith.mulf %7, %795 : vector<22x22xf32>
    %797 = arith.addf %793, %796 : vector<22x22xf32>
    %798 = vector.extract_strided_slice %437 {offsets = [1, 7], sizes = [1, 1], strides = [1, 1]} : vector<2x8xf32> to vector<1x1xf32>
    %799 = vector.broadcast %789 : vector<22x1xf32> to vector<22x22xf32>
    %800 = vector.broadcast %790 : vector<1x22xf32> to vector<22x22xf32>
    %801 = arith.addf %799, %800 : vector<22x22xf32>
    %802 = arith.addf %801, %797 : vector<22x22xf32>
    %cst_111 = arith.constant 0.000000e+00 : f32
    %803 = vector.broadcast %cst_111 : f32 to vector<22x22xf32>
    %804 = arith.cmpf ogt, %802, %803 : vector<22x22xf32>
    %cst_112 = arith.constant 2.000000e-01 : f32
    %805 = vector.broadcast %cst_112 : f32 to vector<22x22xf32>
    %806 = arith.mulf %805, %802 : vector<22x22xf32>
    %807 = arith.select %804, %802, %806 : vector<22x22xi1>, vector<22x22xf32>
    %808 = vector.broadcast %798 : vector<1x1xf32> to vector<22x22xf32>
    %809 = arith.mulf %808, %807 : vector<22x22xf32>
    %810 = arith.addf %788, %809 : vector<22x22xf32>
    %cst_113 = arith.constant dense<0xFF800000> : vector<22xf32>
    %811 = vector.multi_reduction <maximumf>, %810, %cst_113 [1] : vector<22x22xf32> to vector<22xf32>
    %812 = vector.shape_cast %811 : vector<22xf32> to vector<22x1xf32>
    %813 = vector.broadcast %812 : vector<22x1xf32> to vector<22x22xf32>
    %814 = arith.subf %810, %813 : vector<22x22xf32>
    %815 = math.exp %814 : vector<22x22xf32>
    %cst_114 = arith.constant dense<0.000000e+00> : vector<22xf32>
    %816 = vector.multi_reduction <add>, %815, %cst_114 [1] : vector<22x22xf32> to vector<22xf32>
    %817 = vector.shape_cast %816 : vector<22xf32> to vector<22x1xf32>
    %cst_115 = arith.constant 1.000000e-30 : f32
    %818 = vector.broadcast %cst_115 : f32 to vector<22x1xf32>
    %819 = arith.maximumf %817, %818 : vector<22x1xf32>
    %820 = tpu.reciprocal %819 {approx = true} : vector<22x1xf32> -> vector<22x1xf32>
    %821 = vector.broadcast %820 : vector<22x1xf32> to vector<22x22xf32>
    %822 = arith.mulf %815, %821 : vector<22x22xf32>
    %cst_116 = arith.constant dense<0.000000e+00> : vector<22x8xf32>
    %823 = tpu.matmul %632, %443, %cst_116 {dimension_numbers = #tpu.dot_dimension_numbers<[1], [0], [0], [1], [0, 0, 1, 1], [], []>} : vector<22x22xf32>, vector<22x8xf32>, vector<22x8xf32> -> vector<22x8xf32>
    %cst_117 = arith.constant dense<0.000000e+00> : vector<22x8xf32>
    %824 = tpu.matmul %822, %633, %cst_117 {dimension_numbers = #tpu.dot_dimension_numbers<[1], [0], [0], [1], [0, 0, 1, 1], [], []>} : vector<22x22xf32>, vector<22x8xf32>, vector<22x8xf32> -> vector<22x8xf32>
    %825 = tpu.concatenate %823, %824 in 1 : vector<22x8xf32>, vector<22x8xf32> -> vector<22x16xf32>
    %826 = vector.broadcast %438 : vector<1x16xf32> to vector<22x16xf32>
    %827 = arith.addf %825, %826 : vector<22x16xf32>
    %cst_118 = arith.constant dense<0.000000e+00> : vector<16xf32>
    %828 = vector.multi_reduction <add>, %827, %cst_118 [0] : vector<22x16xf32> to vector<16xf32>
    %829 = vector.shape_cast %828 : vector<16xf32> to vector<1x16xf32>
    %c104 = arith.constant 104 : index
    %c0_119 = arith.constant 0 : index
    %830 = vector.load %arg6[%c104, %c0_119] : memref<296x128xf32, #tpu.memory_space<vmem>>, vector<16x64xf32>
    %c120 = arith.constant 120 : index
    %c0_120 = arith.constant 0 : index
    %831 = vector.load %arg6[%c120, %c0_120] : memref<296x128xf32, #tpu.memory_space<vmem>>, vector<1x64xf32>
    %cst_121 = arith.constant dense<0.000000e+00> : vector<1x64xf32>
    %832 = tpu.matmul %829, %830, %cst_121 {dimension_numbers = #tpu.dot_dimension_numbers<[1], [0], [0], [1], [0, 0, 1, 1], [], []>} : vector<1x16xf32>, vector<16x64xf32>, vector<1x64xf32> -> vector<1x64xf32>
    %833 = arith.addf %832, %831 : vector<1x64xf32>
    %cst_122 = arith.constant 0.000000e+00 : f32
    %834 = vector.broadcast %cst_122 : f32 to vector<1x64xf32>
    %835 = arith.maximumf %833, %834 : vector<1x64xf32>
    %c128 = arith.constant 128 : index
    %c0_123 = arith.constant 0 : index
    %836 = vector.load %arg6[%c128, %c0_123] : memref<296x128xf32, #tpu.memory_space<vmem>>, vector<64x16xf32>
    %c192 = arith.constant 192 : index
    %c0_124 = arith.constant 0 : index
    %837 = vector.load %arg6[%c192, %c0_124] : memref<296x128xf32, #tpu.memory_space<vmem>>, vector<1x16xf32>
    %cst_125 = arith.constant dense<0.000000e+00> : vector<1x16xf32>
    %838 = tpu.matmul %835, %836, %cst_125 {dimension_numbers = #tpu.dot_dimension_numbers<[1], [0], [0], [1], [0, 0, 1, 1], [], []>} : vector<1x64xf32>, vector<64x16xf32>, vector<1x16xf32> -> vector<1x16xf32>
    %839 = arith.addf %838, %837 : vector<1x16xf32>
    %c0_126 = arith.constant 0 : index
    %c0_127 = arith.constant 0 : index
    %c0_128 = arith.constant 0 : index
    %840 = vector.load %arg4[%c0_126, %c0_127, %c0_128] : memref<1x1x6xf32, #tpu.memory_space<vmem>>, vector<1x1x6xf32>
    %841 = vector.shape_cast %840 : vector<1x1x6xf32> to vector<1x6xf32>
    %c200 = arith.constant 200 : index
    %c0_129 = arith.constant 0 : index
    %842 = vector.load %arg6[%c200, %c0_129] : memref<296x128xf32, #tpu.memory_space<vmem>>, vector<6x8xf32>
    %c208 = arith.constant 208 : index
    %c0_130 = arith.constant 0 : index
    %843 = vector.load %arg6[%c208, %c0_130] : memref<296x128xf32, #tpu.memory_space<vmem>>, vector<1x8xf32>
    %cst_131 = arith.constant dense<0.000000e+00> : vector<1x8xf32>
    %844 = tpu.matmul %841, %842, %cst_131 {dimension_numbers = #tpu.dot_dimension_numbers<[1], [0], [0], [1], [0, 0, 1, 1], [], []>} : vector<1x6xf32>, vector<6x8xf32>, vector<1x8xf32> -> vector<1x8xf32>
    %845 = arith.addf %844, %843 : vector<1x8xf32>
    %cst_132 = arith.constant 0.000000e+00 : f32
    %846 = vector.broadcast %cst_132 : f32 to vector<1x8xf32>
    %847 = arith.maximumf %845, %846 : vector<1x8xf32>
    %848 = tpu.concatenate %839, %847 in 1 : vector<1x16xf32>, vector<1x8xf32> -> vector<1x24xf32>
    %c216 = arith.constant 216 : index
    %c0_133 = arith.constant 0 : index
    %849 = vector.load %arg6[%c216, %c0_133] : memref<296x128xf32, #tpu.memory_space<vmem>>, vector<24x24xf32>
    %c240 = arith.constant 240 : index
    %c0_134 = arith.constant 0 : index
    %850 = vector.load %arg6[%c240, %c0_134] : memref<296x128xf32, #tpu.memory_space<vmem>>, vector<1x24xf32>
    %cst_135 = arith.constant dense<0.000000e+00> : vector<1x24xf32>
    %851 = tpu.matmul %848, %849, %cst_135 {dimension_numbers = #tpu.dot_dimension_numbers<[1], [0], [0], [1], [0, 0, 1, 1], [], []>} : vector<1x24xf32>, vector<24x24xf32>, vector<1x24xf32> -> vector<1x24xf32>
    %852 = arith.addf %851, %850 : vector<1x24xf32>
    %cst_136 = arith.constant 0.000000e+00 : f32
    %853 = vector.broadcast %cst_136 : f32 to vector<1x24xf32>
    %854 = arith.cmpf ogt, %852, %853 : vector<1x24xf32>
    %cst_137 = arith.constant 1.000000e-01 : f32
    %855 = vector.broadcast %cst_137 : f32 to vector<1x24xf32>
    %856 = arith.mulf %855, %852 : vector<1x24xf32>
    %857 = arith.select %854, %852, %856 : vector<1x24xi1>, vector<1x24xf32>
    %c248 = arith.constant 248 : index
    %c0_138 = arith.constant 0 : index
    %858 = vector.load %arg6[%c248, %c0_138] : memref<296x128xf32, #tpu.memory_space<vmem>>, vector<24x8xf32>
    %c272 = arith.constant 272 : index
    %c0_139 = arith.constant 0 : index
    %859 = vector.load %arg6[%c272, %c0_139] : memref<296x128xf32, #tpu.memory_space<vmem>>, vector<1x8xf32>
    %cst_140 = arith.constant dense<0.000000e+00> : vector<1x8xf32>
    %860 = tpu.matmul %857, %858, %cst_140 {dimension_numbers = #tpu.dot_dimension_numbers<[1], [0], [0], [1], [0, 0, 1, 1], [], []>} : vector<1x24xf32>, vector<24x8xf32>, vector<1x8xf32> -> vector<1x8xf32>
    %861 = arith.addf %860, %859 : vector<1x8xf32>
    %cst_141 = arith.constant 0.000000e+00 : f32
    %862 = vector.broadcast %cst_141 : f32 to vector<1x8xf32>
    %863 = arith.cmpf ogt, %861, %862 : vector<1x8xf32>
    %cst_142 = arith.constant 1.000000e-01 : f32
    %864 = vector.broadcast %cst_142 : f32 to vector<1x8xf32>
    %865 = arith.mulf %864, %861 : vector<1x8xf32>
    %866 = arith.select %863, %861, %865 : vector<1x8xi1>, vector<1x8xf32>
    %c0_143 = arith.constant 0 : index
    %c0_144 = arith.constant 0 : index
    %c0_145 = arith.constant 0 : index
    %867 = vector.load %arg5[%c0_143, %c0_144, %c0_145] : memref<1x1x8xf32, #tpu.memory_space<vmem>>, vector<1x1x8xf32>
    %868 = vector.shape_cast %867 : vector<1x1x8xf32> to vector<1x8xf32>
    %869 = arith.mulf %866, %868 : vector<1x8xf32>
    %c280 = arith.constant 280 : index
    %c0_146 = arith.constant 0 : index
    %870 = vector.load %arg6[%c280, %c0_146] : memref<296x128xf32, #tpu.memory_space<vmem>>, vector<8x3xf32>
    %c288 = arith.constant 288 : index
    %c0_147 = arith.constant 0 : index
    %871 = vector.load %arg6[%c288, %c0_147] : memref<296x128xf32, #tpu.memory_space<vmem>>, vector<1x3xf32>
    %cst_148 = arith.constant dense<0.000000e+00> : vector<1x3xf32>
    %872 = tpu.matmul %869, %870, %cst_148 {dimension_numbers = #tpu.dot_dimension_numbers<[1], [0], [0], [1], [0, 0, 1, 1], [], []>} : vector<1x8xf32>, vector<8x3xf32>, vector<1x3xf32> -> vector<1x3xf32>
    %873 = arith.addf %872, %871 : vector<1x3xf32>
    %cst_149 = arith.constant dense<0xFF800000> : vector<1xf32>
    %874 = vector.multi_reduction <maximumf>, %873, %cst_149 [1] : vector<1x3xf32> to vector<1xf32>
    %875 = vector.shape_cast %874 : vector<1xf32> to vector<1x1xf32>
    %876 = vector.broadcast %875 : vector<1x1xf32> to vector<1x3xf32>
    %877 = arith.subf %873, %876 : vector<1x3xf32>
    %878 = math.exp %877 : vector<1x3xf32>
    %cst_150 = arith.constant dense<0.000000e+00> : vector<1xf32>
    %879 = vector.multi_reduction <add>, %878, %cst_150 [1] : vector<1x3xf32> to vector<1xf32>
    %880 = vector.shape_cast %879 : vector<1xf32> to vector<1x1xf32>
    %881 = vector.broadcast %880 : vector<1x1xf32> to vector<1x3xf32>
    %882 = arith.divf %878, %881 : vector<1x3xf32>
    %c0_151 = arith.constant 0 : index
    %c0_152 = arith.constant 0 : index
    %c0_153 = arith.constant 0 : index
    %883 = vector.load %arg7[%c0_151, %c0_152, %c0_153] : memref<1x1x3xf32, #tpu.memory_space<vmem>>, vector<1x1x3xf32>
    %884 = vector.shape_cast %883 : vector<1x1x3xf32> to vector<1x3xf32>
    %885 = vector.shape_cast %882 : vector<1x3xf32> to vector<1x1x3xf32>
    tpu.vector_store %arg7[%c0_151, %c0_152, %c0_153], %885 {strides = array<i32>} : memref<1x1x3xf32, #tpu.memory_space<vmem>>, vector<1x1x3xf32>,
    return
  }
  func.func @transform_0(%arg0: i32) -> (i32, i32, i32) {
    %c0_i32 = arith.constant 0 : i32
    %c0_i32_0 = arith.constant 0 : i32
    %c0_i32_1 = arith.constant 0 : i32
    return %arg0, %c0_i32, %c0_i32_0 : i32, i32, i32
  }
  func.func @transform_1(%arg0: i32) -> (i32, i32, i32, i32) {
    %c0_i32 = arith.constant 0 : i32
    %c0_i32_0 = arith.constant 0 : i32
    %c0_i32_1 = arith.constant 0 : i32
    %c0_i32_2 = arith.constant 0 : i32
    return %arg0, %c0_i32, %c0_i32_0, %c0_i32_1 : i32, i32, i32, i32
  }
  func.func @transform_2(%arg0: i32) -> (i32, i32, i32) {
    %c0_i32 = arith.constant 0 : i32
    %c0_i32_0 = arith.constant 0 : i32
    %c0_i32_1 = arith.constant 0 : i32
    return %arg0, %c0_i32, %c0_i32_0 : i32, i32, i32
  }
  func.func @transform_3(%arg0: i32) -> (i32, i32, i32) {
    %c0_i32 = arith.constant 0 : i32
    %c0_i32_0 = arith.constant 0 : i32
    %c0_i32_1 = arith.constant 0 : i32
    return %arg0, %c0_i32, %c0_i32_0 : i32, i32, i32
  }
  func.func @transform_4(%arg0: i32) -> (i32, i32, i32) {
    %c0_i32 = arith.constant 0 : i32
    %c0_i32_0 = arith.constant 0 : i32
    %c0_i32_1 = arith.constant 0 : i32
    return %arg0, %c0_i32, %c0_i32_0 : i32, i32, i32
  }
  func.func @transform_5(%arg0: i32) -> (i32, i32) {
    %c0_i32 = arith.constant 0 : i32
    %c0_i32_0 = arith.constant 0 : i32
    %c0_i32_1 = arith.constant 0 : i32
    return %c0_i32, %c0_i32_0 : i32, i32
  }
  func.func @transform_6(%arg0: i32) -> (i32, i32, i32) {
    %c0_i32 = arith.constant 0 : i32
    %c0_i32_0 = arith.constant 0 : i32
    %c0_i32_1 = arith.constant 0 : i32
    return %arg0, %c0_i32, %c0_i32_0 : i32, i32, i32
  }
}

</mosaic_0001>

<bundles_post_ra>
// kernel: sports_gnn_forward.1
= control target key start
LH: loop header
LB: loop body
LE: loop exit
PB: predicated region body
PF: predicated region fallthrough
CT: control target
= control target key end

     0   :  { %s7468_s0 = inlined_call_operand.vmem [shape: f32[2,22,3], index: 0, kind: input, shape index: {}]   ;;  %s7469_s1 = inlined_call_operand.vmem [shape: f32[2,2,22,22], index: 1, kind: input, shape index: {}]   ;;  %s7470_s2 = inlined_call_operand.vmem [shape: f32[2,22,22], index: 2, kind: input, shape index: {}]   ;;  %s7471_s3 = inlined_call_operand.vmem [shape: f32[2,1,6], index: 3, kind: input, shape index: {}]   ;;  %s7472_s4 = inlined_call_operand.vmem [shape: f32[2,1,8], index: 4, kind: input, shape index: {}]   ;;  %s7473_s5 = inlined_call_operand.vmem [shape: f32[296,128], index: 5, kind: input, shape index: {}]   ;;  %s7474_s6 = inlined_call_operand.hbm [shape: f32[2,1,3], index: 6, kind: output, shape index: {}]  }
   0x1   :  { %7589 = sst [smem:[#allocation91_spill]] %s7468_s0 }
   0x2   :  { %7590 = sst [smem:[#allocation92_spill]] %s7472_s4 }
   0x3   :  { %7591 = sst [smem:[#allocation93_spill]] %s7474_s6 }
   0x4   :  { %11 = vsyncpa [#allocation3], 0 }
   0x5   :  { %13 = vsyncpa [#allocation3 + $0x1], 0  ;;  %s5043_s21 = smov 0   ;;  %s5045_s22 = smov 0  }
   0x6   :  { %s5047_s23 = smov 0   ;;  %s5049_s24 = smov 0  }
   0x7 LB: > { %7592 = sst [smem:[#allocation5_spill]] %s4963_s21  ;;  %s5064_s25 = sadd.s32 4294967295, %s4975_s24   ;;  %s4975_s24 = sphi %s5049_s24, %s7942_s24   ;;  %s4971_s23 = sphi %s5047_s23, %s7945_s23   ;;  %s4967_s22 = sphi %s5045_s22, %s7944_s22   ;;  %s4963_s21 = sphi %s5043_s21, %s7943_s21  }
   0x8   : > { %7593 = sst [smem:[#allocation6_spill]] %s4967_s22  ;;  %s4127_s26 = sadd.s32 4294967294, %s4975_s24  }
   0x9   : > { %7594 = sst [smem:[#allocation7_spill]] %s4971_s23  ;;  %s5068_s27 = sadd.s32 1, %s4975_s24  }
   0xa   : > { %7595 = sst [smem:[#allocation8_spill]] %s4975_s24  ;;  %s177_s28 = sadd.s32 1, %s4971_s23 }
   0xb   : > { %7596 = sst [smem:[#allocation9_spill]] %s5064_s25  ;;  %s174_s29 = ssub.s32 %s4975_s24, %s5068_s27 }
   0xc   : > { %7597 = sst [smem:[#allocation10_spill]] %s5068_s27  ;;  %p187_p0 = scmp.ne.s32.totalorder %s4971_s23, %s4967_s22 }
   0xd   : > { %p175_p1 = scmp.eq.s32.totalorder %s174_s29, 0  ;;  %p188_p2 = scmp.eq.s32.totalorder %s5064_s25, 1 }
   0xe   : > { %p193_p3 = scmp.ne.s32.totalorder %s4967_s22, %s4963_s21  ;;  %p194_p4 = scmp.eq.s32.totalorder %s4127_s26, 1 }
   0xf   : > { %s5079_s30 = scalar_select %p175_p1, %s4971_s23, %s177_s28  }
  0x10   : > { %p5081_p5 = por %p188_p2, %p187_p0  ;;  %p5085_p6 = por %p194_p4, %p193_p3 }
  0x11   : > { %7598 = sst [smem:[#allocation11_spill]] %s5079_s30  ;;  %p4130_p7 = scmp.ge.s32.totalorder %s4975_s24, 1 }
  0x12   : > { %s7599_s7 = scalar_select %p5081_p5, 1, 0 }
  0x13   : > { %s7601_s8 = scalar_select %p5085_p6, 1, 0 }
  0x14   : > { %7600 = sst [smem:[#allocation12_spill]] %s7599_s7  ;;  %p251_p8 = scmp.lt.s32.totalorder %s4975_s24, 3 }
  0x15   : > { %7602 = sst [smem:[#allocation13_spill]] %s7601_s8 }
  0x16   : > { %p252_p9 = pnand %p4130_p7, %p251_p8 }
  0x18   : > { %255 = sbr.rel (%p252_p9) target bundleno = 4416 (0x1140), region = 44 }
  0x1f   : > { %v351_v0 = vld [vmem:[%s7473_s5] sm:$0x7]  ;;  %vm367_vm0 = vcmask 1042432   ;;  %p296_p10 = scmp.lt.s32.totalorder %s5064_s25, 1  ;;  %v7537_v1 = vmov 0.0   ;;  %vm4978_vm1 = vmmov 0   ;;  %v336_v49 = vlaneseq }
  0x20   : > { %4268 = vmatprep.subr.mxu0 %v7537_v1  ;;  %4270 = vmatprep.mubr.msk.f32.mxu0 %vm4978_vm1, %v7537_v1  ;;  %vm357_vm2 = vcmask 23552   ;;  %s7603_s0 = sld [smem:[#allocation91_spill]]  ;;  %v460_v5 = vld [vmem:[%s7473_s5 + $0x10] sm:$0xff]  ;;  %v565_v6 = vld [vmem:[%s7473_s5 + $0x20] sm:$0xff]  ;;  %v4140_v7 = vld [vmem:[%s7473_s5 + $0x8] ss:$0 sm:$0xff] }
  0x21   : > { %4269 = vmatpush3.msk.msra.mxu0 %vm367_vm0, %v351_v0  ;;  %s5099_s11 = scalar_select %p296_p10, %s5064_s25, 1  ;;  %4279 = vmatprep.subr.mxu1 %v7537_v1  ;;  %vm466_vm4 = vcmask 64512   ;;  %v5136_v23 = vld [vmem:[%s7473_s5 + $0x28] sm:$0xf]  ;;  %v5147_v25 = vld [vmem:[%s7473_s5 + $0x30] sm:$0x3] }
  0x22   : > { %4281 = vmatprep.mubr.msk.f32.mxu1 %vm4978_vm1, %v7537_v1  ;;  %4290 = vmatprep.subr.mxu0 %v7537_v1  ;;  %s7487_s9 = smov 127   ;;  %v5141_v24 = vrot.slane %v5136_v23, 1  ;;  %4492 = vpush %v5136_v23  ;;  %v7527_v26 = vmov 24   ;;  %s7485_s14 = smov 126   ;;  %v5185_v27 = vrot.slane %v5136_v23, 3  ;;  %v5190_v28 = vrot.slane %v5136_v23, 2 }
  0x23   : > { %s7489_s12 = smul.u32 24, %s5099_s11  ;;  %4280 = vmatpush3.msra.mxu1 %v460_v5  ;;  %837 = vrot.lane.b32.xlu1 %v5136_v23, %s7487_s9  ;;  %s7481_s16 = smov 124   ;;  %v5195_v29 = vrot.slane %v5147_v25, 1  ;;  %v4145_v30 = vld [vmem:[%s7473_s5 + $0x18] ss:$0 sm:$0xff]  ;;  %v5225_v50 = vshrl.u32 %v336_v49, 7 }
  0x24   : > { %4753 = vset.pattern.permute.xlu1 %v7527_v26  ;;  %4494 = vpush %v5141_v24  ;;  %s7479_s17 = smov 123   ;;  %s7477_s18 = smov 122   ;;  %v341_v52 = vand.u32 127, %v336_v49  ;;  %v7604_v53 = vmov 0  ;;  %v7535_v54 = vmov 1.0|1.0  }
  0x25   : > { %4496 = vpush %v5147_v25  ;;  %s7475_s19 = smov 121   ;;  %v338_v51 = vadd.s32 8, %v5225_v50  ;;  %v339_v55 = vadd.s32 16, %v5225_v50  ;;  %vm697_vm14 = vcmask 1045504   ;;  %v7533_v63 = vmov 0.0|0.0   ;;  %s7616_s27 = smul.u32 24, %s5099_s11 }
  0x26   : > { %s300_s15 = scalar_lea.vmem %s7603_s0, %s7489_s12  ;;  %vm342_vm10 = vcmp.eq.s32.totalorder %v5225_v50, %v341_v52  ;;  %v7519_v5 = vmov 28   ;;  %vm690_vm15 = vcmask 179200   ;;  %s4491_s0 = smul.u32 48, %s5099_s11 }
  0x27   : > { %v317_v2 = vld [vmem:[%s300_s15] sm:$0xff]  ;;  %v318_v3 = vld [vmem:[%s300_s15 + $0x8] sm:$0xff]  ;;  %v319_v4 = vld [vmem:[%s300_s15 + $0x10] sm:$0x3f]  ;;  %845 = vrot.lane.b32.xlu1 %v5141_v24, %s7487_s9  ;;  %s7483_s15 = smov 125   ;;  %vm343_vm11 = vcmp.eq.s32.totalorder %v338_v51, %v341_v52  ;;  %vm344_vm13 = vcmp.eq.s32.totalorder %v339_v55, %v341_v52  ;;  %s310_s24 = scalar_lea.vmem %s7470_s2, %s7616_s27 }
  0x28   : > { %4271 = vmatmul.mubr.msk.f32.vlgmr.msra.gmra.mrb[0].mxu0 %vm357_vm2, %v317_v2  ;;  %vm5229_vm12 = vmpackc.low %vm343_vm11, %vm342_vm10  ;;  %v5245_v58 = vsel %vm344_vm13, 1.0, %v7537_v1  ;;  %v7523_v2 = vmov 26   ;;  %s5504_s22 = scalar_lea.vmem %s7469_s1, %s4491_s0 }
  0x29   : > { %4273 = vmatprep.mubr.msk.f32.mxu0 %vm4978_vm1, %v7537_v1  ;;  %4291 = vmatpush3.msra.mxu0 %v565_v6  ;;  %v7605_v53 = vsel %vm5229_vm12, 4294967295, %v7604_v53  ;;  %7608 = vst [vmem:[#allocation16_spill] sm:$0xff] %v5245_v58  ;;  %v7507_v6 = vmov 29  }
  0x2a   : > { %7606 = vst [vmem:[#allocation14_spill] sm:$0xff] %v7605_v53  ;;  %4447 = vmatprep.subr.msk.bf16.mxu1 %vm5229_vm12, %v7535_v54  ;;  %4453 = vmatprep.subr.bf16.mxu0 %v7533_v63 }
  0x2b   : > { %887 = vrot.lane.b32.xlu1 %v5147_v25, %s7487_s9 }
  0x2c   : > { %4274 = vmatmul.mubr.msk.f32.gmra.mrb[2].mxu0 %vm357_vm2, %v318_v3 }
  0x2d   : > { %4276 = vmatprep.mubr.msk.f32.mxu0 %vm4978_vm1, %v7537_v1 }
  0x2f   : > { %906 = vrot.lane.b32.xlu1 %v5141_v24, %s7485_s14 }
  0x30   : > { %4277 = vmatmul.mubr.msk.f32.gmra.mrb[4].mxu0 %vm357_vm2, %v319_v4  ;;  %v7521_v4 = vmov 27  }
  0x31   : > { %4292 = vmatprep.mubr.msk.f32.mxu0 %vm4978_vm1, %v7537_v1 }
  0x33   : > { %948 = vrot.lane.b32.xlu1 %v5147_v25, %s7485_s14 }
  0x37   : > { %959 = vrot.lane.b32.xlu1 %v5136_v23, %s7483_s15 }
  0x3b   : > { %967 = vrot.lane.b32.xlu1 %v5141_v24, %s7483_s15 }
  0x3f   : > { %1009 = vrot.lane.b32.xlu1 %v5147_v25, %s7483_s15 }
  0x43   : > { %1020 = vrot.lane.b32.xlu1 %v5136_v23, %s7481_s16 }
  0x47   : > { %1028 = vrot.lane.b32.xlu1 %v5141_v24, %s7481_s16 }
  0x4b   : > { %1070 = vrot.lane.b32.xlu1 %v5147_v25, %s7481_s16 }
  0x4f   : > { %1081 = vrot.lane.b32.xlu1 %v5136_v23, %s7479_s17 }
  0x53   : > { %1089 = vrot.lane.b32.xlu1 %v5141_v24, %s7479_s17  ;;  %s5447_s28 = spop %4492 }
  0x55   : > { %s5449_s29 = spop %4494 }
  0x56   : > { %s5451_s10 = spop %4496 }
  0x57   : > { %1131 = vrot.lane.b32.xlu1 %v5147_v25, %s7479_s17 }
  0x5b   : > { %1150 = vrot.lane.b32.xlu1 %v5141_v24, %s7477_s18 }
  0x5f   : > { %1203 = vrot.lane.b32.xlu1 %v5136_v23, %s7475_s19 }
  0x63   : > { %1253 = vrot.lane.b32.xlu1 %v5147_v25, %s7475_s19 }
  0x67   : > { %1367 = vrot.lane.b32.xlu1 %v5185_v27, %s7487_s9 }
  0x6b   : > { %1420 = vrot.lane.b32.xlu1 %v5190_v28, %s7485_s14 }
  0x6f   : > { %1470 = vrot.lane.b32.xlu1 %v5195_v29, %s7485_s14 }
  0x73   : > { %1489 = vrot.lane.b32.xlu1 %v5185_v27, %s7483_s15 }
  0x77   : > { %1542 = vrot.lane.b32.xlu1 %v5190_v28, %s7481_s16 }
  0x7b   : > { %1592 = vrot.lane.b32.xlu1 %v5195_v29, %s7481_s16 }
  0x7f   : > { %1611 = vrot.lane.b32.xlu1 %v5185_v27, %s7479_s17 }
  0x83   : > { %1664 = vrot.lane.b32.xlu1 %v5190_v28, %s7477_s18 }
  0x87   : > { %1714 = vrot.lane.b32.xlu1 %v5195_v29, %s7477_s18 }
  0x8b   : > { %1733 = vrot.lane.b32.xlu1 %v5185_v27, %s7475_s19 }
  0x95   : > { %v838_v46 = vpop.permute.xlu1 %837 }
  0x96   : > { %4498 = vpush %v838_v46 }
  0x99   : > { %v846_v47 = vpop.permute.xlu1 %845 }
  0x9a   : > { %4500 = vpush %v846_v47 }
  0x9d   : > { %v888_v48 = vpop.permute.xlu1 %887 }
  0x9e   : > { %4502 = vpush %v888_v48 }
  0xc7   : > { %s5455_s13 = spop %4498 }
  0xcb   : > { %s5457_s20 = spop %4500 }
  0xcf   : > { %s5459_s26 = spop %4502 }
  0xfb   : > { %v437_v8 = vpop.f32.mrb[0].mxu0 }
  0xfc   : > { %v438_v9 = vadd.f32 %v4140_v7, %v437_v8  ;;  %v4272_v10 = vpop.f32.mrb[1].mxu0  ;;  %v7525_v8 = vmov 25  }
  0xfd   : > { %v7513_v10 = vmov 17  }
  0xfe   : > { %vm451_vm3 = vcmp.gt.f32.partialorder %v438_v9, 0.0  ;;  %v454_v11 = vmul.f32 0.1, %v438_v9 }
  0xff   : > { %v442_v12 = vpop.f32.mrb[2].mxu0 }
 0x100   : > { %v443_v13 = vadd.f32 %v4140_v7, %v442_v12  ;;  %v4275_v14 = vpop.f32.mrb[3].mxu0  ;;  %v457_v15 = vsel %vm451_vm3, %v438_v9, %v454_v11  ;;  %v7531_v9 = vmov 31   ;;  %v7515_v11 = vmov 16   ;;  %v5303_v12 = vpop.permute.xlu1 %906 }
 0x101   : > { %4282 = vmatmul.mubr.msk.f32.vlgmr.msra.gmra.mrb[0].mxu1 %vm466_vm4, %v457_v15 }
 0x102   : > { %vm452_vm5 = vcmp.gt.f32.partialorder %v443_v13, 0.0  ;;  %v455_v16 = vmul.f32 0.1, %v443_v13  ;;  %4284 = vmatprep.mubr.msk.f32.mxu1 %vm4978_vm1, %v7537_v1  ;;  %4449 = vmatpush3.bf16.msk.msra.mxu1 %vm5229_vm12, %v7535_v54 }
 0x103   : > { %v447_v17 = vpop.f32.mrb[4].mxu0  ;;  %4305 = vmatprep.subr.msk.mxu1 %vm697_vm14, %v5245_v58 }
 0x104   : > { %v448_v18 = vadd.f32 %v4140_v7, %v447_v17  ;;  %v4278_v19 = vpop.f32.mrb[5].mxu0  ;;  %v458_v20 = vsel %vm452_vm5, %v443_v13, %v455_v16  ;;  %v7505_v7 = vmov 30   ;;  %v5311_v13 = vpop.permute.xlu1 %948  ;;  %v7511_v16 = vmov 19  }
 0x105   : > { %4285 = vmatmul.mubr.msk.f32.gmra.mrb[2].mxu1 %vm466_vm4, %v458_v20  ;;  %v7509_v20 = vmov 20  }
 0x106   : > { %vm453_vm6 = vcmp.gt.f32.partialorder %v448_v18, 0.0  ;;  %v456_v21 = vmul.f32 0.1, %v448_v18  ;;  %4287 = vmatprep.mubr.msk.f32.mxu1 %vm4978_vm1, %v7537_v1  ;;  %4306 = vmatpush3.msk.msra.mxu1 %vm697_vm14, %v5245_v58 }
 0x107   : > { %4450 = vmatprep.subr.bf16.mxu1 %v7533_v63 }
 0x108   : > { %v459_v22 = vsel %vm453_vm6, %v448_v18, %v456_v21  ;;  %v5318_v14 = vpop.permute.xlu1 %959  ;;  %v7529_v18 = vmov 18  }
 0x109   : > { %4288 = vmatmul.mubr.msk.f32.gmra.mrb[4].mxu1 %vm466_vm4, %v459_v22  ;;  %v7503_v22 = vmov 21  }
 0x10c   : > { %v5327_v15 = vpop.permute.xlu1 %967 }
 0x110   : > { %v5333_v17 = vpop.permute.xlu1 %1009 }
 0x114   : > { %v5341_v19 = vpop.permute.xlu1 %1020 }
 0x118   : > { %v5347_v21 = vpop.permute.xlu1 %1028 }
 0x1d4   : > { %v542_v31 = vpop.f32.mrb[0].mxu1 }
 0x1d5   : > { %v543_v32 = vadd.f32 %v4145_v30, %v542_v31  ;;  %v4283_v33 = vpop.f32.mrb[1].mxu1 }
 0x1d7   : > { %vm556_vm7 = vcmp.gt.f32.partialorder %v543_v32, 0.0  ;;  %v559_v34 = vmul.f32 0.1, %v543_v32 }
 0x1d8   : > { %v547_v35 = vpop.f32.mrb[2].mxu1 }
 0x1d9   : > { %v562_v36 = vsel %vm556_vm7, %v543_v32, %v559_v34  ;;  %v548_v37 = vadd.f32 %v4145_v30, %v547_v35  ;;  %v4286_v38 = vpop.f32.mrb[3].mxu1  ;;  %v7517_v34 = vmov 23  }
 0x1da   : > { %4293 = vmatmul.mubr.msk.f32.vlgmr.msra.gmra.mrb[6].mxu0 %vm466_vm4, %v562_v36 }
 0x1db   : > { %vm557_vm8 = vcmp.gt.f32.partialorder %v548_v37, 0.0  ;;  %v560_v39 = vmul.f32 0.1, %v548_v37  ;;  %4295 = vmatprep.mubr.msk.f32.mxu0 %vm4978_vm1, %v7537_v1 }
 0x1dc   : > { %v552_v40 = vpop.f32.mrb[4].mxu1 }
 0x1dd   : > { %v553_v41 = vadd.f32 %v4145_v30, %v552_v40  ;;  %v4289_v42 = vpop.f32.mrb[5].mxu1  ;;  %v563_v43 = vsel %vm557_vm8, %v548_v37, %v560_v39 }
 0x1de   : > { %4296 = vmatmul.mubr.msk.f32.gmra.mrb[8].mxu0 %vm466_vm4, %v563_v43 }
 0x1df   : > { %vm558_vm9 = vcmp.gt.f32.partialorder %v553_v41, 0.0  ;;  %v561_v44 = vmul.f32 0.1, %v553_v41  ;;  %4298 = vmatprep.mubr.msk.f32.mxu0 %vm4978_vm1, %v7537_v1 }
 0x1e1   : > { %v564_v45 = vsel %vm558_vm9, %v553_v41, %v561_v44 }
 0x1e2   : > { %4299 = vmatmul.mubr.msk.f32.gmra.mrb[10].mxu0 %vm466_vm4, %v564_v45 }
 0x1e3   : > { %4331 = vmatprep.mubr.msk.f32.mxu0 %vm4978_vm1, %v7537_v1 }
 0x2ad   : > { %v5237_v56 = vpop.f32.mrb[6].mxu0 }
 0x2ae   : > { %7607 = vst [vmem:[#allocation15_spill] sm:$0xff] %v5237_v56  ;;  %1319 = vperm.xlu1 %4753, %v5237_v56   ;;  %658 = vxpose.xlu0.b32.start [1/3] (short) (narrow) %v5237_v56, 16  ;;  %v4294_v57 = vpop.f32.mrb[7].mxu0 }
 0x2b1   : > { %v5249_v59 = vpop.f32.mrb[8].mxu0 }
 0x2b2   : > { %7609 = vst [vmem:[#allocation17_spill] sm:$0xff] %v5249_v59  ;;  %1323 = vperm.xlu1 %4753, %v5249_v59   ;;  %659 = vxpose.xlu0.b32.cont [2/3] (short) (narrow) %v5249_v59, 16  ;;  %v4297_v60 = vpop.f32.mrb[9].mxu0  ;;  %v4451_v61 = vpack.c.bf16 %v5249_v59, %v5237_v56 }
 0x2b5   : > { %v5261_v0 = vpop.f32.mrb[10].mxu0 }
 0x2b6   : > { %7610 = vst [vmem:[#allocation18_spill] sm:$0xff] %v5261_v0  ;;  %4755 = vset.pattern.permute.xlu1 %v7523_v2  ;;  %660 = vxpose.xlu0.b32.end [3/3] (short) (narrow) %v5261_v0, 16  ;;  %v4300_v3 = vpop.f32.mrb[11].mxu0 }
 0x2b7   : > { %1440 = vperm.xlu1 %4755, %v5237_v56  }
 0x2bb   : > { %4756 = vset.pattern.permute.xlu1 %v7521_v4 }
 0x2bc   : > { %1501 = vperm.xlu1 %4756, %v5237_v56  }
 0x2c0   : > { %4757 = vset.pattern.permute.xlu1 %v7523_v2 }
 0x2c1   : > { %1444 = vperm.xlu1 %4757, %v5249_v59  }
 0x2c5   : > { %4758 = vset.pattern.permute.xlu1 %v7519_v5 }
 0x2c6   : > { %1562 = vperm.xlu1 %4758, %v5237_v56  }
 0x2ca   : > { %4759 = vset.pattern.permute.xlu1 %v7521_v4 }
 0x2cb   : > { %1505 = vperm.xlu1 %4759, %v5249_v59  }
 0x2cf   : > { %4760 = vset.pattern.permute.xlu1 %v7507_v6 }
 0x2d0   : > { %1623 = vperm.xlu1 %4760, %v5237_v56  }
 0x2d4   : > { %4761 = vset.pattern.permute.xlu1 %v7519_v5 }
 0x2d5   : > { %1566 = vperm.xlu1 %4761, %v5249_v59  }
 0x2d9   : > { %4762 = vset.pattern.permute.xlu1 %v7505_v7 }
 0x2da   : > { %1684 = vperm.xlu1 %4762, %v5237_v56  }
 0x2de   : > { %4763 = vset.pattern.permute.xlu1 %v7507_v6 }
 0x2df   : > { %1627 = vperm.xlu1 %4763, %v5249_v59   ;;  %898 = vrot.lane.b32.xlu0 %v5136_v23, %s7485_s14 }
 0x2e0   : > { %4754 = vset.pattern.permute.xlu0 %v7525_v8 }
 0x2e3   : > { %4764 = vset.pattern.permute.xlu1 %v7531_v9  ;;  %1142 = vrot.lane.b32.xlu0 %v5136_v23, %s7477_s18  ;;  %v5354_v23 = vpop.permute.xlu1 %1070 }
 0x2e4   : > { %1745 = vperm.xlu1 %4764, %v5237_v56  }
 0x2e7   : > { %1192 = vrot.lane.b32.xlu0 %v5147_v25, %s7477_s18  ;;  %v7501_v25 = vmov 22  }
 0x2e8   : > { %4765 = vset.pattern.permute.xlu1 %v7505_v7 }
 0x2e9   : > { %1688 = vperm.xlu1 %4765, %v5249_v59  }
 0x2eb   : > { %1211 = vrot.lane.b32.xlu0 %v5141_v24, %s7475_s19  ;;  %v5361_v24 = vpop.permute.xlu1 %1081 }
 0x2ed   : > { %4767 = vset.pattern.permute.xlu1 %v7513_v10 }
 0x2ee   : > { %857 = vperm.xlu1 %4767, %v5237_v56  }
 0x2ef   : > { %1359 = vrot.lane.b32.xlu0 %v5190_v28, %s7487_s9  ;;  %v5367_v30 = vpop.permute.xlu1 %1089 }
 0x2f2   : > { %4768 = vset.pattern.permute.xlu1 %v7515_v11 }
 0x2f3   : > { %800 = vperm.xlu1 %4768, %v5249_v59   ;;  %1409 = vrot.lane.b32.xlu0 %v5195_v29, %s7487_s9  ;;  %v1132_v32 = vpop.permute.xlu1 %1131 }
 0x2f7   : > { %4775 = vset.pattern.permute.xlu1 %v7507_v6  ;;  %1428 = vrot.lane.b32.xlu0 %v5185_v27, %s7485_s14  ;;  %v1151_v35 = vpop.permute.xlu1 %1150 }
 0x2f8   : > { %1631 = vperm.xlu1 %4775, %v5261_v0  }
 0x2fb   : > { %1481 = vrot.lane.b32.xlu0 %v5190_v28, %s7483_s15  ;;  %v1204_v36 = vpop.permute.xlu1 %1203 }
 0x2fc   : > { %4776 = vset.pattern.permute.xlu1 %v7505_v7 }
 0x2fd   : > { %1692 = vperm.xlu1 %4776, %v5261_v0  }
 0x2ff   : > { %1531 = vrot.lane.b32.xlu0 %v5195_v29, %s7483_s15  ;;  %v1254_v37 = vpop.permute.xlu1 %1253 }
 0x301   : > { %4777 = vset.pattern.permute.xlu1 %v7531_v9 }
 0x302   : > { %1753 = vperm.xlu1 %4777, %v5261_v0  }
 0x303   : > { %1550 = vrot.lane.b32.xlu0 %v5185_v27, %s7481_s16  ;;  %v1368_v38 = vpop.permute.xlu1 %1367 }
 0x306   : > { %4778 = vset.pattern.permute.xlu1 %v7513_v10 }
 0x307   : > { %861 = vperm.xlu1 %4778, %v5249_v59   ;;  %1603 = vrot.lane.b32.xlu0 %v5190_v28, %s7479_s17  ;;  %v1421_v39 = vpop.permute.xlu1 %1420 }
 0x30b   : > { %4779 = vset.pattern.permute.xlu1 %v7511_v16  ;;  %1653 = vrot.lane.b32.xlu0 %v5195_v29, %s7479_s17  ;;  %v1471_v42 = vpop.permute.xlu1 %1470 }
 0x30c   : > { %979 = vperm.xlu1 %4779, %v5237_v56  }
 0x30f   : > { %1672 = vrot.lane.b32.xlu0 %v5185_v27, %s7477_s18  ;;  %v1490_v44 = vpop.permute.xlu1 %1489 }
 0x310   : > { %4780 = vset.pattern.permute.xlu1 %v7529_v18 }
 0x311   : > { %922 = vperm.xlu1 %4780, %v5249_v59  }
 0x313   : > { %1725 = vrot.lane.b32.xlu0 %v5190_v28, %s7475_s19  ;;  %v1543_v47 = vpop.permute.xlu1 %1542 }
 0x315   : > { %4781 = vset.pattern.permute.xlu1 %v7509_v20 }
 0x316   : > { %1040 = vperm.xlu1 %4781, %v5237_v56  }
 0x317   : > { %1775 = vrot.lane.b32.xlu0 %v5195_v29, %s7475_s19  ;;  %v1593_v49 = vpop.permute.xlu1 %1592 }
 0x31a   : > { %4782 = vset.pattern.permute.xlu1 %v7511_v16 }
 0x31b   : > { %983 = vperm.xlu1 %4782, %v5249_v59   ;;  %1379 = vperm.xlu0 %4754, %v5237_v56   ;;  %v1612_v55 = vpop.permute.xlu1 %1611 }
 0x31f   : > { %4783 = vset.pattern.permute.xlu1 %v7503_v22  ;;  %1383 = vperm.xlu0 %4754, %v5249_v59  }
 0x320   : > { %1101 = vperm.xlu1 %4783, %v5237_v56  }
 0x323   : > { %4766 = vset.pattern.permute.xlu0 %v7531_v9 }
 0x324   : > { %4784 = vset.pattern.permute.xlu1 %v7509_v20  ;;  %1749 = vperm.xlu0 %4766, %v5249_v59  }
 0x325   : > { %1044 = vperm.xlu1 %4784, %v5249_v59  }
 0x328   : > { %4769 = vset.pattern.permute.xlu0 %v7529_v18 }
 0x329   : > { %4785 = vset.pattern.permute.xlu1 %v7501_v25  ;;  %918 = vperm.xlu0 %4769, %v5237_v56  }
 0x32a   : > { %1162 = vperm.xlu1 %4785, %v5237_v56  }
 0x32d   : > { %4770 = vset.pattern.permute.xlu0 %v7527_v26 }
 0x32e   : > { %4786 = vset.pattern.permute.xlu1 %v7503_v22  ;;  %1327 = vperm.xlu0 %4770, %v5261_v0   ;;  %v674_v31 = vpop.trf.xlu0 }
 0x32f   : > { %1105 = vperm.xlu1 %4786, %v5249_v59   ;;  %4307 = vmatprep.mubr.msk.f32.mxu1 %vm690_vm15, %v674_v31 }
 0x332   : > { %4771 = vset.pattern.permute.xlu0 %v7525_v8  ;;  %v675_v33 = vpop.trf.xlu0 }
 0x333   : > { %4787 = vset.pattern.permute.xlu1 %v7517_v34  ;;  %1387 = vperm.xlu0 %4771, %v5261_v0  }
 0x334   : > { %4308 = vmatmul.mubr.msk.f32.vlgmr.msra.gmra.mrb[6].mxu1 %vm690_vm15, %v675_v33  ;;  %1223 = vperm.xlu1 %4787, %v5237_v56  }
 0x335   : > { %4452 = vmatpush3.bf16.msra.mxu1 %v4451_v61  ;;  %4316 = vmatprep.mubr.msk.f32.mxu1 %vm4978_vm1, %v7537_v1 }
 0x336   : > { %4314 = vmatprep.subr.mxu1 %v7537_v1 }
 0x337   : > { %4772 = vset.pattern.permute.xlu0 %v7523_v2 }
 0x338   : > { %4788 = vset.pattern.permute.xlu1 %v7501_v25  ;;  %1448 = vperm.xlu0 %4772, %v5261_v0  }
 0x339   : > { %4315 = vmatpush3.msk.msra.mxu1 %vm697_vm14, %v5261_v0  ;;  %1166 = vperm.xlu1 %4788, %v5249_v59  }
 0x33a   : > { %4456 = vmatprep.subr.bf16.mxu1 %v7533_v63 }
 0x33c   : > { %4773 = vset.pattern.permute.xlu0 %v7521_v4 }
 0x33d   : > { %4795 = vset.pattern.permute.xlu1 %v7503_v22  ;;  %1509 = vperm.xlu0 %4773, %v5261_v0  }
 0x33e   : > { %1109 = vperm.xlu1 %4795, %v5261_v0  }
 0x341   : > { %4774 = vset.pattern.permute.xlu0 %v7519_v5 }
 0x342   : > { %4796 = vset.pattern.permute.xlu1 %v7501_v25  ;;  %1570 = vperm.xlu0 %4774, %v5261_v0  }
 0x343   : > { %1170 = vperm.xlu1 %4796, %v5261_v0  }
 0x346   : > { %4789 = vset.pattern.permute.xlu0 %v7517_v34 }
 0x347   : > { %4797 = vset.pattern.permute.xlu1 %v7517_v34  ;;  %1227 = vperm.xlu0 %4789, %v5249_v59   ;;  %v5570_v34 = vstv %s5451_s10 }
 0x348   : > { %1231 = vperm.xlu1 %4797, %v5261_v0   ;;  %7624 = vst [vmem:[#allocation31_spill] sm:$0xff] %v5570_v34 }
 0x34b   : > { %4790 = vset.pattern.permute.xlu0 %v7515_v11 }
 0x34c   : > { %795 = vperm.xlu0 %4790, %v5237_v56  }
 0x350   : > { %805 = vperm.xlu0 %4790, %v5261_v0  }
 0x351   : > { %v899_v40 = vpop.permute.xlu0 %898 }
 0x352   : > { %4504 = vpush %v899_v40 }
 0x353   : > { %4506 = vpush %v5303_v12 }
 0x354   : > { %4791 = vset.pattern.permute.xlu0 %v7513_v10  ;;  %4508 = vpush %v5311_v13 }
 0x355   : > { %865 = vperm.xlu0 %4791, %v5261_v0   ;;  %v1143_v41 = vpop.permute.xlu0 %1142  ;;  %4510 = vpush %v5318_v14 }
 0x356   : > { %4512 = vpush %v5327_v15 }
 0x357   : > { %4514 = vpush %v5333_v17 }
 0x358   : > { %4516 = vpush %v5341_v19 }
 0x359   : > { %4792 = vset.pattern.permute.xlu0 %v7529_v18  ;;  %v1193_v43 = vpop.permute.xlu0 %1192  ;;  %4518 = vpush %v5347_v21  ;;  %v5614_v18 = vsub.s32 2, %v5225_v50 }
 0x35a   : > { %926 = vperm.xlu0 %4792, %v5261_v0   ;;  %4520 = vpush %v5354_v23 }
 0x35b   : > { %4522 = vpush %v5361_v24  ;;  %7634 = vst [vmem:[#allocation41_spill] sm:$0xff] %v5614_v18 }
 0x35c   : > { %4524 = vpush %v5367_v30 }
 0x35d   : > { %v1212_v45 = vpop.permute.xlu0 %1211  ;;  %4526 = vpush %v1132_v32 }
 0x35e   : > { %4793 = vset.pattern.permute.xlu0 %v7511_v16  ;;  %4528 = vpush %v1143_v41  ;;  %v320_v41 = vld [vmem:[%s310_s24] sm:$0xff] }
 0x35f   : > { %987 = vperm.xlu0 %4793, %v5261_v0   ;;  %4530 = vpush %v1151_v35 }
 0x360   : > { %4532 = vpush %v1193_v43  ;;  %v322_v43 = vld [vmem:[%s310_s24 + $0x10] sm:$0x3f] }
 0x361   : > { %v1360_v46 = vpop.permute.xlu0 %1359  ;;  %4534 = vpush %v1204_v36 }
 0x362   : > { %4536 = vpush %v1212_v45  ;;  %v778_v45 = vstv %s5447_s28 }
 0x363   : > { %4794 = vset.pattern.permute.xlu0 %v7509_v20  ;;  %4538 = vpush %v1254_v37 }
 0x364   : > { %1048 = vperm.xlu0 %4794, %v5261_v0   ;;  %4540 = vpush %v5190_v28 }
 0x365   : > { %v1410_v48 = vpop.permute.xlu0 %1409  ;;  %4542 = vpush %v5185_v27  ;;  %v1665_v27 = vpop.permute.xlu1 %1664 }
 0x366   : > { %4544 = vpush %v5195_v29 }
 0x367   : > { %4546 = vpush %v1360_v46  ;;  %v785_v46 = vstv %s5449_s29 }
 0x368   : > { %4548 = vpush %v1368_v38  ;;  %4805 = vset.pattern.permute.xlu0 %v7523_v2 }
 0x369   : > { %v1429_v51 = vpop.permute.xlu0 %1428  ;;  %4550 = vpush %v1410_v48  ;;  %v1715_v60 = vpop.permute.xlu1 %1714  ;;  %v5521_v48 = vld [vmem:[%s5504_s22 + $0x18] sm:$0xff] }
 0x36a   : > { %4552 = vpush %v1421_v39 }
 0x36b   : > { %4554 = vpush %v1429_v51 }
 0x36c   : > { %4556 = vpush %v1471_v42  ;;  %v321_v42 = vld [vmem:[%s310_s24 + $0x8] sm:$0xff] }
 0x36d   : > { %v1482_v52 = vpop.permute.xlu0 %1481  ;;  %v1734_v3 = vpop.permute.xlu1 %1733  ;;  %v331_v51 = vsub.f32 1.0, %v321_v42 }
 0x36e   : > { %4558 = vpush %v1482_v52 }
 0x36f   : > { %4560 = vpush %v1490_v44  ;;  %v5511_v44 = vld [vmem:[%s5504_s22] sm:$0xff]  ;;  %v5558_v16 = vmul.f32 -1e+30, %v331_v51 }
 0x371   : > { %v1532_v28 = vpop.permute.xlu0 %1531  ;;  %v5429_v14 = vpop.permute.xlu1 %1319  ;;  %7621 = vst [vmem:[#allocation28_spill] sm:$0xff] %v5558_v16 }
 0x372   : > { %4562 = vpush %v1532_v28  ;;  %v848_v28 = vstv %s5457_s20 }
 0x373   : > { %4564 = vpush %v1543_v47  ;;  %v5518_v47 = vld [vmem:[%s5504_s22 + $0x8] sm:$0xff] }
 0x375   : > { %v1551_v57 = vpop.permute.xlu0 %1550  ;;  %v5431_v17 = vpop.permute.xlu1 %1323 }
 0x376   : > { %4566 = vpush %v1551_v57  ;;  %v5532_v57 = vld [vmem:[%s5504_s22 + $0x10] sm:$0x3f] }
 0x377   : > { %4568 = vpush %v1593_v49  ;;  %v330_v49 = vsub.f32 1.0, %v320_v41 }
 0x379   : > { %v1604_v29 = vpop.permute.xlu0 %1603  ;;  %v5433_v19 = vpop.permute.xlu1 %1440  ;;  %v5556_v20 = vmul.f32 -1e+30, %v330_v49 }
 0x37a   : > { %4570 = vpush %v1604_v29  ;;  %v5535_v29 = vld [vmem:[%s5504_s22 + $0x20] sm:$0xff] }
 0x37b   : > { %4572 = vpush %v1612_v55  ;;  %v840_v55 = vstv %s5455_s13  ;;  %v788_v41 = vmul.f32 %v5535_v29, %v785_v46  ;;  %7620 = vst [vmem:[#allocation27_spill] sm:$0xff] %v5556_v20 }
 0x37c   : > { %v842_v25 = vmul.f32 %v840_v55, %v5511_v44  ;;  %v843_v22 = vmul.f32 %v840_v55, %v5518_v47  ;;  %v844_v7 = vmul.f32 %v840_v55, %v5532_v57 }
 0x37d   : > { %v1654_v61 = vpop.permute.xlu0 %1653  ;;  %v5435_v21 = vpop.permute.xlu1 %1501 }
 0x37e   : > { %4574 = vpush %v1654_v61  ;;  %v332_v61 = vsub.f32 1.0, %v322_v43  ;;  %v850_v43 = vmul.f32 %v5521_v48, %v848_v28 }
 0x37f   : > { %4576 = vpush %v1665_v27 }
 0x380   : > { %v5563_v10 = vmul.f32 -1e+30, %v332_v61  ;;  %v5581_v4 = vadd.f32 %v850_v43, %v842_v25  ;;  %v5584_v61 = vstv %s5459_s26 }
 0x381   : > { %v1673_v12 = vpop.permute.xlu0 %1672  ;;  %v5437_v23 = vpop.permute.xlu1 %1444  ;;  %7628 = vst [vmem:[#allocation35_spill] sm:$0xff] %v5584_v61 }
 0x382   : > { %4578 = vpush %v1673_v12  ;;  %7611 = vst [vmem:[#allocation19_spill] sm:$0xff] %v5437_v23  ;;  %v781_v12 = vmul.f32 %v778_v45, %v5518_v47 }
 0x383   : > { %4580 = vpush %v1715_v60  ;;  %s5461_s19 = spop %4504  ;;  %v5538_v60 = vld [vmem:[%s5504_s22 + $0x28] sm:$0x3f]  ;;  %7622 = vst [vmem:[#allocation29_spill] sm:$0xff] %v5563_v10  ;;  %v5812_v10 = vsub.s32 3, %v5225_v50 }
 0x384   : > { %s5467_s18 = spop %4506  ;;  %v789_v42 = vmul.f32 %v5538_v60, %v785_v46  ;;  %v852_v6 = vmul.f32 %v5538_v60, %v848_v28  ;;  %v5577_v49 = vadd.f32 %v788_v41, %v781_v12  ;;  %7627 = vst [vmem:[#allocation34_spill] sm:$0xff] %v5581_v4 }
 0x385   : > { %v1726_v13 = vpop.permute.xlu0 %1725  ;;  %v5439_v24 = vpop.permute.xlu1 %1562  ;;  %s5469_s17 = spop %4508  ;;  %7673 = vst [vmem:[#allocation80_spill] sm:$0xff] %v5812_v10 }
 0x386   : > { %4582 = vpush %v1726_v13  ;;  %s5471_s16 = spop %4510  ;;  %v782_v13 = vmul.f32 %v778_v45, %v5532_v57  ;;  %7625 = vst [vmem:[#allocation32_spill] sm:$0xff] %v5577_v49 }
 0x387   : > { %4584 = vpush %v1734_v3  ;;  %s5473_s15 = spop %4512  ;;  %v780_v3 = vmul.f32 %v778_v45, %v5511_v44  ;;  %v851_v45 = vmul.f32 %v5535_v29, %v848_v28  ;;  %v909_v28 = vstv %s5467_s18  ;;  %v962_v8 = vstv %s5471_s16 }
 0x388   : > { %s5479_s14 = spop %4514  ;;  %v5579_v51 = vadd.f32 %v789_v42, %v782_v13  ;;  %v911_v12 = vmul.f32 %v5521_v48, %v909_v28  ;;  %v912_v25 = vmul.f32 %v5535_v29, %v909_v28  ;;  %v970_v13 = vstv %s5473_s15 }
 0x389   : > { %v1776_v15 = vpop.permute.xlu0 %1775  ;;  %v5441_v30 = vpop.permute.xlu1 %1505  ;;  %s5481_s9 = spop %4516  ;;  %v5601_v42 = vstv %s5469_s17  ;;  %v972_v9 = vmul.f32 %v5521_v48, %v970_v13  ;;  %v973_v63 = vmul.f32 %v5535_v29, %v970_v13  ;;  %v966_v53 = vmul.f32 %v962_v8, %v5532_v57 }
 0x38a   : > { %4586 = vpush %v1776_v15  ;;  %7612 = vst [vmem:[#allocation20_spill] sm:$0xff] %v5441_v30  ;;  %s5483_s12 = spop %4518  ;;  %v787_v15 = vmul.f32 %v5521_v48, %v785_v46  ;;  %v901_v46 = vstv %s5461_s19  ;;  %v1023_v43 = vstv %s5481_s9  ;;  %v974_v0 = vmul.f32 %v5538_v60, %v970_v13 }
 0x38b   : > { %s5486_s30 = spop %4520  ;;  %7626 = vst [vmem:[#allocation33_spill] sm:$0xff] %v5579_v51  ;;  %v903_v2 = vmul.f32 %v901_v46, %v5511_v44  ;;  %v904_v26 = vmul.f32 %v901_v46, %v5518_v47  ;;  %v905_v41 = vmul.f32 %v901_v46, %v5532_v57  ;;  %7631 = vst [vmem:[#allocation38_spill] sm:$0xff] %v5601_v42  ;;  %v1031_v54 = vstv %s5483_s12 }
 0x38c   : > { %s5488_s23 = spop %4522  ;;  %v5567_v55 = vadd.f32 %v787_v15, %v780_v3  ;;  %v5586_v3 = vadd.f32 %v851_v45, %v843_v22  ;;  %v5588_v15 = vadd.f32 %v852_v6, %v844_v7  ;;  %v913_v22 = vmul.f32 %v5538_v60, %v909_v28 }
 0x38d   : > { %v5443_v31 = vpop.permute.xlu1 %1623  ;;  %s5499_s6 = spop %4524  ;;  %v5606_v6 = vsub.s32 0, %v5225_v50  ;;  %v964_v7 = vmul.f32 %v962_v8, %v5511_v44  ;;  %v5611_v45 = vsub.s32 1, %v5225_v50  ;;  %v965_v28 = vmul.f32 %v962_v8, %v5518_v47 }
 0x38e   : > { %s5506_s4 = spop %4526  ;;  %7623 = vst [vmem:[#allocation30_spill] sm:$0xff] %v5567_v55  ;;  %7629 = vst [vmem:[#allocation36_spill] sm:$0xff] %v5586_v3  ;;  %v5626_v62 = vadd.f32 %v911_v12, %v903_v2  ;;  %v5628_v58 = vadd.f32 %v912_v25, %v904_v26  ;;  %v5632_v56 = vadd.f32 %v913_v22, %v905_v41  ;;  %v5635_v59 = vstv %s5479_s14 }
 0x38f   : > { %s5508_s21 = spop %4528  ;;  %7630 = vst [vmem:[#allocation37_spill] sm:$0xff] %v5588_v15  ;;  %7632 = vst [vmem:[#allocation39_spill] sm:$0xff] %v5606_v6  ;;  %v1025_v3 = vmul.f32 %v1023_v43, %v5511_v44  ;;  %v1084_v49 = vstv %s5488_s23  ;;  %v1026_v2 = vmul.f32 %v1023_v43, %v5518_v47  ;;  %v1033_v26 = vmul.f32 %v5521_v48, %v1031_v54 }
 0x390   : > { %s5515_s0 = spop %4530  ;;  %7633 = vst [vmem:[#allocation40_spill] sm:$0xff] %v5611_v45  ;;  %7637 = vst [vmem:[#allocation44_spill] sm:$0xff] %v5626_v62  ;;  %v1034_v12 = vmul.f32 %v5535_v29, %v1031_v54  ;;  %v1092_v8 = vstv %s5499_s6  ;;  %v5647_v25 = vadd.f32 %v972_v9, %v964_v7  ;;  %v5649_v13 = vadd.f32 %v973_v63, %v965_v28 }
 0x391   : > { %v5445_v32 = vpop.permute.xlu1 %1566  ;;  %s5529_s24 = spop %4532  ;;  %7638 = vst [vmem:[#allocation45_spill] sm:$0xff] %v5628_v58  ;;  %7639 = vst [vmem:[#allocation46_spill] sm:$0xff] %v5632_v56  ;;  %v1027_v41 = vmul.f32 %v1023_v43, %v5532_v57  ;;  %v1035_v22 = vmul.f32 %v5538_v60, %v1031_v54  ;;  %v5653_v58 = vadd.f32 %v974_v0, %v966_v53  ;;  %v5656_v62 = vstv %s5486_s30 }
 0x392   : > { %7613 = vst [vmem:[#allocation21_spill] sm:$0xff] %v5445_v32  ;;  %s5544_s25 = spop %4534  ;;  %7640 = vst [vmem:[#allocation47_spill] sm:$0xff] %v5635_v59  ;;  %v1086_v4 = vmul.f32 %v1084_v49, %v5511_v44  ;;  %v1087_v63 = vmul.f32 %v1084_v49, %v5518_v47  ;;  %v1094_v9 = vmul.f32 %v5521_v48, %v1092_v8  ;;  %v1153_v54 = vstv %s5515_s0 }
 0x393   : > { %s5554_s27 = spop %4536  ;;  %7641 = vst [vmem:[#allocation48_spill] sm:$0xff] %v5647_v25  ;;  %7642 = vst [vmem:[#allocation49_spill] sm:$0xff] %v5649_v13  ;;  %v1095_v7 = vmul.f32 %v5535_v29, %v1092_v8  ;;  %v5670_v0 = vadd.f32 %v1033_v26, %v1025_v3  ;;  %v5672_v43 = vadd.f32 %v1034_v12, %v1026_v2  ;;  %v1206_v59 = vstv %s5544_s25 }
 0x394   : > { %s5561_s7 = spop %4538  ;;  %7643 = vst [vmem:[#allocation50_spill] sm:$0xff] %v5653_v58  ;;  %7644 = vst [vmem:[#allocation51_spill] sm:$0xff] %v5656_v62  ;;  %v1088_v28 = vmul.f32 %v1084_v49, %v5532_v57  ;;  %v1096_v13 = vmul.f32 %v5538_v60, %v1092_v8  ;;  %v5678_v25 = vadd.f32 %v1035_v22, %v1027_v41  ;;  %v5681_v62 = vstv %s5506_s4 }
 0x395   : > { %v5453_v33 = vpop.permute.xlu1 %1684  ;;  %s5575_s8 = spop %4540  ;;  %7647 = vst [vmem:[#allocation54_spill] sm:$0xff] %v5670_v0  ;;  %7648 = vst [vmem:[#allocation55_spill] sm:$0xff] %v5672_v43  ;;  %v1155_v2 = vmul.f32 %v5521_v48, %v1153_v54  ;;  %v1156_v49 = vmul.f32 %v5535_v29, %v1153_v54  ;;  %v1214_v26 = vstv %s5554_s27  ;;  %v5693_v12 = vadd.f32 %v1094_v9, %v1086_v4 }
 0x396   : > { %7614 = vst [vmem:[#allocation22_spill] sm:$0xff] %v5453_v33  ;;  %s5592_s18 = spop %4542  ;;  %7649 = vst [vmem:[#allocation56_spill] sm:$0xff] %v5678_v25  ;;  %v5695_v8 = vadd.f32 %v1095_v7, %v1087_v63  ;;  %v1157_v22 = vmul.f32 %v5538_v60, %v1153_v54  ;;  %v5699_v43 = vadd.f32 %v1096_v13, %v1088_v28  ;;  %v5702_v0 = vstv %s5529_s24 }
 0x397   : > { %s5603_s19 = spop %4544  ;;  %7650 = vst [vmem:[#allocation57_spill] sm:$0xff] %v5681_v62  ;;  %7651 = vst [vmem:[#allocation58_spill] sm:$0xff] %v5693_v12  ;;  %v1208_v62 = vmul.f32 %v1206_v59, %v5511_v44  ;;  %v1303_v42 = vstv %s5575_s8  ;;  %v1209_v63 = vmul.f32 %v1206_v59, %v5518_v47  ;;  %v1217_v13 = vmul.f32 %v5535_v29, %v1214_v26 }
 0x398   : > { %s5624_s9 = spop %4546  ;;  %7652 = vst [vmem:[#allocation59_spill] sm:$0xff] %v5695_v8  ;;  %7653 = vst [vmem:[#allocation60_spill] sm:$0xff] %v5699_v43  ;;  %v1310_v9 = vstv %s5592_s18  ;;  %v1210_v28 = vmul.f32 %v1206_v59, %v5532_v57  ;;  %v1218_v8 = vmul.f32 %v5538_v60, %v1214_v26  ;;  %v1305_v43 = vmul.f32 %v1303_v42, %v5511_v44 }
 0x399   : > { %v5463_v35 = vpop.permute.xlu1 %1627  ;;  %s5639_s12 = spop %4548  ;;  %7654 = vst [vmem:[#allocation61_spill] sm:$0xff] %v5702_v0  ;;  %v5727_v0 = vstv %s5561_s7  ;;  %v1362_v61 = vstv %s5624_s9  ;;  %v1306_v58 = vmul.f32 %v1303_v42, %v5518_v47  ;;  %s5004_s7 = smov 120  }
 0x39a   : > { %7615 = vst [vmem:[#allocation23_spill] sm:$0xff] %v5463_v35  ;;  %v5465_v36 = vpop.permute.xlu0 %1379  ;;  %s5645_s15 = spop %4550  ;;  %7659 = vst [vmem:[#allocation66_spill] sm:$0xff] %v5727_v0  ;;  %v1370_v59 = vstv %s5639_s12  ;;  %v1365_v0 = vmul.f32 %v1362_v61, %v5518_v47  ;;  %s5005_s12 = smov 8  }
 0x39b   : > { %s5660_s6 = spop %4552 }
 0x39c   : > { %s5676_s23 = spop %4554 }
 0x39d   : > { %v5475_v37 = vpop.permute.xlu1 %1745  ;;  %s5685_s30 = spop %4556 }
 0x39e   : > { %v5477_v38 = vpop.permute.xlu0 %1383  ;;  %v5794_v15 = vstv %s5685_s30 }
 0x39f   : > { %s5691_s14 = spop %4558  ;;  %7670 = vst [vmem:[#allocation77_spill] sm:$0xff] %v5794_v15 }
 0x3a0   : > { %s5706_s4 = spop %4560 }
 0x3a1   : > { %v5495_v39 = vpop.permute.xlu1 %1688  ;;  %v1492_v56 = vstv %s5706_s4  ;;  %s7760_s4 = smov 126  }
 0x3a2   : > { %7617 = vst [vmem:[#allocation24_spill] sm:$0xff] %v5495_v39 }
 0x3a3   : > { %v5497_v40 = vpop.permute.xlu0 %1749  ;;  %s5716_s16 = spop %4562 }
 0x3a4   : > { %s5731_s17 = spop %4564 }
 0x3a5   : > { %v5523_v52 = vpop.permute.xlu1 %857 }
 0x3a6   : > { %7618 = vst [vmem:[#allocation25_spill] sm:$0xff] %v5523_v52 }
 0x3a7   : > { %s5743_s28 = spop %4566 }
 0x3a8   : > { %v5527_v27 = vpop.permute.xlu0 %918  ;;  %s5752_s29 = spop %4568 }
 0x3a9   : > { %7619 = vst [vmem:[#allocation26_spill] sm:$0xff] %v5527_v27  ;;  %v5565_v11 = vpop.permute.xlu1 %800  ;;  %v1145_v27 = vstv %s5508_s21 }
 0x3aa   : > { %v1147_v55 = vmul.f32 %v1145_v27, %v5511_v44  ;;  %v1148_v3 = vmul.f32 %v1145_v27, %v5518_v47  ;;  %v1149_v41 = vmul.f32 %v1145_v27, %v5532_v57  ;;  %v1216_v27 = vmul.f32 %v5521_v48, %v1214_v26 }
 0x3ab   : > { %v1307_v26 = vmul.f32 %v1303_v42, %v5532_v57  ;;  %s5762_s10 = spop %4570 }
 0x3ac   : > { %v5718_v7 = vadd.f32 %v1155_v2, %v1147_v55  ;;  %v5720_v54 = vadd.f32 %v1156_v49, %v1148_v3  ;;  %v5724_v12 = vadd.f32 %v1157_v22, %v1149_v41  ;;  %v1312_v55 = vmul.f32 %v5521_v48, %v1310_v9  ;;  %s5777_s13 = spop %4572 }
 0x3ad   : > { %v5573_v5 = vpop.permute.xlu0 %1327  ;;  %v5616_v46 = vpop.permute.xlu1 %1631  ;;  %v1313_v3 = vmul.f32 %v5535_v29, %v1310_v9  ;;  %v5737_v2 = vadd.f32 %v1216_v27, %v1208_v62  ;;  %v5739_v49 = vadd.f32 %v1217_v13, %v1209_v63  ;;  %v1314_v41 = vmul.f32 %v5538_v60, %v1310_v9 }
 0x3ae   : > { %7635 = vst [vmem:[#allocation42_spill] sm:$0xff] %v5616_v46  ;;  %7656 = vst [vmem:[#allocation63_spill] sm:$0xff] %v5718_v7  ;;  %v5745_v22 = vadd.f32 %v1218_v8, %v1210_v28  ;;  %v1364_v7 = vmul.f32 %v1362_v61, %v5511_v44  ;;  %v1372_v63 = vmul.f32 %v5521_v48, %v1370_v59  ;;  %v1423_v27 = vstv %s5660_s6 }
 0x3af   : > { %7657 = vst [vmem:[#allocation64_spill] sm:$0xff] %v5720_v54  ;;  %7658 = vst [vmem:[#allocation65_spill] sm:$0xff] %v5724_v12  ;;  %v5748_v54 = vstv %s5603_s19  ;;  %v1373_v8 = vmul.f32 %v5535_v29, %v1370_v59  ;;  %v1431_v13 = vstv %s5676_s23  ;;  %v5764_v9 = vadd.f32 %v1312_v55, %v1305_v43  ;;  %s5783_s20 = spop %4574  ;;  %s7759_s23 = smov 127  }
 0x3b0   : > { %7660 = vst [vmem:[#allocation67_spill] sm:$0xff] %v5737_v2  ;;  %7661 = vst [vmem:[#allocation68_spill] sm:$0xff] %v5739_v49  ;;  %v5766_v28 = vadd.f32 %v1313_v3, %v1306_v58  ;;  %v1366_v49 = vmul.f32 %v1362_v61, %v5532_v57  ;;  %v1374_v2 = vmul.f32 %v5538_v60, %v1370_v59  ;;  %v1484_v12 = vstv %s5691_s14  ;;  %s5798_s26 = spop %4576 }
 0x3b1   : > { %v5662_v52 = vpop.permute.xlu1 %1692  ;;  %7662 = vst [vmem:[#allocation69_spill] sm:$0xff] %v5745_v22  ;;  %v5773_v22 = vstv %s5645_s15  ;;  %v1425_v34 = vmul.f32 %v1423_v27, %v5511_v44  ;;  %v1426_v43 = vmul.f32 %v1423_v27, %v5518_v47  ;;  %v1427_v58 = vmul.f32 %v1423_v27, %v5532_v57 }
 0x3b2   : > { %v5622_v1 = vpop.permute.xlu0 %1387  ;;  %7645 = vst [vmem:[#allocation52_spill] sm:$0xff] %v5662_v52  ;;  %7665 = vst [vmem:[#allocation72_spill] sm:$0xff] %v5766_v28  ;;  %v1433_v55 = vmul.f32 %v5521_v48, %v1431_v13  ;;  %v5785_v61 = vadd.f32 %v1372_v63, %v1364_v7  ;;  %v5787_v3 = vadd.f32 %v1373_v8, %v1365_v0  ;;  %v1545_v52 = vstv %s5731_s17  ;;  %s7762_s17 = smov 124  }
 0x3b3   : > { %7636 = vst [vmem:[#allocation43_spill] sm:$0xff] %v5622_v1  ;;  %7667 = vst [vmem:[#allocation74_spill] sm:$0xff] %v5773_v22  ;;  %v1434_v59 = vmul.f32 %v5535_v29, %v1431_v13  ;;  %v1486_v51 = vmul.f32 %v1484_v12, %v5511_v44  ;;  %v1494_v27 = vmul.f32 %v5521_v48, %v1492_v56  ;;  %s4579_s21 = spop %4578 }
 0x3b4   : > { %7668 = vst [vmem:[#allocation75_spill] sm:$0xff] %v5787_v3  ;;  %v1487_v0 = vmul.f32 %v1484_v12, %v5518_v47  ;;  %v1488_v8 = vmul.f32 %v1484_v12, %v5532_v57  ;;  %v1553_v12 = vstv %s5743_s28  ;;  %s5822_s0 = spop %4580  ;;  %s7763_s28 = smov 123  }
 0x3b5   : > { %v5708_v25 = vpop.permute.xlu1 %1753 }
 0x3b7   : > { %v5667_v53 = vpop.permute.xlu0 %1448  ;;  %s4583_s24 = spop %4582 }
 0x3b8   : > { %7646 = vst [vmem:[#allocation53_spill] sm:$0xff] %v5667_v53  ;;  %s4585_s25 = spop %4584 }
 0x3b9   : > { %v5754_v62 = vpop.permute.xlu1 %861  ;;  %v1736_v32 = vstv %s4585_s25 }
 0x3ba   : > { %7663 = vst [vmem:[#allocation70_spill] sm:$0xff] %v5754_v62  ;;  %v5770_v62 = vadd.f32 %v1314_v41, %v1307_v26  ;;  %v1435_v26 = vmul.f32 %v5538_v60, %v1431_v13  ;;  %v5791_v41 = vadd.f32 %v1374_v2, %v1366_v49  ;;  %v1495_v2 = vmul.f32 %v5535_v29, %v1492_v56 }
 0x3bb   : > { %v1496_v49 = vmul.f32 %v5538_v60, %v1492_v56  ;;  %v5808_v13 = vadd.f32 %v1433_v55, %v1425_v34  ;;  %v5825_v56 = vsub.s32 5, %v5225_v50  ;;  %v5827_v34 = vadd.f32 %v1494_v27, %v1486_v51  ;;  %s4587_s27 = spop %4586 }
 0x3bc   : > { %v5710_v4 = vpop.permute.xlu0 %1509  ;;  %7666 = vst [vmem:[#allocation73_spill] sm:$0xff] %v5770_v62  ;;  %7669 = vst [vmem:[#allocation76_spill] sm:$0xff] %v5791_v41  ;;  %v5819_v46 = vadd.f32 %v1435_v26, %v1427_v58  ;;  %v5830_v55 = vstv %s5716_s16  ;;  %v5838_v58 = vadd.f32 %v1495_v2, %v1487_v0  ;;  %v1547_v26 = vmul.f32 %v1545_v52, %v5511_v44  ;;  %s7761_s16 = smov 125  }
 0x3bd   : > { %7655 = vst [vmem:[#allocation62_spill] sm:$0xff] %v5710_v4  ;;  %v5800_v7 = vpop.permute.xlu1 %979  ;;  %7677 = vst [vmem:[#allocation84_spill] sm:$0xff] %v5825_v56  ;;  %v1606_v4 = vstv %s5762_s10  ;;  %v1548_v51 = vmul.f32 %v1545_v52, %v5518_v47  ;;  %v1549_v27 = vmul.f32 %v1545_v52, %v5532_v57  ;;  %v1614_v41 = vstv %s5777_s13  ;;  %s7765_s10 = smov 121  }
 0x3be   : > { %7671 = vst [vmem:[#allocation78_spill] sm:$0xff] %v5800_v7  ;;  %v5815_v7 = vsub.s32 4, %v5225_v50  ;;  %7676 = vst [vmem:[#allocation83_spill] sm:$0xff] %v5819_v46  ;;  %v1555_v46 = vmul.f32 %v5521_v48, %v1553_v12  ;;  %v1557_v0 = vmul.f32 %v5538_v60, %v1553_v12  ;;  %v1675_v2 = vstv %s4579_s21 }
 0x3bf   : > { %7678 = vst [vmem:[#allocation85_spill] sm:$0xff] %v5830_v55  ;;  %7679 = vst [vmem:[#allocation86_spill] sm:$0xff] %v5838_v58  ;;  %v1610_v62 = vmul.f32 %v1606_v4, %v5532_v57  ;;  %v1728_v52 = vstv %s4583_s24  ;;  %v1616_v39 = vmul.f32 %v5521_v48, %v1614_v41  ;;  %v1617_v35 = vmul.f32 %v5535_v29, %v1614_v41 }
 0x3c0   : > { %7674 = vst [vmem:[#allocation81_spill] sm:$0xff] %v5815_v7  ;;  %v1678_v30 = vmul.f32 %v5535_v29, %v1675_v2  ;;  %v1730_v23 = vmul.f32 %v1728_v52, %v5511_v44  ;;  %v1731_v3 = vmul.f32 %v1728_v52, %v5518_v47  ;;  %v1738_v55 = vmul.f32 %v5521_v48, %v1736_v32 }
 0x3c1   : > { %v5756_v42 = vpop.permute.xlu0 %1570  ;;  %v5848_v53 = vpop.permute.xlu1 %922  ;;  %v1739_v28 = vmul.f32 %v5535_v29, %v1736_v32  ;;  %v1558_v20 = vadd.f32 %v1555_v46, %v1547_v26  ;;  %v5896_v26 = vstv %s5822_s0 }
 0x3c2   : > { %7664 = vst [vmem:[#allocation71_spill] sm:$0xff] %v5756_v42  ;;  %v5833_v42 = vsub.s32 7, %v5225_v50  ;;  %7681 = vst [vmem:[#allocation88_spill] sm:$0xff] %v5848_v53  ;;  %v1618_v53 = vmul.f32 %v5538_v60, %v1614_v41  ;;  %v1732_v41 = vmul.f32 %v1728_v52, %v5532_v57 }
 0x3c5   : > { %v5871_v33 = vpop.permute.xlu1 %1040 }
 0x3c6   : > { %v5802_v63 = vpop.permute.xlu0 %1227 }
 0x3c7   : > { %7672 = vst [vmem:[#allocation79_spill] sm:$0xff] %v5802_v63  ;;  %v5817_v63 = vadd.f32 %v1434_v59, %v1426_v43  ;;  %v5836_v43 = vsub.s32 6, %v5225_v50  ;;  %v5840_v59 = vadd.f32 %v1496_v49, %v1488_v8  ;;  %v1556_v50 = vmul.f32 %v5535_v29, %v1553_v12 }
 0x3c8   : > { %v1667_v8 = vstv %s5798_s26  ;;  %v1608_v49 = vmul.f32 %v1606_v4, %v5511_v44  ;;  %v5887_v29 = vstv %s5783_s20 }
 0x3c9   : > { %7675 = vst [vmem:[#allocation82_spill] sm:$0xff] %v5817_v63  ;;  %7680 = vst [vmem:[#allocation87_spill] sm:$0xff] %v5840_v59  ;;  %v1609_v59 = vmul.f32 %v1606_v4, %v5518_v47  ;;  %v1669_v58 = vmul.f32 %v1667_v8, %v5511_v44  ;;  %v1670_v12 = vmul.f32 %v1667_v8, %v5518_v47  ;;  %v5878_v44 = vstv %s5752_s29  ;;  %s7764_s29 = smov 122  }
 0x3ca   : > { %v1671_v16 = vmul.f32 %v1667_v8, %v5532_v57  ;;  %v1677_v63 = vmul.f32 %v5521_v48, %v1675_v2  ;;  %v1679_v4 = vmul.f32 %v5538_v60, %v1675_v2  ;;  %v1740_v8 = vmul.f32 %v5538_v60, %v1736_v32 }
 0x3cb   : > { %v796_v1 = vpop.permute.xlu0 %795  ;;  %v5873_v22 = vadd.f32 %v1556_v50, %v1548_v51  ;;  %v5875_v2 = vadd.f32 %v1557_v0, %v1549_v27  ;;  %v5880_v47 = vadd.f32 %v1616_v39, %v1608_v49  ;;  %v5882_v57 = vadd.f32 %v1617_v35, %v1609_v59 }
 0x3cc   : > { %v5884_v48 = vadd.f32 %v1618_v53, %v1610_v62  ;;  %v5889_v32 = vadd.f32 %v1677_v63, %v1669_v58  ;;  %v5891_v60 = vadd.f32 %v1678_v30, %v1670_v12  ;;  %v5893_v46 = vadd.f32 %v1679_v4, %v1671_v16 }
 0x3cd   : > { %v1741_v51 = vadd.f32 %v1738_v55, %v1730_v23  ;;  %v1742_v27 = vadd.f32 %v1739_v28, %v1731_v3  ;;  %v1743_v50 = vadd.f32 %v1740_v8, %v1732_v41  ;;  %v5898_v39 = vstv %s4587_s27  ;;  %v5924_v55 = vpop.permute.xlu1 %983 }
 0x3ce   : > { %7682 = vst [vmem:[#allocation89_spill] sm:$0xff] %v5924_v55 }
 0x3cf   : > { %v806_v15 = vpop.permute.xlu0 %805 }
 0x3d4   : > { %v866_v58 = vpop.permute.xlu0 %865 }
 0x407   : > { %v4309_v0 = vpop.f32.mrb[6].mxu1 }
 0x408   : > { %v1333_v35 = vrot.slane %v4309_v0, %v5606_v6  ;;  %v5902_v53 = vrot.slane %v4309_v0, %v5611_v45  ;;  %v5905_v62 = vrot.slane %v4309_v0, %v5614_v18  ;;  %v5908_v30 = vrot.slane %v4309_v0, %v5812_v10  ;;  %v5910_v16 = vpop.f32.mrb[7].mxu1 }
 0x409   : > { %v5913_v23 = vrot.slane %v4309_v0, %v5815_v7  ;;  %v5916_v28 = vrot.slane %v4309_v0, %v5825_v56  ;;  %v811_v3 = vrot.slane %v5910_v16, %v5606_v6  ;;  %v5922_v63 = vrot.slane %v5910_v16, %v5611_v45 }
 0x40a   : > { %v1334_v59 = vadd.f32 %v1333_v35, %v5429_v14  ;;  %v5928_v49 = vadd.f32 %v1333_v35, %v5431_v17  ;;  %v5931_v52 = vadd.f32 %v1333_v35, %v5573_v5  ;;  %v5935_v12 = vadd.f32 %v5902_v53, %v5477_v38 }
 0x40b   : > { %v5937_v4 = vadd.f32 %v811_v3, %v796_v1  ;;  %v5940_v41 = vadd.f32 %v811_v3, %v5565_v11  ;;  %v5942_v8 = vadd.f32 %v811_v3, %v806_v15  ;;  %v5945_v45 = vadd.f32 %v5922_v63, %v866_v58 }
 0x40c   : > { %v5949_v14 = vrot.slane %v5910_v16, %v5614_v18  ;;  %v5953_v5 = vrot.slane %v5910_v16, %v5812_v10  ;;  %v5957_v1 = vrot.slane %v5910_v16, %v5815_v7  ;;  %v5961_v11 = vrot.slane %v5910_v16, %v5825_v56 }
 0x40d   : > { %7683 = vst [vmem:[#allocation90_spill] sm:$0xff] %v5940_v41  ;;  %v1759_v17 = vrot.slane %v4309_v0, %v5833_v42  ;;  %v1337_v38 = vadd.f32 %v1334_v59, %v5764_v9  ;;  %v1394_v15 = vadd.f32 %v5902_v53, %v5465_v36  ;;  %v1455_v35 = vadd.f32 %v5905_v62, %v5433_v19  ;;  %v5981_v19 = vpop.permute.xlu1 %1101 }
 0x40e   : > { %v1516_v3 = vadd.f32 %v5908_v30, %v5435_v21  ;;  %v1577_v58 = vadd.f32 %v5913_v23, %v5439_v24  ;;  %v1638_v56 = vadd.f32 %v5916_v28, %v5443_v31  ;;  %v5976_v7 = vrot.slane %v4309_v0, %v5836_v43 }
 0x40f   : > { %v1760_v9 = vadd.f32 %v1759_v17, %v5475_v37  ;;  %v1761_v59 = vadd.f32 %v1759_v17, %v5497_v40  ;;  %v1762_v36 = vadd.f32 %v1759_v17, %v5708_v25  ;;  %vm1340_vm0 = vcmp.gt.f32.partialorder %v1337_v38, 0.0 }
 0x410   : > { %v1343_v10 = vmul.f32 0.2, %v1337_v38  ;;  %v1397_v21 = vadd.f32 %v1394_v15, %v5785_v61  ;;  %v1458_v24 = vadd.f32 %v1455_v35, %v5808_v13  ;;  %v1519_v18 = vadd.f32 %v1516_v3, %v5827_v34  ;;  %v7684_v35 = vld [vmem:[#allocation74_spill] sm:$0xff] }
 0x411   : > { %v1763_v31 = vadd.f32 %v1760_v9, %v1741_v51  ;;  %v1764_v6 = vadd.f32 %v1761_v59, %v1742_v27  ;;  %v1765_v0 = vadd.f32 %v1762_v36, %v1743_v50  ;;  %v1580_v55 = vadd.f32 %v1577_v58, %v1558_v20  ;;  %v5988_v27 = vpop.permute.xlu1 %1044 }
 0x412   : > { %v1346_v41 = vsel %vm1340_vm0, %v1337_v38, %v1343_v10  ;;  %vm1400_vm2 = vcmp.gt.f32.partialorder %v1397_v21, 0.0  ;;  %v1403_v37 = vmul.f32 0.2, %v1397_v21  ;;  %vm1461_vm3 = vcmp.gt.f32.partialorder %v1458_v24, 0.0  ;;  %v7685_v38 = vld [vmem:[#allocation27_spill] sm:$0xff] }
 0x413   : > { %vm1766_vm5 = vcmp.gt.f32.partialorder %v1763_v31, 0.0  ;;  %vm1767_vm6 = vcmp.gt.f32.partialorder %v1764_v6, 0.0  ;;  %vm1768_vm7 = vcmp.gt.f32.partialorder %v1765_v0, 0.0  ;;  %v1769_v40 = vmul.f32 0.2, %v1763_v31 }
 0x414   : > { %v1770_v25 = vmul.f32 0.2, %v1764_v6  ;;  %v1771_v17 = vmul.f32 0.2, %v1765_v0  ;;  %v1353_v61 = vmul.f32 %v5748_v54, %v1346_v41  ;;  %v1406_v15 = vsel %vm1400_vm2, %v1397_v21, %v1403_v37  ;;  %v7686_v21 = vld [vmem:[#allocation77_spill] sm:$0xff] }
 0x415   : > { %v1772_v13 = vsel %vm1766_vm5, %v1763_v31, %v1769_v40  ;;  %v1414_v34 = vmul.f32 %v7684_v35, %v1406_v15  ;;  %v1464_v51 = vmul.f32 0.2, %v1458_v24  ;;  %vm1522_vm8 = vcmp.gt.f32.partialorder %v1519_v18, 0.0  ;;  %v7687_v40 = vld [vmem:[#allocation22_spill] sm:$0xff] }
 0x416   : > { %v1773_v10 = vsel %vm1767_vm6, %v1764_v6, %v1770_v25  ;;  %v1774_v20 = vsel %vm1768_vm7, %v1765_v0, %v1771_v17  ;;  %v1780_v50 = vmul.f32 %v5898_v39, %v1772_v13  ;;  %v1356_v3 = vadd.f32 %v1353_v61, %v7685_v38  ;;  %v7688_v17 = vld [vmem:[#allocation72_spill] sm:$0xff] }
 0x417   : > { %v5993_v58 = vmul.f32 %v5898_v39, %v1773_v10  ;;  %v5996_v9 = vmul.f32 %v5898_v39, %v1774_v20  ;;  %v1467_v41 = vsel %vm1461_vm3, %v1458_v24, %v1464_v51  ;;  %v1525_v59 = vmul.f32 0.2, %v1519_v18  ;;  %v7689_v39 = vld [vmem:[#allocation85_spill] sm:$0xff]  ;;  %v7690_v24 = vld [vmem:[#allocation75_spill] sm:$0xff] }
 0x418   : > { %v1417_v36 = vadd.f32 %v1414_v34, %v1356_v3  ;;  %v1475_v31 = vmul.f32 %v7686_v21, %v1467_v41  ;;  %vm1583_vm9 = vcmp.gt.f32.partialorder %v1580_v55, 0.0  ;;  %v1586_v37 = vmul.f32 0.2, %v1580_v55 }
 0x419   : > { %v1528_v6 = vsel %vm1522_vm8, %v1519_v18, %v1525_v59  ;;  %v1641_v0 = vadd.f32 %v1638_v56, %v5880_v47  ;;  %v1699_v25 = vadd.f32 %v5976_v7, %v7687_v40  ;;  %v1338_v61 = vadd.f32 %v5928_v49, %v7688_v17  ;;  %v6010_v56 = vpop.permute.xlu1 %1162 }
 0x41a   : > { %v1478_v15 = vadd.f32 %v1475_v31, %v1417_v36  ;;  %v1536_v13 = vmul.f32 %v7689_v39, %v1528_v6  ;;  %v1589_v10 = vsel %vm1583_vm9, %v1580_v55, %v1586_v37  ;;  %v1398_v34 = vadd.f32 %v5935_v12, %v7690_v24  ;;  %v7691_v31 = vld [vmem:[#allocation19_spill] sm:$0xff] }
 0x41b   : > { %v1597_v51 = vmul.f32 %v5878_v44, %v1589_v10  ;;  %vm1644_vm10 = vcmp.gt.f32.partialorder %v1641_v0, 0.0  ;;  %v1647_v20 = vmul.f32 0.2, %v1641_v0  ;;  %v1702_v18 = vadd.f32 %v1699_v25, %v5889_v32  ;;  %v7692_v25 = vld [vmem:[#allocation20_spill] sm:$0xff]  ;;  %v7693_v10 = vld [vmem:[#allocation82_spill] sm:$0xff] }
 0x41c   : > { %v1539_v47 = vadd.f32 %v1536_v13, %v1478_v15  ;;  %vm1341_vm11 = vcmp.gt.f32.partialorder %v1338_v61, 0.0  ;;  %v1344_v3 = vmul.f32 0.2, %v1338_v61  ;;  %vm1401_vm13 = vcmp.gt.f32.partialorder %v1398_v34, 0.0 }
 0x41d   : > { %v1650_v49 = vsel %vm1644_vm10, %v1641_v0, %v1647_v20  ;;  %vm1705_vm0 = vcmp.gt.f32.partialorder %v1702_v18, 0.0  ;;  %v1708_v41 = vmul.f32 0.2, %v1702_v18  ;;  %v1404_v59 = vmul.f32 0.2, %v1398_v34 }
 0x41e   : > { %v1600_v55 = vadd.f32 %v1597_v51, %v1539_v47  ;;  %v1658_v36 = vmul.f32 %v5887_v29, %v1650_v49  ;;  %v1347_v12 = vsel %vm1341_vm11, %v1338_v61, %v1344_v3  ;;  %v1456_v37 = vadd.f32 %v5905_v62, %v7691_v31  ;;  %v7694_v51 = vld [vmem:[#allocation28_spill] sm:$0xff]  ;;  %v7695_v61 = vld [vmem:[#allocation86_spill] sm:$0xff]  ;;  %v7696_v3 = vld [vmem:[#allocation21_spill] sm:$0xff] }
 0x41f   : > { %v1711_v6 = vsel %vm1705_vm0, %v1702_v18, %v1708_v41  ;;  %v1354_v32 = vmul.f32 %v5748_v54, %v1347_v12  ;;  %v1407_v40 = vsel %vm1401_vm13, %v1398_v34, %v1404_v59  ;;  %v1517_v17 = vadd.f32 %v5908_v30, %v7692_v25  ;;  %v7697_v49 = vld [vmem:[#allocation23_spill] sm:$0xff]  ;;  %v6027_v41 = vpop.permute.xlu1 %1105 }
 0x420   : > { %v1661_v15 = vadd.f32 %v1658_v36, %v1600_v55  ;;  %v1719_v0 = vmul.f32 %v5896_v26, %v1711_v6  ;;  %v1415_v13 = vmul.f32 %v7684_v35, %v1407_v40  ;;  %v1459_v24 = vadd.f32 %v1456_v37, %v7693_v10  ;;  %v7698_v36 = vld [vmem:[#allocation24_spill] sm:$0xff] }
 0x421   : > { %v1357_v20 = vadd.f32 %v1354_v32, %v7694_v51  ;;  %v1520_v47 = vadd.f32 %v1517_v17, %v7695_v61  ;;  %v1578_v18 = vadd.f32 %v5913_v23, %v7696_v3  ;;  %v1639_v34 = vadd.f32 %v5916_v28, %v7697_v49  ;;  %v7700_v49 = vld [vmem:[#allocation43_spill] sm:$0xff] }
 0x422   : > { %v1722_v59 = vadd.f32 %v1719_v0, %v1661_v15  ;;  %vm1462_vm2 = vcmp.gt.f32.partialorder %v1459_v24, 0.0  ;;  %v1465_v55 = vmul.f32 0.2, %v1459_v24  ;;  %v1700_v12 = vadd.f32 %v5976_v7, %v7698_v36 }
 0x423   : > { %v1418_v31 = vadd.f32 %v1415_v13, %v1357_v20  ;;  %vm1523_vm3 = vcmp.gt.f32.partialorder %v1520_v47, 0.0  ;;  %v1526_v37 = vmul.f32 0.2, %v1520_v47  ;;  %v1581_v6 = vadd.f32 %v1578_v18, %v5873_v22 }
 0x424   : > { %v6032_v32 = vadd.f32 %v1780_v50, %v1722_v59  ;;  %v1468_v40 = vsel %vm1462_vm2, %v1459_v24, %v1465_v55  ;;  %v1642_v25 = vadd.f32 %v1639_v34, %v5882_v57  ;;  %v1703_v17 = vadd.f32 %v1700_v12, %v5891_v60  ;;  %v6040_v57 = vpop.permute.xlu1 %1223  ;;  %v7701_v12 = vld [vmem:[#allocation53_spill] sm:$0xff] }
 0x425   : > { %v1476_v10 = vmul.f32 %v7686_v21, %v1468_v40  ;;  %v1529_v15 = vsel %vm1523_vm3, %v1520_v47, %v1526_v37  ;;  %vm1584_vm5 = vcmp.gt.f32.partialorder %v1581_v6, 0.0  ;;  %v1587_v0 = vmul.f32 0.2, %v1581_v6  ;;  %v7699_v47 = vld [vmem:[#allocation73_spill] sm:$0xff]  ;;  %v7702_v40 = vld [vmem:[#allocation76_spill] sm:$0xff] }
 0x426   : > { %v1786_v61 = vsel %vm690_vm15, %v6032_v32, -inf  ;;  %v1537_v13 = vmul.f32 %v7689_v39, %v1529_v15  ;;  %vm1645_vm6 = vcmp.gt.f32.partialorder %v1642_v25, 0.0  ;;  %v1648_v20 = vmul.f32 0.2, %v1642_v25  ;;  %v7703_v15 = vld [vmem:[#allocation83_spill] sm:$0xff] }
 0x427   : > { %1787 = vmax.xlane.f32.xlu0 %v1786_v61  ;;  %v1479_v22 = vadd.f32 %v1476_v10, %v1418_v31  ;;  %v1590_v50 = vsel %vm1584_vm5, %v1581_v6, %v1587_v0  ;;  %vm1706_vm7 = vcmp.gt.f32.partialorder %v1703_v17, 0.0  ;;  %v1709_v24 = vmul.f32 0.2, %v1703_v17 }
 0x428   : > { %v1598_v60 = vmul.f32 %v5878_v44, %v1590_v50  ;;  %v1651_v3 = vsel %vm1645_vm6, %v1642_v25, %v1648_v20  ;;  %v1339_v18 = vadd.f32 %v5931_v52, %v7699_v47  ;;  %v1396_v34 = vadd.f32 %v5902_v53, %v7700_v49  ;;  %v7704_v52 = vld [vmem:[#allocation62_spill] sm:$0xff]  ;;  %v7705_v53 = vld [vmem:[#allocation71_spill] sm:$0xff]  ;;  %v927_v20 = vpop.permute.xlu0 %926  ;;  %v6060_v47 = vpop.permute.xlu1 %1166 }
 0x429   : > { %v1540_v59 = vadd.f32 %v1537_v13, %v1479_v22  ;;  %v1659_v55 = vmul.f32 %v5887_v29, %v1651_v3  ;;  %v1712_v36 = vsel %vm1706_vm7, %v1703_v17, %v1709_v24  ;;  %v1457_v31 = vadd.f32 %v5905_v62, %v7701_v12  ;;  %v7706_v62 = vld [vmem:[#allocation42_spill] sm:$0xff] }
 0x42a   : > { %v1720_v37 = vmul.f32 %v5896_v26, %v1712_v36  ;;  %vm1342_vm8 = vcmp.gt.f32.partialorder %v1339_v18, 0.0  ;;  %v1345_v6 = vmul.f32 0.2, %v1339_v18  ;;  %v1399_v10 = vadd.f32 %v1396_v34, %v7702_v40  ;;  %v7707_v34 = vld [vmem:[#allocation87_spill] sm:$0xff]  ;;  %v7708_v36 = vld [vmem:[#allocation29_spill] sm:$0xff] }
 0x42b   : > { %v1601_v25 = vadd.f32 %v1598_v60, %v1540_v59  ;;  %v1460_v0 = vadd.f32 %v1457_v31, %v7703_v15  ;;  %v1518_v61 = vadd.f32 %v5908_v30, %v7704_v52  ;;  %v1579_v13 = vadd.f32 %v5913_v23, %v7705_v53  ;;  %v7710_v52 = vld [vmem:[#allocation33_spill] sm:$0xff] }
 0x42c   : > { %v1348_v17 = vsel %vm1342_vm8, %v1339_v18, %v1345_v6  ;;  %vm1402_vm9 = vcmp.gt.f32.partialorder %v1399_v10, 0.0  ;;  %v1405_v22 = vmul.f32 0.2, %v1399_v10  ;;  %v1640_v50 = vadd.f32 %v5916_v28, %v7706_v62  ;;  %v1110_v53 = vpop.permute.xlu1 %1109 }
 0x42d   : > { %v1662_v24 = vadd.f32 %v1659_v55, %v1601_v25  ;;  %v1355_v3 = vmul.f32 %v5748_v54, %v1348_v17  ;;  %vm1463_vm10 = vcmp.gt.f32.partialorder %v1460_v0, 0.0  ;;  %v1466_v60 = vmul.f32 0.2, %v1460_v0 }
 0x42e   : > { %v1408_v49 = vsel %vm1402_vm9, %v1399_v10, %v1405_v22  ;;  %v1521_v30 = vadd.f32 %v1518_v61, %v7707_v34  ;;  %v1582_v59 = vadd.f32 %v1579_v13, %v5875_v2  ;;  %v1643_v23 = vadd.f32 %v1640_v50, %v5884_v48  ;;  %v988_v2 = vpop.permute.xlu0 %987  ;;  %v7711_v50 = vld [vmem:[#allocation37_spill] sm:$0xff] }
 0x42f   : > { %v1723_v18 = vadd.f32 %v1720_v37, %v1662_v24  ;;  %v1358_v12 = vadd.f32 %v1355_v3, %v7708_v36  ;;  %v1416_v31 = vmul.f32 %v7684_v35, %v1408_v49  ;;  %v1469_v28 = vsel %vm1463_vm10, %v1460_v0, %v1466_v60  ;;  %v7709_v37 = vld [vmem:[#allocation52_spill] sm:$0xff] }
 0x430   : > { %v1477_v55 = vmul.f32 %v7686_v21, %v1469_v28  ;;  %vm1524_vm11 = vcmp.gt.f32.partialorder %v1521_v30, 0.0  ;;  %v1527_v54 = vmul.f32 0.2, %v1521_v30  ;;  %vm1585_vm13 = vcmp.gt.f32.partialorder %v1582_v59, 0.0 }
 0x431   : > { %v6069_v6 = vadd.f32 %v5993_v58, %v1723_v18  ;;  %v1419_v40 = vadd.f32 %v1416_v31, %v1358_v12  ;;  %v1588_v10 = vmul.f32 0.2, %v1582_v59  ;;  %vm1646_vm0 = vcmp.gt.f32.partialorder %v1643_v23, 0.0  ;;  %v7713_v18 = vld [vmem:[#allocation46_spill] sm:$0xff] }
 0x432   : > { %v1530_v25 = vsel %vm1524_vm11, %v1521_v30, %v1527_v54  ;;  %v1649_v48 = vmul.f32 0.2, %v1643_v23  ;;  %v1701_v15 = vadd.f32 %v5976_v7, %v7709_v37  ;;  %v817_v35 = vadd.f32 %v5942_v8, %v7710_v52  ;;  %v1049_v30 = vpop.permute.xlu0 %1048  ;;  %v7714_v12 = vld [vmem:[#allocation50_spill] sm:$0xff]  ;;  %v1171_v54 = vpop.permute.xlu1 %1170 }
 0x433   : > { %v1789_v21 = vsel %vm690_vm15, %v6069_v6, -inf  ;;  %v1480_v0 = vadd.f32 %v1477_v55, %v1419_v40  ;;  %v1538_v61 = vmul.f32 %v7689_v39, %v1530_v25  ;;  %v1591_v58 = vsel %vm1585_vm13, %v1582_v59, %v1588_v10  ;;  %v7712_v59 = vld [vmem:[#allocation31_spill] sm:$0xff] }
 0x434   : > { %1790 = vmax.xlane.f32.xlu1 %v1789_v21  ;;  %vm1270_vm2 = vcmask 177152   ;;  %v1599_v13 = vmul.f32 %v5878_v44, %v1591_v58  ;;  %v1652_v17 = vsel %vm1646_vm0, %v1643_v23, %v1649_v48  ;;  %v1704_v22 = vadd.f32 %v1701_v15, %v5893_v46  ;;  %v7715_v10 = vld [vmem:[#allocation35_spill] sm:$0xff]  ;;  %v7716_v15 = vld [vmem:[#allocation56_spill] sm:$0xff]  ;;  %v7717_v58 = vld [vmem:[#allocation38_spill] sm:$0xff] }
 0x435   : > { %vm820_vm3 = vcmp.gt.f32.partialorder %v817_v35, 0.0  ;;  %v1541_v7 = vadd.f32 %v1538_v61, %v1480_v0  ;;  %v1660_v62 = vmul.f32 %v5887_v29, %v1652_v17  ;;  %v823_v8 = vmul.f32 0.2, %v817_v35 }
 0x436   : > { %v877_v24 = vadd.f32 %v5945_v45, %v7711_v50  ;;  %vm1707_vm5 = vcmp.gt.f32.partialorder %v1704_v22, 0.0  ;;  %v1710_v3 = vmul.f32 0.2, %v1704_v22  ;;  %v935_v39 = vadd.f32 %v5949_v14, %v927_v20 }
 0x437   : > { %v996_v60 = vadd.f32 %v5953_v5, %v988_v2  ;;  %v1602_v49 = vadd.f32 %v1599_v13, %v1541_v7  ;;  %v826_v34 = vsel %vm820_vm3, %v817_v35, %v823_v8  ;;  %v1057_v20 = vadd.f32 %v5957_v1, %v1049_v30  ;;  %v7719_v8 = vld [vmem:[#allocation60_spill] sm:$0xff]  ;;  %v7721_v30 = vld [vmem:[#allocation65_spill] sm:$0xff] }
 0x438   : > { %vm880_vm6 = vcmp.gt.f32.partialorder %v877_v24, 0.0  ;;  %v883_v44 = vmul.f32 0.2, %v877_v24  ;;  %v1713_v46 = vsel %vm1707_vm5, %v1704_v22, %v1710_v3  ;;  %v833_v23 = vmul.f32 %v7712_v59, %v826_v34  ;;  %v7718_v22 = vld [vmem:[#allocation47_spill] sm:$0xff] }
 0x439   : > { %v938_v29 = vadd.f32 %v935_v39, %v7713_v18  ;;  %v999_v31 = vadd.f32 %v996_v60, %v7714_v12  ;;  %v1663_v28 = vadd.f32 %v1660_v62, %v1602_v49  ;;  %v1721_v45 = vmul.f32 %v5896_v26, %v1713_v46  ;;  %v1232_v49 = vpop.permute.xlu1 %1231  ;;  %v7722_v18 = vld [vmem:[#allocation51_spill] sm:$0xff] }
 0x43a   : > { %v886_v55 = vsel %vm880_vm6, %v877_v24, %v883_v44  ;;  %v836_v40 = vadd.f32 %v833_v23, %v7708_v36  ;;  %v1060_v52 = vadd.f32 %v1057_v20, %v7716_v15  ;;  %v1118_v0 = vadd.f32 %v5961_v11, %v1110_v53  ;;  %v7724_v20 = vld [vmem:[#allocation69_spill] sm:$0xff] }
 0x43b   : > { %v894_v2 = vmul.f32 %v7715_v10, %v886_v55  ;;  %vm941_vm7 = vcmp.gt.f32.partialorder %v938_v29, 0.0  ;;  %v944_v25 = vmul.f32 0.2, %v938_v29  ;;  %v1724_v48 = vadd.f32 %v1721_v45, %v1663_v28  ;;  %v7723_v55 = vld [vmem:[#allocation57_spill] sm:$0xff] }
 0x43c   : > { %vm1002_vm8 = vcmp.gt.f32.partialorder %v999_v31, 0.0  ;;  %v1005_v37 = vmul.f32 0.2, %v999_v31  ;;  %v6096_v26 = vrot.slane %v5910_v16, %v5836_v43  ;;  %vm1063_vm9 = vcmp.gt.f32.partialorder %v1060_v52, 0.0 }
 0x43d   : > { %v897_v35 = vadd.f32 %v894_v2, %v836_v40  ;;  %v947_v21 = vsel %vm941_vm7, %v938_v29, %v944_v25  ;;  %v6099_v61 = vadd.f32 %v5996_v9, %v1724_v48  ;;  %v1066_v62 = vmul.f32 0.2, %v1060_v52  ;;  %v7720_v9 = vld [vmem:[#allocation30_spill] sm:$0xff]  ;;  %v7725_v40 = vld [vmem:[#allocation25_spill] sm:$0xff] }
 0x43e   : > { %v955_v13 = vmul.f32 %v7717_v58, %v947_v21  ;;  %v1008_v17 = vsel %vm1002_vm8, %v999_v31, %v1005_v37  ;;  %v1121_v50 = vadd.f32 %v1118_v0, %v7719_v8  ;;  %v1179_v24 = vadd.f32 %v6096_v26, %v1171_v54  ;;  %v7726_v37 = vld [vmem:[#allocation26_spill] sm:$0xff]  ;;  %v7728_v0 = vld [vmem:[#allocation61_spill] sm:$0xff] }
 0x43f   : > { %v1016_v7 = vmul.f32 %v7718_v22, %v1008_v17  ;;  %v1792_v53 = vsel %vm1270_vm2, %v6099_v61, -inf  ;;  %v6109_v39 = vrot.slane %v5910_v16, %v5833_v42  ;;  %v815_v60 = vadd.f32 %v5937_v4, %v7720_v9 }
 0x440   : > { %v958_v3 = vadd.f32 %v955_v13, %v897_v35  ;;  %1793 = vmax.xlane.f32.xlu0 %v1792_v53  ;;  %v1069_v34 = vsel %vm1063_vm9, %v1060_v52, %v1066_v62  ;;  %vm1124_vm10 = vcmp.gt.f32.partialorder %v1121_v50, 0.0  ;;  %v1127_v44 = vmul.f32 0.2, %v1121_v50  ;;  %v7727_v52 = vld [vmem:[#allocation78_spill] sm:$0xff]  ;;  %v7731_v53 = vld [vmem:[#allocation48_spill] sm:$0xff] }
 0x441   : > { %v1182_v46 = vadd.f32 %v1179_v24, %v7721_v30  ;;  %v1077_v29 = vmul.f32 %v7722_v18, %v1069_v34  ;;  %v1240_v12 = vadd.f32 %v6109_v39, %v1232_v49  ;;  %vm818_vm11 = vcmp.gt.f32.partialorder %v815_v60, 0.0  ;;  %v7729_v62 = vld [vmem:[#allocation34_spill] sm:$0xff] }
 0x442   : > { %v1019_v23 = vadd.f32 %v1016_v7, %v958_v3  ;;  %v1130_v31 = vsel %vm1124_vm10, %v1121_v50, %v1127_v44  ;;  %v821_v28 = vmul.f32 0.2, %v815_v60  ;;  %v872_v2 = vadd.f32 %v5922_v63, %v7725_v40  ;;  %v7730_v50 = vld [vmem:[#allocation44_spill] sm:$0xff]  ;;  %v7732_v44 = vld [vmem:[#allocation66_spill] sm:$0xff] }
 0x443   : > { %vm1185_vm13 = vcmp.gt.f32.partialorder %v1182_v46, 0.0  ;;  %v1188_v16 = vmul.f32 0.2, %v1182_v46  ;;  %v1138_v4 = vmul.f32 %v7723_v55, %v1130_v31  ;;  %v1243_v54 = vadd.f32 %v1240_v12, %v7724_v20 }
 0x444   : > { %v1080_v45 = vadd.f32 %v1077_v29, %v1019_v23  ;;  %v824_v48 = vsel %vm818_vm11, %v815_v60, %v821_v28  ;;  %v933_v15 = vadd.f32 %v5949_v14, %v7726_v37  ;;  %v994_v35 = vadd.f32 %v5953_v5, %v7727_v52  ;;  %v7733_v28 = vld [vmem:[#allocation54_spill] sm:$0xff] }
 0x445   : > { %v1191_v25 = vsel %vm1185_vm13, %v1182_v46, %v1188_v16  ;;  %vm1246_vm0 = vcmp.gt.f32.partialorder %v1243_v54, 0.0  ;;  %v1249_v17 = vmul.f32 0.2, %v1243_v54  ;;  %v831_v7 = vmul.f32 %v7712_v59, %v824_v48 }
 0x446   : > { %v1141_v21 = vadd.f32 %v1138_v4, %v1080_v45  ;;  %v1199_v13 = vmul.f32 %v7728_v0, %v1191_v25  ;;  %v875_v8 = vadd.f32 %v872_v2, %v7729_v62  ;;  %v936_v24 = vadd.f32 %v933_v15, %v7730_v50  ;;  %v7734_v4 = vld [vmem:[#allocation58_spill] sm:$0xff] }
 0x447   : > { %v997_v3 = vadd.f32 %v994_v35, %v7731_v53  ;;  %v1252_v60 = vsel %vm1246_vm0, %v1243_v54, %v1249_v17  ;;  %v1055_v49 = vadd.f32 %v5957_v1, %v5871_v33  ;;  %v1116_v34 = vadd.f32 %v5961_v11, %v5981_v19  ;;  %v7735_v35 = vld [vmem:[#allocation63_spill] sm:$0xff]  ;;  %v7736_v17 = vld [vmem:[#allocation32_spill] sm:$0xff]  ;;  %v7738_v62 = vld [vmem:[#allocation70_spill] sm:$0xff] }
 0x448   : > { %v1202_v9 = vadd.f32 %v1199_v13, %v1141_v21  ;;  %v1260_v30 = vmul.f32 %v7732_v44, %v1252_v60  ;;  %v834_v46 = vadd.f32 %v831_v7, %v7685_v38  ;;  %vm878_vm3 = vcmp.gt.f32.partialorder %v875_v8, 0.0 }
 0x449   : > { %v881_v23 = vmul.f32 0.2, %v875_v8  ;;  %vm939_vm5 = vcmp.gt.f32.partialorder %v936_v24, 0.0  ;;  %v942_v29 = vmul.f32 0.2, %v936_v24  ;;  %vm1000_vm6 = vcmp.gt.f32.partialorder %v997_v3, 0.0 }
 0x44a   : > { %v1003_v12 = vmul.f32 0.2, %v997_v3  ;;  %v6135_v31 = vadd.f32 %v1260_v30, %v1202_v9  ;;  %v1058_v45 = vadd.f32 %v1055_v49, %v7733_v28  ;;  %v1119_v33 = vadd.f32 %v1116_v34, %v7734_v4 }
 0x44b   : > { %v884_v16 = vsel %vm878_vm3, %v875_v8, %v881_v23  ;;  %v945_v19 = vsel %vm939_vm5, %v936_v24, %v942_v29  ;;  %v1177_v40 = vadd.f32 %v6096_v26, %v6010_v56  ;;  %v1238_v13 = vadd.f32 %v6109_v39, %v6040_v57  ;;  %v7737_v56 = vld [vmem:[#allocation90_spill] sm:$0xff]  ;;  %v7740_v57 = vld [vmem:[#allocation67_spill] sm:$0xff] }
 0x44c   : > { %v892_v20 = vmul.f32 %v7715_v10, %v884_v16  ;;  %v1006_v54 = vsel %vm1000_vm6, %v997_v3, %v1003_v12  ;;  %v1271_v2 = vsel %vm1270_vm2, %v6135_v31, -inf  ;;  %v953_v25 = vmul.f32 %v7717_v58, %v945_v19  ;;  %v7739_v3 = vld [vmem:[#allocation88_spill] sm:$0xff]  ;;  %v7742_v16 = vld [vmem:[#allocation45_spill] sm:$0xff] }
 0x44d   : > { %v1014_v48 = vmul.f32 %v7718_v22, %v1006_v54  ;;  %vm1061_vm7 = vcmp.gt.f32.partialorder %v1058_v45, 0.0  ;;  %1272 = vmax.xlane.f32.xlu1 %v1271_v2  ;;  %v1064_v15 = vmul.f32 0.2, %v1058_v45  ;;  %vm1122_vm8 = vcmp.gt.f32.partialorder %v1119_v33, 0.0  ;;  %v7741_v12 = vld [vmem:[#allocation36_spill] sm:$0xff] }
 0x44e   : > { %v895_v37 = vadd.f32 %v892_v20, %v834_v46  ;;  %v1125_v52 = vmul.f32 0.2, %v1119_v33  ;;  %v1180_v21 = vadd.f32 %v1177_v40, %v7735_v35  ;;  %v816_v7 = vadd.f32 %v7737_v56, %v7736_v17 }
 0x44f   : > { %v873_v8 = vadd.f32 %v5922_v63, %v7738_v62  ;;  %v1067_v24 = vsel %vm1061_vm7, %v1058_v45, %v1064_v15  ;;  %v934_v9 = vadd.f32 %v5949_v14, %v7739_v3  ;;  %v1241_v46 = vadd.f32 %v1238_v13, %v7740_v57  ;;  %v7743_v45 = vld [vmem:[#allocation89_spill] sm:$0xff] }
 0x450   : > { %v956_v50 = vadd.f32 %v953_v25, %v895_v37  ;;  %v1128_v53 = vsel %vm1122_vm8, %v1119_v33, %v1125_v52  ;;  %v1075_v60 = vmul.f32 %v7722_v18, %v1067_v24  ;;  %vm1183_vm9 = vcmp.gt.f32.partialorder %v1180_v21, 0.0  ;;  %v7744_v52 = vld [vmem:[#allocation49_spill] sm:$0xff] }
 0x451   : > { %v1136_v49 = vmul.f32 %v7723_v55, %v1128_v53  ;;  %v1186_v34 = vmul.f32 0.2, %v1180_v21  ;;  %vm819_vm10 = vcmp.gt.f32.partialorder %v816_v7, 0.0  ;;  %v822_v23 = vmul.f32 0.2, %v816_v7 }
 0x452   : > { %v1017_v30 = vadd.f32 %v1014_v48, %v956_v50  ;;  %v876_v63 = vadd.f32 %v873_v8, %v7741_v12  ;;  %v937_v28 = vadd.f32 %v934_v9, %v7742_v16  ;;  %v995_v4 = vadd.f32 %v5953_v5, %v7743_v45 }
 0x453   : > { %v1189_v29 = vsel %vm1183_vm9, %v1180_v21, %v1186_v34  ;;  %vm1244_vm11 = vcmp.gt.f32.partialorder %v1241_v46, 0.0  ;;  %v1247_v20 = vmul.f32 0.2, %v1241_v46  ;;  %v825_v19 = vsel %vm819_vm10, %v816_v7, %v822_v23  ;;  %v7747_v34 = vld [vmem:[#allocation59_spill] sm:$0xff] }
 0x454   : > { %v1078_v14 = vadd.f32 %v1075_v60, %v1017_v30  ;;  %v1197_v33 = vmul.f32 %v7728_v0, %v1189_v29  ;;  %vm879_vm13 = vcmp.gt.f32.partialorder %v876_v63, 0.0  ;;  %v882_v54 = vmul.f32 0.2, %v876_v63 }
 0x455   : > { %vm940_vm0 = vcmp.gt.f32.partialorder %v937_v28, 0.0  ;;  %v1250_v2 = vsel %vm1244_vm11, %v1241_v46, %v1247_v20  ;;  %v832_v25 = vmul.f32 %v7712_v59, %v825_v19  ;;  %v943_v48 = vmul.f32 0.2, %v937_v28  ;;  %v7745_v59 = vld [vmem:[#allocation55_spill] sm:$0xff]  ;;  %v7749_v46 = vld [vmem:[#allocation68_spill] sm:$0xff] }
 0x456   : > { %v1139_v40 = vadd.f32 %v1136_v49, %v1078_v14  ;;  %v1258_v37 = vmul.f32 %v7732_v44, %v1250_v2  ;;  %v885_v15 = vsel %vm879_vm13, %v876_v63, %v882_v54  ;;  %v998_v35 = vadd.f32 %v995_v4, %v7744_v52 }
 0x457   : > { %v1056_v5 = vadd.f32 %v5957_v1, %v5988_v27  ;;  %v835_v13 = vadd.f32 %v832_v25, %v7694_v51  ;;  %v893_v17 = vmul.f32 %v7715_v10, %v885_v15  ;;  %v946_v56 = vsel %vm940_vm0, %v937_v28, %v943_v48  ;;  %v7746_v10 = vld [vmem:[#allocation79_spill] sm:$0xff] }
 0x458   : > { %v1200_v21 = vadd.f32 %v1197_v33, %v1139_v40  ;;  %v954_v7 = vmul.f32 %v7717_v58, %v946_v56  ;;  %vm1001_vm3 = vcmp.gt.f32.partialorder %v998_v35, 0.0  ;;  %v1004_v62 = vmul.f32 0.2, %v998_v35 }
 0x459   : > { %v1059_v8 = vadd.f32 %v1056_v5, %v7745_v59  ;;  %v896_v24 = vadd.f32 %v893_v17, %v835_v13  ;;  %v1117_v53 = vadd.f32 %v5961_v11, %v6027_v41  ;;  %v1178_v1 = vadd.f32 %v6096_v26, %v6060_v47  ;;  %v7748_v11 = vld [vmem:[#allocation64_spill] sm:$0xff]  ;;  %v7751_v13 = vld [vmem:[#allocation15_spill] sm:$0xff] }
 0x45a   : > { %v6172_v50 = vadd.f32 %v1258_v37, %v1200_v21  ;;  %v1007_v27 = vsel %vm1001_vm3, %v998_v35, %v1004_v62  ;;  %v1239_v9 = vadd.f32 %v6109_v39, %v7746_v10  ;;  %v7753_v62 = vld [vmem:[#allocation18_spill] sm:$0xff]  ;;  %vm2048_vm9 = vcmask 130048  }
 0x45b   : > { %vm1062_vm5 = vcmp.gt.f32.partialorder %v1059_v8, 0.0  ;;  %v1065_v3 = vmul.f32 0.2, %v1059_v8  ;;  %v957_v60 = vadd.f32 %v954_v7, %v896_v24  ;;  %v1015_v49 = vmul.f32 %v7718_v22, %v1007_v27 }
 0x45c   : > { %v1264_v58 = vsel %vm690_vm15, %v6172_v50, -inf  ;;  %v1120_v30 = vadd.f32 %v1117_v53, %v7747_v34  ;;  %v1181_v41 = vadd.f32 %v1178_v1, %v7748_v11  ;;  %v1242_v47 = vadd.f32 %v1239_v9, %v7749_v46 }
 0x45d   : > { %1265 = vmax.xlane.f32.xlu0 %v1264_v58  ;;  %v1068_v57 = vsel %vm1062_vm5, %v1059_v8, %v1065_v3  ;;  %v1018_v26 = vadd.f32 %v1015_v49, %v957_v60 }
 0x45e   : > { %v1076_v23 = vmul.f32 %v7722_v18, %v1068_v57  ;;  %vm1123_vm6 = vcmp.gt.f32.partialorder %v1120_v30, 0.0  ;;  %v1126_v29 = vmul.f32 0.2, %v1120_v30  ;;  %vm1184_vm7 = vcmp.gt.f32.partialorder %v1181_v41, 0.0 }
 0x45f   : > { %v1187_v39 = vmul.f32 0.2, %v1181_v41  ;;  %vm1245_vm8 = vcmp.gt.f32.partialorder %v1242_v47, 0.0  ;;  %v1248_v12 = vmul.f32 0.2, %v1242_v47 }
 0x460   : > { %v1079_v63 = vadd.f32 %v1076_v23, %v1018_v26  ;;  %v1129_v16 = vsel %vm1123_vm6, %v1120_v30, %v1126_v29 }
 0x461   : > { %v1137_v22 = vmul.f32 %v7723_v55, %v1129_v16  ;;  %v1190_v28 = vsel %vm1184_vm7, %v1181_v41, %v1187_v39  ;;  %v1251_v45 = vsel %vm1245_vm8, %v1242_v47, %v1248_v12  ;;  %v7754_v47 = vmov 0.0  }
 0x462   : > { %v1198_v14 = vmul.f32 %v7728_v0, %v1190_v28  ;;  %v1259_v20 = vmul.f32 %v7732_v44, %v1251_v45  ;;  %v7755_v16 = vmov 1.0|1.0   ;;  %v7757_v45 = vld [vmem:[#allocation16_spill] sm:$0xff] }
 0x463   : > { %v1140_v4 = vadd.f32 %v1137_v22, %v1079_v63 }
 0x465   : > { %v1201_v33 = vadd.f32 %v1198_v14, %v1140_v4  ;;  %v7758_v4 = vmov 0.0|0.0  }
 0x467   : > { %v1262_v19 = vadd.f32 %v1259_v20, %v1201_v33 }
 0x469   : > { %v1267_v18 = vsel %vm690_vm15, %v1262_v19, -inf }
 0x46a   : > { %1268 = vmax.xlane.f32.xlu0 %v1267_v18 }
 0x4b4   : > { %v1788_v54 = vpop.xlane.xlu0 %1787 }
 0x4b5   : > { %v1795_v40 = vsub.f32 %v6032_v32, %v1788_v54 }
 0x4b7   : > { %v1798_v2 = vmul.f32 1.442695, %v1795_v40 }
 0x4b9   : > { %4855 = vpow2.f32 %v1798_v2 }
 0x4c1   : > { %v1791_v25 = vpop.xlane.xlu1 %1790 }
 0x4c2   : > { %v1796_v55 = vsub.f32 %v6069_v6, %v1791_v25  ;;  %v7750_v6 = vld [vmem:[#allocation17_spill] sm:$0xff] }
 0x4c3   : > { %v4856_v48 = vpop.eup %4855  ;;  %v7752_v17 = vpack.i.bf16 %v7750_v6, %v7751_v13  ;;  %v2045_v6 = vld [vmem:[%s7473_s5 + $0x50] sm:$0xf] }
 0x4c4   : > { %v1800_v37 = vmul.f32 1.442695, %v1796_v55  ;;  %v1804_v15 = vsel %vm690_vm15, %v4856_v48, 0.0  ;;  %4588 = vpush %v2045_v6 }
 0x4c5   : > { %1805 = vadd.xlane.f32.xlu0 %v1804_v15 }
 0x4c6   : > { %4857 = vpow2.f32 %v1800_v37 }
 0x4cd   : > { %v1794_v0 = vpop.xlane.xlu0 %1793 }
 0x4ce   : > { %v1797_v44 = vsub.f32 %v6099_v61, %v1794_v0 }
 0x4d0   : > { %v4858_v52 = vpop.eup %4857  ;;  %v1802_v35 = vmul.f32 1.442695, %v1797_v44  ;;  %v2043_v44 = vld [vmem:[%s7473_s5 + $0x40] sm:$0xff] }
 0x4d1   : > { %v1807_v5 = vsel %vm690_vm15, %v4858_v52, 0.0 }
 0x4d2   : > { %4859 = vpow2.f32 %v1802_v35  ;;  %1808 = vadd.xlane.f32.xlu1 %v1807_v5 }
 0x4da   : > { %v1273_v61 = vpop.xlane.xlu1 %1272 }
 0x4db   : > { %v1276_v59 = vsub.f32 %v6135_v31, %v1273_v61 }
 0x4dc   : > { %v4860_v32 = vpop.eup %4859 }
 0x4dd   : > { %v1810_v21 = vsel %vm1270_vm2, %v4860_v32, 0.0  ;;  %v1281_v24 = vmul.f32 1.442695, %v1276_v59 }
 0x4de   : > { %1811 = vadd.xlane.f32.xlu0 %v1810_v21 }
 0x4e3   : > { %4799 = vrot.lane.b32.xlu1 %v7752_v17, %s5004_s7  ;;  %v6250_v17 = vrot.slane %v2045_v6, 1 }
 0x4e5   : > { %4590 = vpush %v6250_v17 }
 0x4ea   : > { %v1266_v56 = vpop.xlane.xlu0 %1265 }
 0x4eb   : > { %v1274_v7 = vsub.f32 %v6172_v50, %v1266_v56  ;;  %v2046_v56 = vld [vmem:[%s7473_s5 + $0x58] sm:$0x3] }
 0x4ec   : > { %4592 = vpush %v2046_v56 }
 0x4ed   : > { %v1277_v8 = vmul.f32 1.442695, %v1274_v7 }
 0x4ef   : > { %4861 = vpow2.f32 %v1277_v8 }
 0x4f0   : > { %4863 = vpow2.f32 %v1281_v24 }
 0x4f4   : > { %1917 = vrot.lane.b32.xlu0 %v7753_v62, %s5004_s7 }
 0x4f5   : > { %s6488_s26 = spop %4588 }
 0x4f7   : > { %v1269_v53 = vpop.xlane.xlu0 %1268 }
 0x4f8   : > { %v1275_v1 = vsub.f32 %v1262_v19, %v1269_v53 }
 0x4f9   : > { %v4862_v3 = vpop.eup %4861 }
 0x4fa   : > { %v1279_v27 = vmul.f32 1.442695, %v1275_v1  ;;  %v1283_v10 = vsel %vm690_vm15, %v4862_v3, 0.0  ;;  %v4864_v9 = vpop.eup %4863 }
 0x4fb   : > { %v1289_v50 = vsel %vm1270_vm2, %v4864_v9, 0.0 }
 0x4fc   : > { %4865 = vpow2.f32 %v1279_v27  ;;  %v6282_v27 = vrot.slane %v2045_v6, 3 }
 0x506   : > { %v4866_v58 = vpop.eup %4865 }
 0x507   : > { %1284 = vadd.xlane.f32.xlu1 %v1283_v10  ;;  %v1286_v60 = vsel %vm690_vm15, %v4866_v58, 0.0  ;;  %v6290_v10 = vrot.slane %v2046_v56, 1 }
 0x50b   : > { %1290 = vadd.xlane.f32.xlu1 %v1289_v50 }
 0x513   : > { %1287 = vadd.xlane.f32.xlu0 %v1286_v60 }
 0x516   : > { %s6490_s21 = spop %4590 }
 0x51d   : > { %s6492_s0 = spop %4592 }
 0x552   : > { %v1806_v31 = vpop.xlane.xlu0 %1805 }
 0x553   : > { %v1813_v49 = vmax.f32 %v1806_v31, 1e-30 }
 0x555   : > { %4867 = vrcp.f32 %v1813_v49 }
 0x55f   : > { %v1809_v34 = vpop.xlane.xlu1 %1808  ;;  %v4868_v26 = vpop.eup %4867 }
 0x560   : > { %v1814_v30 = vmax.f32 %v1809_v34, 1e-30  ;;  %v1819_v39 = vmul.f32 %v4868_v26, %v4856_v48 }
 0x562   : > { %4869 = vrcp.f32 %v1814_v30 }
 0x563   : > { %v4800_v57 = vpop.permute.xlu1 %4799 }
 0x564   : > { %v4802_v11 = vunpack.i.h.bf16 %v4800_v57  ;;  %v4801_v41 = vunpack.i.l.bf16 %v4800_v57 }
 0x566   : > { %v4454_v46 = vpack.c.bf16 %v4802_v11, %v4801_v41 }
 0x568   : > { %4455 = vmatpush3.bf16.msra.mxu0 %v4454_v46 }
 0x569   : > { %4329 = vmatprep.subr.mxu0 %v7754_v47 }
 0x56b   : > { %v1812_v23 = vpop.xlane.xlu0 %1811 }
 0x56c   : > { %v1815_v29 = vmax.f32 %v1812_v23, 1e-30  ;;  %v4870_v63 = vpop.eup %4869 }
 0x56d   : > { %v1820_v28 = vmul.f32 %v4870_v63, %v4858_v52  ;;  %v2044_v52 = vld [vmem:[%s7473_s5 + $0x48] sm:$0xff] }
 0x56e   : > { %4871 = vrcp.f32 %v1815_v29  ;;  %v4457_v35 = vpack.c.bf16 %v2044_v52, %v2043_v44  ;;  %v7770_v52 = vmov 18  }
 0x56f   : > { %v1918_v12 = vpop.permute.xlu0 %1917 }
 0x570   : > { %4330 = vmatpush3.msk.msra.mxu0 %vm697_vm14, %v1918_v12 }
 0x571   : > { %4332 = vmatmul.mubr.msk.f32.vlgmr.msra.gmra.mrb[12].mxu0 %vm690_vm15, %v1819_v39  ;;  %4460 = vmatprep.subr.msk.bf16.mxu0 %vm5229_vm12, %v7755_v16 }
 0x572   : > { %4334 = vmatprep.mubr.msk.f32.mxu0 %vm4978_vm1, %v7754_v47  ;;  %4462 = vmatpush3.bf16.msk.msra.mxu0 %vm5229_vm12, %v7755_v16 }
 0x573   : > { %4357 = vmatprep.subr.msk.mxu0 %vm697_vm14, %v7757_v45 }
 0x575   : > { %4335 = vmatmul.mubr.msk.f32.gmra.mrb[14].mxu0 %vm690_vm15, %v1820_v28 }
 0x576   : > { %4337 = vmatprep.mubr.msk.f32.mxu0 %vm4978_vm1, %v7754_v47  ;;  %4358 = vmatpush3.msk.msra.mxu0 %vm697_vm14, %v7757_v45 }
 0x577   : > { %4463 = vmatprep.subr.bf16.mxu0 %v7758_v4 }
 0x578   : > { %v4872_v14 = vpop.eup %4871 }
 0x579   : > { %v1821_v33 = vmul.f32 %v4872_v14, %v4860_v32 }
 0x57b   : > { %4338 = vmatmul.mubr.msk.f32.gmra.mrb[16].mxu0 %vm690_vm15, %v1821_v33 }
 0x594   : > { %v1285_v20 = vpop.xlane.xlu1 %1284 }
 0x595   : > { %v1292_v19 = vmax.f32 %v1285_v20, 1e-30 }
 0x597   : > { %4873 = vrcp.f32 %v1292_v19 }
 0x598   : > { %v1291_v18 = vpop.xlane.xlu1 %1290 }
 0x599   : > { %v1294_v2 = vmax.f32 %v1291_v18, 1e-30 }
 0x5a0   : > { %v1288_v54 = vpop.xlane.xlu0 %1287 }
 0x5a1   : > { %v4874_v40 = vpop.eup %4873  ;;  %v1293_v25 = vmax.f32 %v1288_v54, 1e-30 }
 0x5a2   : > { %v1298_v55 = vmul.f32 %v4874_v40, %v4862_v3  ;;  %v6286_v3 = vrot.slane %v2045_v6, 2 }
 0x5a3   : > { %4875 = vrcp.f32 %v1293_v25 }
 0x5a4   : > { %4317 = vmatmul.mubr.msk.f32.vlgmr.msra.gmra.mrb[8].mxu1 %vm690_vm15, %v1298_v55  ;;  %4877 = vrcp.f32 %v1294_v2 }
 0x5a5   : > { %4319 = vmatprep.mubr.msk.f32.mxu1 %vm4978_vm1, %v7754_v47  ;;  %4458 = vmatpush3.bf16.msra.mxu1 %v4457_v35 }
 0x5a6   : > { %4466 = vmatprep.subr.bf16.mxu1 %v7758_v4 }
 0x5ad   : > { %v4876_v48 = vpop.eup %4875 }
 0x5ae   : > { %v1299_v37 = vmul.f32 %v4876_v48, %v4866_v58  ;;  %v4878_v15 = vpop.eup %4877  ;;  %v7768_v48 = vmov 31  }
 0x5af   : > { %v1300_v0 = vmul.f32 %v4878_v15, %v4864_v9  ;;  %v4165_v9 = vld [vmem:[%s7473_s5 + $0x38] ss:$0 sm:$0xff] }
 0x5b0   : > { %4320 = vmatmul.mubr.msk.f32.gmra.mrb[10].mxu1 %vm690_vm15, %v1299_v37 }
 0x5b1   : > { %4322 = vmatprep.mubr.msk.f32.mxu1 %vm4978_vm1, %v7754_v47 }
 0x5b4   : > { %4323 = vmatmul.mubr.msk.f32.gmra.mrb[12].mxu1 %vm690_vm15, %v1300_v0 }
 0x5b5   : > { %4344 = vmatprep.mubr.msk.f32.mxu1 %vm4978_vm1, %v7754_v47 }
 0x644   : > { %v1998_v5 = vpop.f32.mrb[12].mxu0 }
 0x645   : > { %2015 = vrot.lane.b32.xlu0 %v1998_v5, %s5005_s12  ;;  %v4333_v32 = vpop.f32.mrb[13].mxu0  ;;  %v7771_v5 = vmov 24  }
 0x646   : > { %v7772_v32 = vmov 25  }
 0x648   : > { %v2003_v21 = vpop.f32.mrb[14].mxu0 }
 0x649   : > { %2017 = vrot.lane.b32.xlu1 %v2003_v21, %s5005_s12  ;;  %v4336_v13 = vpop.f32.mrb[15].mxu0  ;;  %2312 = vrot.lane.b32.xlu0 %v2045_v6, %s7759_s23  ;;  %v7773_v21 = vmov 26  }
 0x64a   : > { %v7775_v13 = vmov 28  }
 0x64d   : > { %2320 = vrot.lane.b32.xlu0 %v6250_v17, %s7759_s23 }
 0x64e   : > { %v2008_v7 = vpop.f32.mrb[16].mxu0 }
 0x64f   : > { %2019 = vrot.lane.b32.xlu1 %v2008_v7, %s5005_s12  ;;  %v4339_v61 = vpop.f32.mrb[17].mxu0  ;;  %v7777_v7 = vmov 16  }
 0x650   : > { %v7779_v61 = vmov 19  }
 0x651   : > { %2362 = vrot.lane.b32.xlu0 %v2046_v56, %s7759_s23 }
 0x655   : > { %2373 = vrot.lane.b32.xlu0 %v2045_v6, %s7760_s4 }
 0x659   : > { %2381 = vrot.lane.b32.xlu0 %v6250_v17, %s7760_s4 }
 0x65d   : > { %2423 = vrot.lane.b32.xlu0 %v2046_v56, %s7760_s4 }
 0x661   : > { %2434 = vrot.lane.b32.xlu0 %v2045_v6, %s7761_s16 }
 0x665   : > { %2442 = vrot.lane.b32.xlu0 %v6250_v17, %s7761_s16 }
 0x669   : > { %2484 = vrot.lane.b32.xlu0 %v2046_v56, %s7761_s16 }
 0x66d   : > { %2495 = vrot.lane.b32.xlu0 %v2045_v6, %s7762_s17 }
 0x671   : > { %2503 = vrot.lane.b32.xlu0 %v6250_v17, %s7762_s17 }
 0x675   : > { %2545 = vrot.lane.b32.xlu0 %v2046_v56, %s7762_s17 }
 0x677   : > { %v1899_v62 = vpop.f32.mrb[8].mxu1 }
 0x678   : > { %v4318_v59 = vpop.f32.mrb[9].mxu1 }
 0x679   : > { %2556 = vrot.lane.b32.xlu0 %v2045_v6, %s7763_s28 }
 0x67d   : > { %2606 = vrot.lane.b32.xlu0 %v2046_v56, %s7763_s28 }
 0x681   : > { %2617 = vrot.lane.b32.xlu0 %v2045_v6, %s7764_s29 }
 0x683   : > { %v1904_v8 = vpop.f32.mrb[10].mxu1 }
 0x684   : > { %v4321_v24 = vpop.f32.mrb[11].mxu1 }
 0x685   : > { %2625 = vrot.lane.b32.xlu0 %v6250_v17, %s7764_s29 }
 0x687   : > { %v1909_v53 = vpop.f32.mrb[12].mxu1 }
 0x688   : > { %v4324_v1 = vpop.f32.mrb[13].mxu1 }
 0x689   : > { %2667 = vrot.lane.b32.xlu0 %v2046_v56, %s7764_s29  ;;  %v7781_v1 = vmov 29  }
 0x68d   : > { %2678 = vrot.lane.b32.xlu0 %v2045_v6, %s7765_s10  ;;  %v7774_v6 = vmov 27  }
 0x691   : > { %2686 = vrot.lane.b32.xlu0 %v6250_v17, %s7765_s10 }
 0x695   : > { %2728 = vrot.lane.b32.xlu0 %v2046_v56, %s7765_s10  ;;  %v7776_v56 = vmov 23  }
 0x699   : > { %2841 = vrot.lane.b32.xlu0 %v6282_v27, %s7759_s23 }
 0x69d   : > { %2894 = vrot.lane.b32.xlu0 %v6286_v3, %s7760_s4 }
 0x6a1   : > { %2944 = vrot.lane.b32.xlu0 %v6290_v10, %s7760_s4 }
 0x6a5   : > { %2963 = vrot.lane.b32.xlu0 %v6282_v27, %s7761_s16 }
 0x6a9   : > { %3016 = vrot.lane.b32.xlu0 %v6286_v3, %s7762_s17 }
 0x6ad   : > { %3066 = vrot.lane.b32.xlu0 %v6290_v10, %s7762_s17 }
 0x6b1   : > { %3085 = vrot.lane.b32.xlu0 %v6282_v27, %s7763_s28 }
 0x6b5   : > { %3138 = vrot.lane.b32.xlu0 %v6286_v3, %s7764_s29 }
 0x6b7   : > { %v2016_v50 = vpop.permute.xlu0 %2015 }
 0x6b8   : > { %v2024_v58 = vsel %vm466_vm4, %v1899_v62, %v2016_v50  ;;  %v7780_v62 = vmov 20  }
 0x6b9   : > { %v2031_v60 = vadd.f32 %v4165_v9, %v2024_v58  ;;  %3188 = vrot.lane.b32.xlu0 %v6290_v10, %s7764_s29 }
 0x6bb   : > { %vm2034_vm12 = vcmp.gt.f32.partialorder %v2031_v60, 0.0  ;;  %v2037_v31 = vmul.f32 0.1, %v2031_v60  ;;  %v2018_v49 = vpop.permute.xlu1 %2017  ;;  %v2313_v12 = vpop.permute.xlu0 %2312 }
 0x6bc   : > { %v2025_v34 = vsel %vm466_vm4, %v1904_v8, %v2018_v49  ;;  %4594 = vpush %v2313_v12 }
 0x6bd   : > { %v2040_v30 = vsel %vm2034_vm12, %v2031_v60, %v2037_v31  ;;  %v2032_v57 = vadd.f32 %v4165_v9, %v2025_v34  ;;  %3207 = vrot.lane.b32.xlu0 %v6282_v27, %s7765_s10  ;;  %v7782_v60 = vmov 30  }
 0x6be   : > { %4345 = vmatmul.mubr.msk.f32.vlgmr.msra.gmra.mrb[14].mxu1 %vm2048_vm9, %v2040_v30 }
 0x6bf   : > { %v2038_v11 = vmul.f32 0.1, %v2032_v57  ;;  %4347 = vmatprep.mubr.msk.f32.mxu1 %vm4978_vm1, %v7754_v47  ;;  %vm2035_vm10 = vcmp.gt.f32.partialorder %v2032_v57, 0.0  ;;  %v2321_v63 = vpop.permute.xlu0 %2320 }
 0x6c0   : > { %4596 = vpush %v2321_v63 }
 0x6c1   : > { %v2020_v41 = vpop.permute.xlu1 %2019  ;;  %v2041_v46 = vsel %vm2035_vm10, %v2032_v57, %v2038_v11 }
 0x6c2   : > { %v2026_v26 = vsel %vm466_vm4, %v1909_v53, %v2020_v41  ;;  %4348 = vmatmul.mubr.msk.f32.gmra.mrb[16].mxu1 %vm2048_vm9, %v2041_v46 }
 0x6c3   : > { %v2033_v23 = vadd.f32 %v4165_v9, %v2026_v26  ;;  %4350 = vmatprep.mubr.msk.f32.mxu1 %vm4978_vm1, %v7754_v47  ;;  %v2363_v16 = vpop.permute.xlu0 %2362 }
 0x6c4   : > { %4598 = vpush %v2363_v16 }
 0x6c5   : > { %v2039_v29 = vmul.f32 0.1, %v2033_v23  ;;  %vm2036_vm11 = vcmp.gt.f32.partialorder %v2033_v23, 0.0 }
 0x6c7   : > { %v2042_v39 = vsel %vm2036_vm11, %v2033_v23, %v2039_v29  ;;  %v2374_v22 = vpop.permute.xlu0 %2373 }
 0x6c8   : > { %4351 = vmatmul.mubr.msk.f32.gmra.mrb[18].mxu1 %vm2048_vm9, %v2042_v39  ;;  %4600 = vpush %v2374_v22 }
 0x6c9   : > { %4383 = vmatprep.mubr.msk.f32.mxu1 %vm4978_vm1, %v7754_v47 }
 0x6cb   : > { %v2382_v28 = vpop.permute.xlu0 %2381 }
 0x6cc   : > { %4602 = vpush %v2382_v28 }
 0x6cf   : > { %v2424_v45 = vpop.permute.xlu0 %2423 }
 0x6d0   : > { %4604 = vpush %v2424_v45 }
 0x6d3   : > { %v2435_v14 = vpop.permute.xlu0 %2434 }
 0x6d4   : > { %4606 = vpush %v2435_v14 }
 0x6d7   : > { %v2443_v33 = vpop.permute.xlu0 %2442 }
 0x6d8   : > { %4608 = vpush %v2443_v33 }
 0x6db   : > { %v2485_v20 = vpop.permute.xlu0 %2484 }
 0x6dc   : > { %4610 = vpush %v2485_v20 }
 0x6df   : > { %v2496_v19 = vpop.permute.xlu0 %2495 }
 0x6e0   : > { %4612 = vpush %v2496_v19  ;;  %v7783_v19 = vmov 21  }
 0x6e3   : > { %v2504_v18 = vpop.permute.xlu0 %2503 }
 0x6e4   : > { %4614 = vpush %v2504_v18  ;;  %v7784_v18 = vmov 22  }
 0x6e7   : > { %v2546_v54 = vpop.permute.xlu0 %2545 }
 0x6e8   : > { %4616 = vpush %v2546_v54 }
 0x6eb   : > { %v2557_v40 = vpop.permute.xlu0 %2556 }
 0x6ec   : > { %4618 = vpush %v2557_v40 }
 0x6ed   : > { %s6496_s24 = spop %4594 }
 0x6ef   : > { %v2607_v59 = vpop.permute.xlu0 %2606 }
 0x6f1   : > { %s6498_s25 = spop %4596 }
 0x6f3   : > { %v2618_v8 = vpop.permute.xlu0 %2617 }
 0x6f5   : > { %s6500_s27 = spop %4598 }
 0x6f7   : > { %v2626_v24 = vpop.permute.xlu0 %2625 }
 0x6f9   : > { %s6504_s8 = spop %4600 }
 0x6fb   : > { %v2668_v53 = vpop.permute.xlu0 %2667 }
 0x6fd   : > { %s6506_s18 = spop %4602 }
 0x6ff   : > { %v2679_v9 = vpop.permute.xlu0 %2678 }
 0x701   : > { %s6508_s19 = spop %4604 }
 0x703   : > { %v2687_v50 = vpop.permute.xlu0 %2686 }
 0x705   : > { %s6510_s9 = spop %4606 }
 0x707   : > { %v2729_v49 = vpop.permute.xlu0 %2728 }
 0x709   : > { %s6514_s15 = spop %4608 }
 0x70b   : > { %v2842_v34 = vpop.permute.xlu0 %2841 }
 0x70d   : > { %s6516_s6 = spop %4610 }
 0x70f   : > { %v2895_v30 = vpop.permute.xlu0 %2894 }
 0x713   : > { %v2945_v57 = vpop.permute.xlu0 %2944 }
 0x717   : > { %v2964_v46 = vpop.permute.xlu0 %2963 }
 0x71b   : > { %v3017_v23 = vpop.permute.xlu0 %3016 }
 0x71f   : > { %v3067_v12 = vpop.permute.xlu0 %3066 }
 0x791   : > { %v6323_v2 = vpop.f32.mrb[14].mxu1 }
 0x792   : > { %7766 = vst [vmem:[#allocation74_spill] sm:$0xff] %v6323_v2  ;;  %2914 = vperm.xlu0 %4805, %v6323_v2   ;;  %v4346_v25 = vpop.f32.mrb[15].mxu1  ;;  %2138 = vxpose.xlu1.b32.start [1/3] (short) (narrow) %v6323_v2, 16 }
 0x795   : > { %v6327_v55 = vpop.f32.mrb[16].mxu1 }
 0x796   : > { %7767 = vst [vmem:[#allocation77_spill] sm:$0xff] %v6327_v55  ;;  %4817 = vset.pattern.permute.xlu0 %v7768_v48  ;;  %v4349_v37 = vpop.f32.mrb[17].mxu1  ;;  %2139 = vxpose.xlu1.b32.cont [2/3] (short) (narrow) %v6327_v55, 16  ;;  %v4464_v15 = vpack.c.bf16 %v6327_v55, %v6323_v2 }
 0x797   : > { %3223 = vperm.xlu0 %4817, %v6327_v55  }
 0x79b   : > { %v6336_v44 = vpop.f32.mrb[18].mxu1  ;;  %4820 = vset.pattern.permute.xlu0 %v7770_v52 }
 0x79c   : > { %7769 = vst [vmem:[#allocation22_spill] sm:$0xff] %v6336_v44  ;;  %2140 = vxpose.xlu1.b32.end [3/3] (short) (narrow) %v6336_v44, 16  ;;  %v4352_v35 = vpop.f32.mrb[19].mxu1  ;;  %2393 = vperm.xlu0 %4820, %v6323_v2  }
 0x7a0   : > { %4821 = vset.pattern.permute.xlu0 %v7771_v5 }
 0x7a1   : > { %2793 = vperm.xlu0 %4821, %v6323_v2  }
 0x7a5   : > { %2801 = vperm.xlu0 %4821, %v6336_v44  }
 0x7a9   : > { %4822 = vset.pattern.permute.xlu0 %v7772_v32 }
 0x7aa   : > { %2861 = vperm.xlu0 %4822, %v6336_v44  }
 0x7ae   : > { %4823 = vset.pattern.permute.xlu0 %v7773_v21 }
 0x7af   : > { %2922 = vperm.xlu0 %4823, %v6336_v44  }
 0x7b3   : > { %4824 = vset.pattern.permute.xlu0 %v7774_v6 }
 0x7b4   : > { %2983 = vperm.xlu0 %4824, %v6336_v44  }
 0x7b8   : > { %4825 = vset.pattern.permute.xlu0 %v7775_v13 }
 0x7b9   : > { %3044 = vperm.xlu0 %4825, %v6336_v44  }
 0x7ba   : > { %2564 = vrot.lane.b32.xlu1 %v6250_v17, %s7763_s28  ;;  %v7778_v17 = vmov 17  }
 0x7bb   : > { %4803 = vset.pattern.permute.xlu1 %v7772_v32 }
 0x7bd   : > { %4840 = vset.pattern.permute.xlu0 %v7776_v56 }
 0x7be   : > { %2833 = vrot.lane.b32.xlu1 %v6286_v3, %s7759_s23  ;;  %2702 = vperm.xlu0 %4840, %v6327_v55  }
 0x7c2   : > { %2883 = vrot.lane.b32.xlu1 %v6290_v10, %s7759_s23  ;;  %4841 = vset.pattern.permute.xlu0 %v7777_v7  ;;  %s6518_s23 = spop %4612 }
 0x7c3   : > { %2270 = vperm.xlu0 %4841, %v6323_v2   ;;  %s6524_s30 = spop %4614 }
 0x7c4   : > { %s6526_s14 = spop %4616 }
 0x7c6   : > { %2902 = vrot.lane.b32.xlu1 %v6282_v27, %s7760_s4  ;;  %s6530_s4 = spop %4618 }
 0x7c7   : > { %2280 = vperm.xlu0 %4841, %v6336_v44  }
 0x7ca   : > { %2955 = vrot.lane.b32.xlu1 %v6286_v3, %s7761_s16 }
 0x7cb   : > { %4842 = vset.pattern.permute.xlu0 %v7778_v17 }
 0x7cc   : > { %2340 = vperm.xlu0 %4842, %v6336_v44  }
 0x7ce   : > { %3005 = vrot.lane.b32.xlu1 %v6290_v10, %s7761_s16 }
 0x7d0   : > { %4843 = vset.pattern.permute.xlu0 %v7770_v52 }
 0x7d1   : > { %2401 = vperm.xlu0 %4843, %v6336_v44  }
 0x7d2   : > { %3024 = vrot.lane.b32.xlu1 %v6282_v27, %s7762_s17 }
 0x7d5   : > { %4844 = vset.pattern.permute.xlu0 %v7779_v61 }
 0x7d6   : > { %3077 = vrot.lane.b32.xlu1 %v6286_v3, %s7763_s28  ;;  %2462 = vperm.xlu0 %4844, %v6336_v44  }
 0x7da   : > { %3127 = vrot.lane.b32.xlu1 %v6290_v10, %s7763_s28  ;;  %4845 = vset.pattern.permute.xlu0 %v7780_v62 }
 0x7db   : > { %2523 = vperm.xlu0 %4845, %v6336_v44  }
 0x7de   : > { %3146 = vrot.lane.b32.xlu1 %v6282_v27, %s7764_s29 }
 0x7df   : > { %4854 = vset.pattern.permute.xlu0 %v7768_v48 }
 0x7e2   : > { %3199 = vrot.lane.b32.xlu1 %v6286_v3, %s7765_s10 }
 0x7e6   : > { %3249 = vrot.lane.b32.xlu1 %v6290_v10, %s7765_s10 }
 0x7ea   : > { %2853 = vperm.xlu1 %4803, %v6323_v2  }
 0x7ee   : > { %4804 = vset.pattern.permute.xlu1 %v7771_v5 }
 0x7ef   : > { %2797 = vperm.xlu1 %4804, %v6327_v55  }
 0x7f3   : > { %4806 = vset.pattern.permute.xlu1 %v7772_v32 }
 0x7f4   : > { %2857 = vperm.xlu1 %4806, %v6327_v55  }
 0x7f8   : > { %4807 = vset.pattern.permute.xlu1 %v7774_v6 }
 0x7f9   : > { %2975 = vperm.xlu1 %4807, %v6323_v2  }
 0x7fd   : > { %4808 = vset.pattern.permute.xlu1 %v7773_v21 }
 0x7fe   : > { %2918 = vperm.xlu1 %4808, %v6327_v55  }
 0x802   : > { %4809 = vset.pattern.permute.xlu1 %v7775_v13 }
 0x803   : > { %3036 = vperm.xlu1 %4809, %v6323_v2  }
 0x807   : > { %4810 = vset.pattern.permute.xlu1 %v7774_v6 }
 0x808   : > { %2979 = vperm.xlu1 %4810, %v6327_v55  }
 0x80c   : > { %4811 = vset.pattern.permute.xlu1 %v7781_v1 }
 0x80d   : > { %3097 = vperm.xlu1 %4811, %v6323_v2  }
 0x811   : > { %4812 = vset.pattern.permute.xlu1 %v7775_v13 }
 0x812   : > { %3040 = vperm.xlu1 %4812, %v6327_v55  }
 0x814   : > { %v2154_v58 = vpop.trf.xlu1 }
 0x815   : > { %4359 = vmatprep.mubr.msk.f32.mxu0 %vm690_vm15, %v2154_v58 }
 0x816   : > { %4813 = vset.pattern.permute.xlu1 %v7782_v60 }
 0x817   : > { %3158 = vperm.xlu1 %4813, %v6323_v2  }
 0x818   : > { %v2155_v31 = vpop.trf.xlu1 }
 0x819   : > { %4360 = vmatmul.mubr.msk.f32.vlgmr.msra.gmra.mrb[18].mxu0 %vm690_vm15, %v2155_v31 }
 0x81a   : > { %4465 = vmatpush3.bf16.msra.mxu0 %v4464_v15  ;;  %4368 = vmatprep.mubr.msk.f32.mxu0 %vm4978_vm1, %v7754_v47 }
 0x81b   : > { %4814 = vset.pattern.permute.xlu1 %v7781_v1  ;;  %4366 = vmatprep.subr.mxu0 %v7754_v47 }
 0x81c   : > { %3101 = vperm.xlu1 %4814, %v6327_v55  }
 0x81e   : > { %4367 = vmatpush3.msk.msra.mxu0 %vm697_vm14, %v6336_v44 }
 0x81f   : > { %4469 = vmatprep.subr.bf16.mxu0 %v7758_v4 }
 0x820   : > { %4815 = vset.pattern.permute.xlu1 %v7768_v48 }
 0x821   : > { %3219 = vperm.xlu1 %4815, %v6323_v2  }
 0x825   : > { %4816 = vset.pattern.permute.xlu1 %v7782_v60 }
 0x826   : > { %3162 = vperm.xlu1 %4816, %v6327_v55  }
 0x82a   : > { %4818 = vset.pattern.permute.xlu1 %v7778_v17 }
 0x82b   : > { %2332 = vperm.xlu1 %4818, %v6323_v2  }
 0x82c   : > { %v2565_v11 = vpop.permute.xlu1 %2564 }
 0x82d   : > { %4620 = vpush %v2565_v11  ;;  %v6577_v11 = vld [vmem:[%s5504_s22 + $0x18] sm:$0xff] }
 0x82e   : > { %4622 = vpush %v2607_v59 }
 0x82f   : > { %4819 = vset.pattern.permute.xlu1 %v7777_v7  ;;  %4624 = vpush %v2618_v8 }
 0x830   : > { %2275 = vperm.xlu1 %4819, %v6327_v55   ;;  %v2834_v41 = vpop.permute.xlu1 %2833  ;;  %4626 = vpush %v2626_v24  ;;  %v2253_v24 = vstv %s6488_s26 }
 0x831   : > { %4628 = vpush %v2668_v53  ;;  %v2260_v53 = vstv %s6490_s21 }
 0x832   : > { %4630 = vpush %v2679_v9  ;;  %v2315_v9 = vstv %s6496_s24 }
 0x833   : > { %4632 = vpush %v2687_v50  ;;  %v2323_v50 = vstv %s6498_s25 }
 0x834   : > { %4826 = vset.pattern.permute.xlu1 %v7781_v1  ;;  %v2884_v26 = vpop.permute.xlu1 %2883  ;;  %4634 = vpush %v2729_v49  ;;  %v6567_v49 = vld [vmem:[%s5504_s22 + $0x8] sm:$0xff] }
 0x835   : > { %3105 = vperm.xlu1 %4826, %v6336_v44   ;;  %4636 = vpush %v6286_v3  ;;  %v3086_v3 = vpop.permute.xlu0 %3085 }
 0x836   : > { %4638 = vpush %v6282_v27 }
 0x837   : > { %4640 = vpush %v6290_v10 }
 0x838   : > { %v2903_v29 = vpop.permute.xlu1 %2902  ;;  %4642 = vpush %v2834_v41  ;;  %v2262_v41 = vmul.f32 %v6577_v11, %v2260_v53 }
 0x839   : > { %4827 = vset.pattern.permute.xlu1 %v7782_v60  ;;  %4644 = vpush %v2842_v34  ;;  %v3139_v16 = vpop.permute.xlu0 %3138  ;;  %v6563_v60 = vld [vmem:[%s5504_s22] sm:$0xff]  ;;  %v2256_v34 = vmul.f32 %v6567_v49, %v2253_v24 }
 0x83a   : > { %3166 = vperm.xlu1 %4827, %v6336_v44   ;;  %4646 = vpush %v2884_v26  ;;  %v2255_v31 = vmul.f32 %v6563_v60, %v2253_v24 }
 0x83b   : > { %4648 = vpush %v2895_v30  ;;  %v6573_v30 = vld [vmem:[%s5504_s22 + $0x10] sm:$0x3f] }
 0x83c   : > { %v2956_v39 = vpop.permute.xlu1 %2955  ;;  %4650 = vpush %v2903_v29 }
 0x83d   : > { %4652 = vpush %v2945_v57  ;;  %v3189_v28 = vpop.permute.xlu0 %3188  ;;  %v2257_v57 = vmul.f32 %v6573_v30, %v2253_v24  ;;  %v6611_v24 = vadd.f32 %v2262_v41, %v2255_v31 }
 0x83e   : > { %4828 = vset.pattern.permute.xlu1 %v7768_v48  ;;  %4654 = vpush %v2956_v39  ;;  %v2317_v39 = vmul.f32 %v6563_v60, %v2315_v9 }
 0x83f   : > { %3227 = vperm.xlu1 %4828, %v6336_v44   ;;  %4656 = vpush %v2964_v46  ;;  %v6581_v46 = vld [vmem:[%s5504_s22 + $0x20] sm:$0xff]  ;;  %7798 = vst [vmem:[#allocation53_spill] sm:$0xff] %v6611_v24 }
 0x840   : > { %v3006_v27 = vpop.permute.xlu1 %3005  ;;  %v2263_v26 = vmul.f32 %v6581_v46, %v2260_v53 }
 0x841   : > { %4658 = vpush %v3006_v27  ;;  %v3208_v33 = vpop.permute.xlu0 %3207  ;;  %v2376_v27 = vstv %s6504_s8 }
 0x842   : > { %4660 = vpush %v3017_v23  ;;  %v6585_v23 = vld [vmem:[%s5504_s22 + $0x28] sm:$0x3f]  ;;  %v2379_v0 = vmul.f32 %v6567_v49, %v2376_v27  ;;  %v2380_v4 = vmul.f32 %v6573_v30, %v2376_v27 }
 0x843   : > { %4829 = vset.pattern.permute.xlu1 %v7778_v17  ;;  %v2264_v29 = vmul.f32 %v6585_v23, %v2260_v53  ;;  %v6613_v53 = vadd.f32 %v2263_v26, %v2256_v34  ;;  %v6634_v26 = vstv %s6500_s27 }
 0x844   : > { %2336 = vperm.xlu1 %4829, %v6327_v55   ;;  %v3025_v10 = vpop.permute.xlu1 %3024  ;;  %7804 = vst [vmem:[#allocation87_spill] sm:$0xff] %v6634_v26 }
 0x845   : > { %4662 = vpush %v3025_v10  ;;  %v6522_v7 = vpop.permute.xlu0 %2914  ;;  %v6595_v10 = vstv %s6492_s0  ;;  %7799 = vst [vmem:[#allocation76_spill] sm:$0xff] %v6613_v53 }
 0x846   : > { %4664 = vpush %v3067_v12  ;;  %7791 = vst [vmem:[#allocation28_spill] sm:$0xff] %v6522_v7  ;;  %v2325_v12 = vmul.f32 %v6577_v11, %v2323_v50 }
 0x847   : > { %7797 = vst [vmem:[#allocation43_spill] sm:$0xff] %v6595_v10 }
 0x848   : > { %4830 = vset.pattern.permute.xlu1 %v7779_v61  ;;  %v3078_v63 = vpop.permute.xlu1 %3077 }
 0x849   : > { %2454 = vperm.xlu1 %4830, %v6323_v2   ;;  %4666 = vpush %v3078_v63  ;;  %v2318_v63 = vmul.f32 %v6567_v49, %v2315_v9 }
 0x84a   : > { %4668 = vpush %v3086_v3  ;;  %v2384_v3 = vstv %s6506_s18 }
 0x84b   : > { %v2387_v47 = vmul.f32 %v6581_v46, %v2384_v3 }
 0x84c   : > { %v3128_v22 = vpop.permute.xlu1 %3127 }
 0x84d   : > { %4831 = vset.pattern.permute.xlu1 %v7770_v52  ;;  %4670 = vpush %v3128_v22  ;;  %v2326_v22 = vmul.f32 %v6581_v46, %v2323_v50 }
 0x84e   : > { %2397 = vperm.xlu1 %4831, %v6327_v55   ;;  %4672 = vpush %v3139_v16  ;;  %v2319_v16 = vmul.f32 %v6573_v30, %v2315_v9  ;;  %v6615_v9 = vadd.f32 %v2264_v29, %v2257_v57 }
 0x84f   : > { %v6625_v31 = vadd.f32 %v2326_v22, %v2318_v63  ;;  %v2506_v22 = vstv %s6524_s30 }
 0x850   : > { %v3147_v45 = vpop.permute.xlu1 %3146  ;;  %7800 = vst [vmem:[#allocation83_spill] sm:$0xff] %v6615_v9 }
 0x851   : > { %4674 = vpush %v3147_v45  ;;  %7802 = vst [vmem:[#allocation71_spill] sm:$0xff] %v6625_v31 }
 0x852   : > { %4832 = vset.pattern.permute.xlu1 %v7780_v62  ;;  %4676 = vpush %v3189_v28  ;;  %v2327_v28 = vmul.f32 %v6585_v23, %v2323_v50  ;;  %v6617_v50 = vadd.f32 %v2325_v12, %v2317_v39  ;;  %v2498_v12 = vstv %s6518_s23 }
 0x853   : > { %2515 = vperm.xlu1 %4832, %v6323_v2   ;;  %v2501_v9 = vmul.f32 %v6567_v49, %v2498_v12 }
 0x854   : > { %v3200_v14 = vpop.permute.xlu1 %3199  ;;  %7801 = vst [vmem:[#allocation62_spill] sm:$0xff] %v6617_v50  ;;  %v6627_v34 = vadd.f32 %v2327_v28, %v2319_v16 }
 0x855   : > { %4678 = vpush %v3200_v14 }
 0x856   : > { %4680 = vpush %v3208_v33  ;;  %v2378_v33 = vmul.f32 %v6563_v60, %v2376_v27  ;;  %7803 = vst [vmem:[#allocation42_spill] sm:$0xff] %v6627_v34  ;;  %v6659_v34 = vstv %s6508_s19 }
 0x857   : > { %4833 = vset.pattern.permute.xlu1 %v7779_v61  ;;  %v6532_v61 = vpop.permute.xlu0 %3223  ;;  %7809 = vst [vmem:[#allocation46_spill] sm:$0xff] %v6659_v34 }
 0x858   : > { %2458 = vperm.xlu1 %4833, %v6327_v55   ;;  %v3250_v20 = vpop.permute.xlu1 %3249  ;;  %7792 = vst [vmem:[#allocation86_spill] sm:$0xff] %v6532_v61 }
 0x859   : > { %4682 = vpush %v3250_v20  ;;  %v2386_v20 = vmul.f32 %v6577_v11, %v2384_v3 }
 0x85b   : > { %v6544_v59 = vpop.permute.xlu0 %2393  ;;  %v6636_v29 = vadd.f32 %v2386_v20, %v2378_v33  ;;  %v2559_v20 = vstv %s6530_s4 }
 0x85c   : > { %4834 = vset.pattern.permute.xlu1 %v7783_v19  ;;  %7794 = vst [vmem:[#allocation23_spill] sm:$0xff] %v6544_v59 }
 0x85d   : > { %2576 = vperm.xlu1 %4834, %v6323_v2   ;;  %7805 = vst [vmem:[#allocation52_spill] sm:$0xff] %v6636_v29 }
 0x85e   : > { %s6534_s16 = spop %4620 }
 0x85f   : > { %s6536_s17 = spop %4622  ;;  %v6556_v1 = vpop.permute.xlu0 %2793 }
 0x860   : > { %s6540_s28 = spop %4624  ;;  %v6704_v26 = vstv %s6536_s17 }
 0x861   : > { %4835 = vset.pattern.permute.xlu1 %v7780_v62  ;;  %s6542_s29 = spop %4626  ;;  %v2620_v59 = vstv %s6540_s28  ;;  %7820 = vst [vmem:[#allocation69_spill] sm:$0xff] %v6704_v26 }
 0x862   : > { %2519 = vperm.xlu1 %4835, %v6327_v55   ;;  %s6546_s10 = spop %4628 }
 0x863   : > { %s6550_s13 = spop %4630  ;;  %v6605_v14 = vpop.permute.xlu0 %2801 }
 0x864   : > { %s6554_s20 = spop %4632 }
 0x865   : > { %s6570_s26 = spop %4634 }
 0x866   : > { %4836 = vset.pattern.permute.xlu1 %v7784_v18  ;;  %s6592_s21 = spop %4636  ;;  %v6787_v36 = vstv %s6570_s26 }
 0x867   : > { %2637 = vperm.xlu1 %4836, %v6323_v2   ;;  %s6601_s22 = spop %4638  ;;  %v6648_v28 = vpop.permute.xlu0 %2861  ;;  %7829 = vst [vmem:[#allocation54_spill] sm:$0xff] %v6787_v36 }
 0x868   : > { %s6619_s0 = spop %4640 }
 0x869   : > { %v6456_v54 = vpop.permute.xlu1 %2853  ;;  %s6631_s24 = spop %4642 }
 0x86a   : > { %s6646_s25 = spop %4644 }
 0x86b   : > { %4837 = vset.pattern.permute.xlu1 %v7783_v19  ;;  %s6656_s27 = spop %4646 }
 0x86c   : > { %2580 = vperm.xlu1 %4837, %v6327_v55   ;;  %s6665_s8 = spop %4648 }
 0x86d   : > { %s6677_s18 = spop %4650 }
 0x86e   : > { %v6460_v40 = vpop.permute.xlu1 %2797  ;;  %s6685_s19 = spop %4652 }
 0x86f   : > { %v6829_v38 = vstv %s6685_s19 }
 0x870   : > { %4838 = vset.pattern.permute.xlu1 %v7776_v56 }
 0x871   : > { %2698 = vperm.xlu1 %4838, %v6323_v2   ;;  %v6650_v2 = vadd.f32 %v2387_v47, %v2379_v0  ;;  %v2502_v47 = vmul.f32 %v6573_v30, %v2498_v12  ;;  %v2509_v0 = vmul.f32 %v6581_v46, %v2506_v22 }
 0x873   : > { %v6464_v25 = vpop.permute.xlu1 %2857  ;;  %7807 = vst [vmem:[#allocation37_spill] sm:$0xff] %v6650_v2  ;;  %v6699_v24 = vadd.f32 %v2509_v0, %v2501_v9  ;;  %v6719_v9 = vmul.f32 %v6573_v30, %v2620_v59  ;;  %v2784_v0 = vstv %s6601_s22  ;;  %s7933_s22 = sld [smem:[#allocation92_spill]] }
 0x874   : > { %v2786_v10 = vmul.f32 %v6577_v11, %v2784_v0  ;;  %v2788_v2 = vmul.f32 %v6585_v23, %v2784_v0 }
 0x875   : > { %4839 = vset.pattern.permute.xlu1 %v7784_v18  ;;  %7818 = vst [vmem:[#allocation51_spill] sm:$0xff] %v6699_v24 }
 0x876   : > { %2641 = vperm.xlu1 %4839, %v6327_v55   ;;  %v2567_v55 = vstv %s6534_s16 }
 0x878   : > { %v6468_v48 = vpop.permute.xlu1 %2975 }
 0x879   : > { %7785 = vst [vmem:[#allocation72_spill] sm:$0xff] %v6468_v48 }
 0x87a   : > { %4846 = vset.pattern.permute.xlu1 %v7783_v19  ;;  %v2437_v19 = vstv %s6510_s9  ;;  %s6706_s9 = spop %4654 }
 0x87b   : > { %2584 = vperm.xlu1 %4846, %v6336_v44   ;;  %v2439_v57 = vmul.f32 %v6563_v60, %v2437_v19  ;;  %v2440_v39 = vmul.f32 %v6567_v49, %v2437_v19 }
 0x87d   : > { %v6472_v37 = vpop.permute.xlu1 %2918 }
 0x87f   : > { %4847 = vset.pattern.permute.xlu1 %v7784_v18  ;;  %v2445_v18 = vstv %s6514_s15  ;;  %s6724_s15 = spop %4656 }
 0x880   : > { %2645 = vperm.xlu1 %4847, %v6336_v44   ;;  %v2447_v41 = vmul.f32 %v6577_v11, %v2445_v18  ;;  %v2448_v63 = vmul.f32 %v6581_v46, %v2445_v18  ;;  %v2449_v16 = vmul.f32 %v6585_v23, %v2445_v18  ;;  %v2500_v18 = vmul.f32 %v6563_v60, %v2498_v12 }
 0x881   : > { %v2562_v12 = vmul.f32 %v6567_v49, %v2559_v20 }
 0x882   : > { %v6476_v15 = vpop.permute.xlu1 %3036 }
 0x883   : > { %7786 = vst [vmem:[#allocation85_spill] sm:$0xff] %v6476_v15 }
 0x884   : > { %4848 = vset.pattern.permute.xlu1 %v7776_v56 }
 0x885   : > { %2706 = vperm.xlu1 %4848, %v6336_v44   ;;  %v2388_v44 = vmul.f32 %v6585_v23, %v2384_v3  ;;  %v2441_v3 = vmul.f32 %v6573_v30, %v2437_v19  ;;  %v6661_v19 = vadd.f32 %v2447_v41, %v2439_v57  ;;  %v6671_v57 = vadd.f32 %v2448_v63, %v2440_v39 }
 0x886   : > { %v6688_v39 = vstv %s6516_s6  ;;  %v2563_v63 = vmul.f32 %v6573_v30, %v2559_v20  ;;  %s6731_s6 = spop %4658 }
 0x887   : > { %v6480_v52 = vpop.permute.xlu1 %2979  ;;  %v6652_v33 = vadd.f32 %v2388_v44, %v2380_v4  ;;  %7810 = vst [vmem:[#allocation50_spill] sm:$0xff] %v6661_v19  ;;  %v2508_v4 = vmul.f32 %v6577_v11, %v2506_v22  ;;  %v2510_v44 = vmul.f32 %v6585_v23, %v2506_v22  ;;  %7811 = vst [vmem:[#allocation35_spill] sm:$0xff] %v6671_v57  ;;  %v2628_v22 = vstv %s6542_s29  ;;  %s6745_s23 = spop %4660 }
 0x888   : > { %v6673_v41 = vadd.f32 %v2449_v16, %v2441_v3  ;;  %v2569_v19 = vmul.f32 %v6577_v11, %v2567_v55  ;;  %7814 = vst [vmem:[#allocation47_spill] sm:$0xff] %v6688_v39  ;;  %v6691_v3 = vstv %s6526_s14  ;;  %v2571_v16 = vmul.f32 %v6585_v23, %v2567_v55  ;;  %s6762_s30 = spop %4662 }
 0x889   : > { %7808 = vst [vmem:[#allocation31_spill] sm:$0xff] %v6652_v33  ;;  %v2561_v33 = vmul.f32 %v6563_v60, %v2559_v20  ;;  %7815 = vst [vmem:[#allocation60_spill] sm:$0xff] %v6691_v3  ;;  %v6697_v50 = vadd.f32 %v2508_v4, %v2500_v18  ;;  %v6701_v34 = vadd.f32 %v2510_v44, %v2502_v47  ;;  %v2681_v39 = vstv %s6550_s13  ;;  %s6768_s14 = spop %4664 }
 0x88a   : > { %7812 = vst [vmem:[#allocation56_spill] sm:$0xff] %v6673_v41  ;;  %v6695_v41 = vpop.permute.xlu0 %2922  ;;  %v2622_v20 = vmul.f32 %v6563_v60, %v2620_v59  ;;  %v6716_v18 = vmul.f32 %v6567_v49, %v2620_v59  ;;  %v6722_v47 = vstv %s6546_s10  ;;  %v2777_v4 = vstv %s6592_s21  ;;  %s6782_s4 = spop %4666 }
 0x88b   : > { %7816 = vst [vmem:[#allocation30_spill] sm:$0xff] %v6695_v41  ;;  %7817 = vst [vmem:[#allocation65_spill] sm:$0xff] %v6697_v50  ;;  %v6708_v3 = vadd.f32 %v2569_v19, %v2561_v33  ;;  %v2689_v19 = vstv %s6554_s20  ;;  %v6736_v44 = vmul.f32 %v6581_v46, %v2628_v22  ;;  %v6739_v59 = vmul.f32 %v6585_v23, %v2628_v22  ;;  %s6802_s16 = spop %4668 }
 0x88c   : > { %v6482_v35 = vpop.permute.xlu1 %3097  ;;  %7819 = vst [vmem:[#allocation57_spill] sm:$0xff] %v6701_v34  ;;  %7823 = vst [vmem:[#allocation78_spill] sm:$0xff] %v6722_v47  ;;  %v2684_v34 = vmul.f32 %v6567_v49, %v2681_v39  ;;  %v6757_v47 = vmul.f32 %v6577_v11, %v2689_v19  ;;  %v2779_v24 = vmul.f32 %v6563_v60, %v2777_v4  ;;  %v6792_v41 = vstv %s6619_s0  ;;  %s6811_s17 = spop %4670  ;;  %s316_s0 = scalar_lea.vmem %s7933_s22, %s5099_s11 }
 0x88d   : > { %7787 = vst [vmem:[#allocation75_spill] sm:$0xff] %v6482_v35  ;;  %7821 = vst [vmem:[#allocation25_spill] sm:$0xff] %v6708_v3  ;;  %v6773_v31 = vmul.f32 %v6585_v23, %v2689_v19  ;;  %v2905_v35 = vstv %s6677_s18  ;;  %s6821_s28 = spop %4672  ;;  %v6860_v3 = vstv %s6731_s6  ;;  %s5006_s18 = smov 16  }
 0x88e   : > { %v6754_v26 = vpop.permute.xlu0 %2983  ;;  %s6833_s29 = spop %4674  ;;  %7839 = vst [vmem:[#allocation89_spill] sm:$0xff] %v6860_v3 }
 0x88f   : > { %7826 = vst [vmem:[#allocation44_spill] sm:$0xff] %v6754_v26  ;;  %v6789_v26 = vadd.f32 %v2786_v10, %v2779_v24  ;;  %v2958_v24 = vstv %s6706_s9  ;;  %s6839_s10 = spop %4676 }
 0x890   : > { %s4679_s13 = spop %4678 }
 0x891   : > { %v6484_v5 = vpop.permute.xlu1 %3040  ;;  %7830 = vst [vmem:[#allocation58_spill] sm:$0xff] %v6789_v26  ;;  %s4681_s20 = spop %4680 }
 0x892   : > { %s4683_s26 = spop %4682 }
 0x896   : > { %v6486_v32 = vpop.permute.xlu1 %3158 }
 0x897   : > { %7788 = vst [vmem:[#allocation19_spill] sm:$0xff] %v6486_v32  ;;  %v6799_v32 = vstv %s6656_s27  ;;  %s7934_s27 = sld [smem:[#allocation6_spill]] }
 0x89b   : > { %v6494_v21 = vpop.permute.xlu1 %3101 }
 0x8a0   : > { %v6502_v6 = vpop.permute.xlu1 %3219 }
 0x8a1   : > { %7789 = vst [vmem:[#allocation20_spill] sm:$0xff] %v6502_v6 }
 0x8a5   : > { %v6512_v13 = vpop.permute.xlu1 %3162 }
 0x8a6   : > { %7790 = vst [vmem:[#allocation82_spill] sm:$0xff] %v6512_v13 }
 0x8aa   : > { %v6520_v56 = vpop.permute.xlu1 %2332 }
 0x8af   : > { %v6528_v17 = vpop.permute.xlu1 %2275 }
 0x8b4   : > { %v6538_v62 = vpop.permute.xlu1 %3105 }
 0x8b5   : > { %7793 = vst [vmem:[#allocation21_spill] sm:$0xff] %v6538_v62 }
 0x8b9   : > { %v6548_v8 = vpop.permute.xlu1 %3166 }
 0x8ba   : > { %7795 = vst [vmem:[#allocation24_spill] sm:$0xff] %v6548_v8 }
 0x8be   : > { %v6560_v58 = vpop.permute.xlu1 %3227 }
 0x8bf   : > { %7796 = vst [vmem:[#allocation73_spill] sm:$0xff] %v6560_v58 }
 0x8c3   : > { %v6603_v45 = vpop.permute.xlu1 %2336 }
 0x8c8   : > { %v6640_v27 = vpop.permute.xlu1 %2454 }
 0x8c9   : > { %7806 = vst [vmem:[#allocation33_spill] sm:$0xff] %v6640_v27  ;;  %v2570_v27 = vmul.f32 %v6581_v46, %v2567_v55  ;;  %v2630_v55 = vmul.f32 %v6577_v11, %v2628_v22  ;;  %v2692_v22 = vmul.f32 %v6581_v46, %v2689_v19 }
 0x8cb   : > { %v6713_v57 = vadd.f32 %v2570_v27, %v2562_v12  ;;  %v6733_v27 = vadd.f32 %v2571_v16, %v2563_v63  ;;  %v6742_v12 = vmul.f32 %v6563_v60, %v2681_v39  ;;  %v6747_v50 = vadd.f32 %v2630_v55, %v2622_v20 }
 0x8cc   : > { %v2836_v63 = vstv %s6631_s24  ;;  %v2844_v16 = vstv %s6646_s25  ;;  %v2780_v20 = vmul.f32 %v6567_v49, %v2777_v4  ;;  %v2787_v55 = vmul.f32 %v6581_v46, %v2784_v0 }
 0x8cd   : > { %v6679_v29 = vpop.permute.xlu1 %2397  ;;  %7822 = vst [vmem:[#allocation26_spill] sm:$0xff] %v6713_v57  ;;  %7825 = vst [vmem:[#allocation34_spill] sm:$0xff] %v6733_v27  ;;  %v2838_v53 = vmul.f32 %v6563_v60, %v2836_v63  ;;  %v2839_v58 = vmul.f32 %v6567_v49, %v2836_v63  ;;  %v2840_v8 = vmul.f32 %v6573_v30, %v2836_v63 }
 0x8ce   : > { %7813 = vst [vmem:[#allocation38_spill] sm:$0xff] %v6679_v29  ;;  %v2847_v62 = vmul.f32 %v6581_v46, %v2844_v16  ;;  %v2848_v0 = vmul.f32 %v6585_v23, %v2844_v16  ;;  %v6784_v19 = vadd.f32 %v2692_v22, %v2684_v34  ;;  %v6794_v6 = vadd.f32 %v2787_v55, %v2780_v20 }
 0x8cf   : > { %v2966_v22 = vstv %s6724_s15 }
 0x8d0   : > { %7828 = vst [vmem:[#allocation66_spill] sm:$0xff] %v6784_v19  ;;  %v6815_v20 = vadd.f32 %v2847_v62, %v2839_v58  ;;  %v3019_v19 = vstv %s6745_s23  ;;  %v2960_v62 = vmul.f32 %v6563_v60, %v2958_v24  ;;  %v2961_v58 = vmul.f32 %v6567_v49, %v2958_v24  ;;  %s7937_s23 = sld [smem:[#allocation93_spill]] }
 0x8d1   : > { %v3022_v15 = vmul.f32 %v6567_v49, %v3019_v19  ;;  %v3023_v26 = vmul.f32 %v6573_v30, %v3019_v19 }
 0x8d2   : > { %v6726_v33 = vpop.permute.xlu1 %2515 }
 0x8d3   : > { %7824 = vst [vmem:[#allocation61_spill] sm:$0xff] %v6726_v33  ;;  %v6750_v33 = vmul.f32 %v6573_v30, %v2681_v39  ;;  %v2781_v39 = vmul.f32 %v6573_v30, %v2777_v4  ;;  %v2846_v4 = vmul.f32 %v6577_v11, %v2844_v16  ;;  %v6804_v16 = vpop.permute.xlu0 %3044 }
 0x8d4   : > { %7832 = vst [vmem:[#allocation32_spill] sm:$0xff] %v6804_v16  ;;  %v3027_v16 = vstv %s6762_s30 }
 0x8d5   : > { %v6796_v63 = vadd.f32 %v2788_v2, %v2781_v39  ;;  %v6806_v34 = vadd.f32 %v2846_v4, %v2838_v53  ;;  %v6817_v39 = vadd.f32 %v2848_v0, %v2840_v8  ;;  %v2907_v53 = vmul.f32 %v6577_v11, %v2905_v35 }
 0x8d6   : > { %v2908_v4 = vmul.f32 %v6581_v46, %v2905_v35  ;;  %v2968_v8 = vmul.f32 %v6577_v11, %v2966_v22  ;;  %v2969_v0 = vmul.f32 %v6581_v46, %v2966_v22  ;;  %v3029_v48 = vmul.f32 %v6577_v11, %v3027_v16  ;;  %s7938_s30 = smov %s7937_s23 }
 0x8d7   : > { %v6770_v29 = vpop.permute.xlu1 %2458  ;;  %7831 = vst [vmem:[#allocation63_spill] sm:$0xff] %v6796_v63  ;;  %7833 = vst [vmem:[#allocation90_spill] sm:$0xff] %v6806_v34  ;;  %v2909_v63 = vmul.f32 %v6585_v23, %v2905_v35  ;;  %v3021_v35 = vmul.f32 %v6563_v60, %v3019_v19  ;;  %v3030_v7 = vmul.f32 %v6581_v46, %v3027_v16  ;;  %v6871_v19 = vstv %s6768_s14 }
 0x8d8   : > { %7827 = vst [vmem:[#allocation48_spill] sm:$0xff] %v6770_v29  ;;  %v2897_v29 = vstv %s6665_s8  ;;  %7834 = vst [vmem:[#allocation70_spill] sm:$0xff] %v6817_v39  ;;  %v2970_v39 = vmul.f32 %v6585_v23, %v2966_v22  ;;  %v3031_v13 = vmul.f32 %v6585_v23, %v3027_v16  ;;  %v6857_v57 = vadd.f32 %v2968_v8, %v2960_v62  ;;  %s7935_s8 = sld [smem:[#allocation9_spill]] }
 0x8d9   : > { %v2899_v10 = vmul.f32 %v6563_v60, %v2897_v29  ;;  %v2900_v55 = vmul.f32 %v6567_v49, %v2897_v29  ;;  %v2901_v36 = vmul.f32 %v6573_v30, %v2897_v29  ;;  %v2962_v29 = vmul.f32 %v6573_v30, %v2958_v24  ;;  %v6847_v24 = vpop.permute.xlu0 %2702  ;;  %7841 = vst [vmem:[#allocation55_spill] sm:$0xff] %v6871_v19 }
 0x8da   : > { %7838 = vst [vmem:[#allocation45_spill] sm:$0xff] %v6857_v57  ;;  %v3080_v16 = vstv %s6782_s4  ;;  %v6881_v62 = vadd.f32 %v6736_v44, %v6716_v18  ;;  %v6883_v8 = vadd.f32 %v3031_v13, %v3023_v26 }
 0x8db   : > { %v6849_v34 = vadd.f32 %v2907_v53, %v2899_v10  ;;  %v6851_v22 = vadd.f32 %v2908_v4, %v2900_v55  ;;  %v6855_v27 = vadd.f32 %v2909_v63, %v2901_v36  ;;  %v6864_v10 = vadd.f32 %v6757_v47, %v6742_v12 }
 0x8dc   : > { %v6813_v2 = vpop.permute.xlu1 %2576  ;;  %v6866_v53 = vadd.f32 %v2969_v0, %v2961_v58  ;;  %v6868_v55 = vadd.f32 %v2970_v39, %v2962_v29  ;;  %v6874_v4 = vadd.f32 %v3029_v48, %v3021_v35  ;;  %v6876_v36 = vadd.f32 %v3030_v7, %v3022_v15  ;;  %7843 = vst [vmem:[#allocation59_spill] sm:$0xff] %v6883_v8 }
 0x8dd   : > { %7836 = vst [vmem:[#allocation67_spill] sm:$0xff] %v6849_v34  ;;  %7837 = vst [vmem:[#allocation36_spill] sm:$0xff] %v6855_v27  ;;  %v3088_v63 = vstv %s6802_s16  ;;  %v3141_v47 = vstv %s6821_s28  ;;  %v3149_v12 = vstv %s6833_s29  ;;  %v6891_v39 = vadd.f32 %v6739_v59, %v6719_v9  ;;  %v2271_v0 = vpop.permute.xlu0 %2270 }
 0x8de   : > { %7840 = vst [vmem:[#allocation49_spill] sm:$0xff] %v6868_v55  ;;  %7842 = vst [vmem:[#allocation79_spill] sm:$0xff] %v6874_v4  ;;  %v3082_v48 = vmul.f32 %v6563_v60, %v3080_v16  ;;  %v3083_v15 = vmul.f32 %v6567_v49, %v3080_v16  ;;  %v3202_v7 = vstv %s4679_s13  ;;  %v3210_v29 = vstv %s4681_s20 }
 0x8df   : > { %7844 = vst [vmem:[#allocation64_spill] sm:$0xff] %v6891_v39  ;;  %v3084_v18 = vmul.f32 %v6573_v30, %v3080_v16  ;;  %v3090_v13 = vmul.f32 %v6577_v11, %v3088_v63  ;;  %v3091_v26 = vmul.f32 %v6581_v46, %v3088_v63  ;;  %v3092_v44 = vmul.f32 %v6585_v23, %v3088_v63 }
 0x8e0   : > { %v3143_v35 = vmul.f32 %v6563_v60, %v3141_v47  ;;  %v3144_v9 = vmul.f32 %v6567_v49, %v3141_v47  ;;  %v3145_v59 = vmul.f32 %v6573_v30, %v3141_v47  ;;  %v3152_v8 = vmul.f32 %v6581_v46, %v3149_v12 }
 0x8e1   : > { %v6845_v61 = vpop.permute.xlu1 %2519  ;;  %v3153_v16 = vmul.f32 %v6585_v23, %v3149_v12  ;;  %v3204_v55 = vmul.f32 %v6563_v60, %v3202_v7  ;;  %v3212_v27 = vmul.f32 %v6577_v11, %v3210_v29  ;;  %v3205_v63 = vmul.f32 %v6567_v49, %v3202_v7 }
 0x8e2   : > { %7835 = vst [vmem:[#allocation88_spill] sm:$0xff] %v6845_v61  ;;  %v3151_v61 = vmul.f32 %v6577_v11, %v3149_v12  ;;  %v3206_v4 = vmul.f32 %v6573_v30, %v3202_v7  ;;  %v3213_v57 = vmul.f32 %v6581_v46, %v3210_v29  ;;  %v3214_v34 = vmul.f32 %v6585_v23, %v3210_v29  ;;  %v7847_v30 = vld [vmem:[#allocation39_spill] sm:$0xff]  ;;  %v7848_v23 = vld [vmem:[#allocation40_spill] sm:$0xff] }
 0x8e3   : > { %v6913_v39 = vadd.f32 %v3090_v13, %v3082_v48  ;;  %v6915_v19 = vadd.f32 %v3091_v26, %v3083_v15  ;;  %v6917_v3 = vadd.f32 %v3092_v44, %v3084_v18  ;;  %v6920_v12 = vstv %s6811_s17  ;;  %v2281_v15 = vpop.permute.xlu0 %2280  ;;  %s5007_s17 = smov [#allocation2]  }
 0x8e4   : > { %v6924_v11 = vadd.f32 %v3151_v61, %v3143_v35  ;;  %v6927_v49 = vstv %s6839_s10  ;;  %v6933_v29 = vadd.f32 %v3152_v8, %v3144_v9  ;;  %v6935_v18 = vadd.f32 %v3153_v16, %v3145_v59  ;;  %v7852_v9 = vld [vmem:[#allocation41_spill] sm:$0xff]  ;;  %v7855_v59 = vld [vmem:[#allocation84_spill] sm:$0xff]  ;;  %s313_s10 = scalar_lea.vmem %s7471_s3, %s5099_s11  ;;  %s4917_s28 = sshll.u32 %s5007_s17, 4  ;;  %s4918_s28 = int_to_ptr.vmem [resolvable:$false] %s4917_s28 }
 0x8e5   : > { %7845 = vst [vmem:[#allocation68_spill] sm:$0xff] %v6917_v3  ;;  %v6937_v13 = vadd.f32 %v3212_v27, %v3204_v55  ;;  %v6941_v61 = vadd.f32 %v6773_v31, %v6750_v33  ;;  %v6943_v26 = vadd.f32 %v3213_v57, %v3205_v63  ;;  %v6945_v44 = vadd.f32 %v3214_v34, %v3206_v4  ;;  %v7853_v33 = vld [vmem:[#allocation80_spill] sm:$0xff]  ;;  %s4919_s29 = scalar_lea.vmem %s4918_s28, 32 }
 0x8e6   : > { %v6887_v58 = vpop.permute.xlu1 %2637  ;;  %7846 = vst [vmem:[#allocation17_spill] sm:$0xff] %v6924_v11  ;;  %7849 = vst [vmem:[#allocation15_spill] sm:$0xff] %v6935_v18  ;;  %v6949_v11 = vstv %s4683_s26 }
 0x8e7   : > { %7850 = vst [vmem:[#allocation18_spill] sm:$0xff] %v6937_v13  ;;  %7851 = vst [vmem:[#allocation14_spill] sm:$0xff] %v6945_v44 }
 0x8eb   : > { %v6911_v47 = vpop.permute.xlu1 %2580 }
 0x8ec   : > { %v6922_v60 = vpop.f32.mrb[18].mxu0 }
 0x8ed   : > { %v2807_v46 = vrot.slane %v6922_v60, %v7847_v30  ;;  %v2867_v48 = vrot.slane %v6922_v60, %v7848_v23  ;;  %v2242_v7 = vpop.f32.mrb[19].mxu0  ;;  %v6954_v27 = vrot.slane %v6922_v60, %v7852_v9  ;;  %v6962_v34 = vrot.slane %v6922_v60, %v7853_v33 }
 0x8ee   : > { %v2286_v3 = vrot.slane %v2242_v7, %v7847_v30  ;;  %v2346_v55 = vrot.slane %v2242_v7, %v7848_v23  ;;  %v6982_v30 = vrot.slane %v2242_v7, %v5833_v42 }
 0x8ef   : > { %v2809_v35 = vadd.f32 %v2807_v46, %v6460_v40  ;;  %v2869_v8 = vadd.f32 %v2867_v48, %v6464_v25  ;;  %v6958_v57 = vadd.f32 %v2807_v46, %v6556_v1  ;;  %v7854_v40 = vld [vmem:[#allocation81_spill] sm:$0xff]  ;;  %v6970_v25 = vrot.slane %v6922_v60, %v7855_v59 }
 0x8f0   : > { %v2699_v31 = vpop.permute.xlu1 %2698  ;;  %v6966_v4 = vrot.slane %v6922_v60, %v7854_v40  ;;  %v6973_v16 = vadd.f32 %v2807_v46, %v6605_v14  ;;  %v6976_v63 = vadd.f32 %v2867_v48, %v6456_v54  ;;  %v6979_v1 = vadd.f32 %v2867_v48, %v6648_v28  ;;  %v2341_v14 = vpop.permute.xlu0 %2340 }
 0x8f1   : > { %v6984_v23 = vadd.f32 %v2286_v3, %v2271_v0  ;;  %v6987_v44 = vadd.f32 %v2286_v3, %v6528_v17  ;;  %v2812_v18 = vadd.f32 %v2809_v35, %v6794_v6  ;;  %v2872_v13 = vadd.f32 %v2869_v8, %v6815_v20 }
 0x8f2   : > { %v6991_v46 = vadd.f32 %v2286_v3, %v2281_v15  ;;  %v6994_v54 = vadd.f32 %v2346_v55, %v6520_v56  ;;  %v6997_v28 = vadd.f32 %v2346_v55, %v6603_v45  ;;  %v7000_v48 = vrot.slane %v2242_v7, %v5836_v43 }
 0x8f3   : > { %v7002_v0 = vadd.f32 %v2346_v55, %v2341_v14  ;;  %vm2815_vm13 = vcmp.gt.f32.partialorder %v2812_v18, 0.0  ;;  %v2930_v6 = vadd.f32 %v6954_v27, %v6472_v37  ;;  %v2991_v3 = vadd.f32 %v6962_v34, %v6480_v52 }
 0x8f4   : > { %7856 = vst [vmem:[#allocation16_spill] sm:$0xff] %v6991_v46  ;;  %v2713_v20 = vadd.f32 %v6982_v30, %v2699_v31  ;;  %v2590_v56 = vrot.slane %v2242_v7, %v7855_v59  ;;  %v2818_v15 = vmul.f32 0.2, %v2812_v18  ;;  %vm2875_vm0 = vcmp.gt.f32.partialorder %v2872_v13, 0.0 }
 0x8f5   : > { %7857 = vst [vmem:[#allocation39_spill] sm:$0xff] %v7002_v0  ;;  %v2642_v17 = vpop.permute.xlu1 %2641  ;;  %v7011_v45 = vrot.slane %v2242_v7, %v7852_v9  ;;  %v7014_v35 = vrot.slane %v2242_v7, %v7853_v33  ;;  %v7017_v8 = vrot.slane %v2242_v7, %v7854_v40  ;;  %v2878_v55 = vmul.f32 0.2, %v2872_v13 }
 0x8f6   : > { %v7021_v37 = vadd.f32 %v6982_v30, %v6847_v24  ;;  %v2652_v52 = vadd.f32 %v7000_v48, %v6887_v58  ;;  %v2653_v31 = vadd.f32 %v7000_v48, %v2642_v17  ;;  %v2821_v59 = vsel %vm2815_vm13, %v2812_v18, %v2818_v15 }
 0x8f7   : > { %v2828_v9 = vmul.f32 %v6792_v41, %v2821_v59  ;;  %v2881_v14 = vsel %vm2875_vm0, %v2872_v13, %v2878_v55  ;;  %v2933_v33 = vadd.f32 %v2930_v6, %v6851_v22  ;;  %v2994_v0 = vadd.f32 %v2991_v3, %v6866_v53  ;;  %v7858_v59 = vld [vmem:[#allocation25_spill] sm:$0xff] }
 0x8f8   : > { %v7030_v7 = vadd.f32 %v2713_v20, %v6864_v10  ;;  %v2591_v24 = vadd.f32 %v2590_v56, %v6813_v2  ;;  %v2592_v46 = vadd.f32 %v2590_v56, %v6911_v47  ;;  %v3052_v58 = vadd.f32 %v6966_v4, %v6484_v5 }
 0x8f9   : > { %v2831_v18 = vadd.f32 %v2828_v9, %v7694_v51  ;;  %v2889_v17 = vmul.f32 %v6799_v32, %v2881_v14  ;;  %vm2936_vm3 = vcmp.gt.f32.partialorder %v2933_v33, 0.0  ;;  %v2939_v13 = vmul.f32 0.2, %v2933_v33 }
 0x8fa   : > { %v2585_v40 = vpop.permute.xlu1 %2584  ;;  %v2656_v22 = vadd.f32 %v2653_v31, %v6881_v62  ;;  %vm2997_vm5 = vcmp.gt.f32.partialorder %v2994_v0, 0.0  ;;  %v3000_v53 = vmul.f32 0.2, %v2994_v0  ;;  %v3055_v10 = vadd.f32 %v3052_v58, %v6876_v36  ;;  %v7859_v31 = vld [vmem:[#allocation26_spill] sm:$0xff] }
 0x8fb   : > { %v2593_v6 = vadd.f32 %v2590_v56, %v2585_v40  ;;  %v2892_v3 = vadd.f32 %v2889_v17, %v2831_v18  ;;  %v2942_v2 = vsel %vm2936_vm3, %v2933_v33, %v2939_v13  ;;  %v3113_v47 = vadd.f32 %v6970_v25, %v6494_v21  ;;  %v7860_v33 = vld [vmem:[#allocation89_spill] sm:$0xff]  ;;  %v7862_v18 = vld [vmem:[#allocation55_spill] sm:$0xff]  ;;  %v7863_v13 = vld [vmem:[#allocation82_spill] sm:$0xff] }
 0x8fc   : > { %v2950_v5 = vmul.f32 %v6829_v38, %v2942_v2  ;;  %v3003_v20 = vsel %vm2997_vm5, %v2994_v0, %v3000_v53  ;;  %vm3058_vm6 = vcmp.gt.f32.partialorder %v3055_v10, 0.0  ;;  %v3061_v15 = vmul.f32 0.2, %v3055_v10  ;;  %v7865_v2 = vld [vmem:[#allocation90_spill] sm:$0xff] }
 0x8fd   : > { %v7044_v55 = vadd.f32 %v2652_v52, %v6747_v50  ;;  %v7047_v62 = vadd.f32 %v2591_v24, %v7858_v59  ;;  %v7050_v9 = vadd.f32 %v2592_v46, %v7859_v31  ;;  %v3116_v56 = vadd.f32 %v3113_v47, %v6915_v19  ;;  %v7861_v24 = vld [vmem:[#allocation34_spill] sm:$0xff] }
 0x8fe   : > { %v2953_v14 = vadd.f32 %v2950_v5, %v2892_v3  ;;  %v3011_v21 = vmul.f32 %v7860_v33, %v3003_v20  ;;  %v3064_v40 = vsel %vm3058_vm6, %v3055_v10, %v3061_v15  ;;  %v7056_v0 = vrot.slane %v6922_v60, %v5836_v43  ;;  %v7864_v43 = vld [vmem:[#allocation58_spill] sm:$0xff] }
 0x8ff   : > { %v2646_v36 = vpop.permute.xlu1 %2645  ;;  %vm2659_vm7 = vcmp.gt.f32.partialorder %v2656_v22, 0.0  ;;  %v2662_v50 = vmul.f32 0.2, %v2656_v22  ;;  %vm3119_vm8 = vcmp.gt.f32.partialorder %v3116_v56, 0.0  ;;  %v3122_v52 = vmul.f32 0.2, %v3116_v56 }
 0x900   : > { %v7059_v58 = vadd.f32 %v2593_v6, %v7861_v24  ;;  %v3014_v46 = vadd.f32 %v3011_v21, %v2953_v14  ;;  %v3072_v17 = vmul.f32 %v7862_v18, %v3064_v40  ;;  %v3174_v19 = vadd.f32 %v7056_v0, %v7863_v13  ;;  %v7868_v24 = vld [vmem:[#allocation72_spill] sm:$0xff] }
 0x901   : > { %v3125_v53 = vsel %vm3119_vm8, %v3116_v56, %v3122_v52  ;;  %v7066_v10 = vrot.slane %v6922_v60, %v5833_v42  ;;  %v2811_v3 = vadd.f32 %v6958_v57, %v7864_v43  ;;  %v2871_v47 = vadd.f32 %v6976_v63, %v7865_v2  ;;  %v7866_v60 = vld [vmem:[#allocation86_spill] sm:$0xff]  ;;  %v7870_v2 = vld [vmem:[#allocation67_spill] sm:$0xff] }
 0x902   : > { %v7073_v6 = vmul.f32 0.2, %v7030_v7  ;;  %v2654_v5 = vadd.f32 %v7000_v48, %v2646_v36  ;;  %v3075_v15 = vadd.f32 %v3072_v17, %v3014_v46  ;;  %v3133_v59 = vmul.f32 %v6920_v12, %v3125_v53 }
 0x903   : > { %v3177_v42 = vadd.f32 %v3174_v19, %v6933_v29  ;;  %v3235_v56 = vadd.f32 %v7066_v10, %v7866_v60  ;;  %vm2814_vm12 = vcmp.gt.f32.partialorder %v2811_v3, 0.0  ;;  %v7082_v57 = vsel %vm2659_vm7, %v2656_v22, %v2662_v50  ;;  %v7867_v29 = vld [vmem:[#allocation28_spill] sm:$0xff]  ;;  %v7872_v60 = vld [vmem:[#allocation85_spill] sm:$0xff] }
 0x904   : > { %v2707_v20 = vpop.permute.xlu1 %2706  ;;  %v7085_v63 = vmul.f32 0.2, %v7059_v58  ;;  %v3136_v14 = vadd.f32 %v3133_v59, %v3075_v15  ;;  %v2817_v48 = vmul.f32 0.2, %v2811_v3  ;;  %vm2874_vm11 = vcmp.gt.f32.partialorder %v2871_v47, 0.0  ;;  %v7869_v22 = vld [vmem:[#allocation64_spill] sm:$0xff] }
 0x905   : > { %v2715_v31 = vadd.f32 %v6982_v30, %v2707_v20  ;;  %vm3180_vm10 = vcmp.gt.f32.partialorder %v3177_v42, 0.0  ;;  %v3183_v36 = vmul.f32 0.2, %v3177_v42  ;;  %v3238_v21 = vadd.f32 %v3235_v56, %v6943_v26  ;;  %v7871_v15 = vld [vmem:[#allocation45_spill] sm:$0xff] }
 0x906   : > { %v2820_v30 = vsel %vm2814_vm12, %v2811_v3, %v2817_v48  ;;  %v2877_v40 = vmul.f32 0.2, %v2871_v47  ;;  %v2929_v52 = vadd.f32 %v6954_v27, %v7867_v29  ;;  %v2990_v46 = vadd.f32 %v6962_v34, %v7868_v24  ;;  %v7874_v48 = vld [vmem:[#allocation75_spill] sm:$0xff] }
 0x907   : > { %v7093_v50 = vadd.f32 %v2654_v5, %v7869_v22  ;;  %v7096_v17 = vadd.f32 %v2715_v31, %v6941_v61  ;;  %v3186_v13 = vsel %vm3180_vm10, %v3177_v42, %v3183_v36  ;;  %vm3241_vm13 = vcmp.gt.f32.partialorder %v3238_v21, 0.0  ;;  %v7873_v31 = vld [vmem:[#allocation27_spill] sm:$0xff] }
 0x908   : > { %v3194_v19 = vmul.f32 %v6927_v49, %v3186_v13  ;;  %v3244_v26 = vmul.f32 0.2, %v3238_v21  ;;  %v2827_v53 = vmul.f32 %v6792_v41, %v2820_v30  ;;  %v2880_v43 = vsel %vm2874_vm11, %v2871_v47, %v2877_v40 }
 0x909   : > { %v2888_v3 = vmul.f32 %v6799_v32, %v2880_v43  ;;  %v2932_v20 = vadd.f32 %v2929_v52, %v7870_v2  ;;  %v2993_v59 = vadd.f32 %v2990_v46, %v7871_v15  ;;  %v3051_v5 = vadd.f32 %v6966_v4, %v7872_v60  ;;  %v7875_v52 = vld [vmem:[#allocation79_spill] sm:$0xff] }
 0x90a   : > { %v3197_v56 = vadd.f32 %v3194_v19, %v3136_v14  ;;  %v3247_v61 = vsel %vm3241_vm13, %v3238_v21, %v3244_v26  ;;  %v2830_v42 = vadd.f32 %v2827_v53, %v7873_v31  ;;  %v3112_v36 = vadd.f32 %v6970_v25, %v7874_v48  ;;  %v7876_v21 = vld [vmem:[#allocation19_spill] sm:$0xff]  ;;  %v7877_v19 = vld [vmem:[#allocation20_spill] sm:$0xff] }
 0x90b   : > { %v3255_v29 = vmul.f32 %v6949_v11, %v3247_v61  ;;  %vm2935_vm0 = vcmp.gt.f32.partialorder %v2932_v20, 0.0  ;;  %v2938_v47 = vmul.f32 0.2, %v2932_v20  ;;  %vm2996_vm3 = vcmp.gt.f32.partialorder %v2993_v59, 0.0  ;;  %v7879_v61 = vld [vmem:[#allocation18_spill] sm:$0xff] }
 0x90c   : > { %v2891_v30 = vadd.f32 %v2888_v3, %v2830_v42  ;;  %v2999_v40 = vmul.f32 0.2, %v2993_v59  ;;  %v3054_v24 = vadd.f32 %v3051_v5, %v7875_v52  ;;  %v3115_v46 = vadd.f32 %v3112_v36, %v6913_v39  ;;  %v7878_v5 = vld [vmem:[#allocation17_spill] sm:$0xff] }
 0x90d   : > { %v7111_v22 = vadd.f32 %v3255_v29, %v3197_v56  ;;  %v2941_v14 = vsel %vm2935_vm0, %v2932_v20, %v2938_v47  ;;  %v3173_v13 = vadd.f32 %v7056_v0, %v7876_v21  ;;  %v3234_v26 = vadd.f32 %v7066_v10, %v7877_v19  ;;  %v7881_v47 = vld [vmem:[#allocation70_spill] sm:$0xff] }
 0x90e   : > { %v2949_v53 = vmul.f32 %v6829_v38, %v2941_v14  ;;  %v3002_v43 = vsel %vm2996_vm3, %v2993_v59, %v2999_v40  ;;  %vm3057_vm5 = vcmp.gt.f32.partialorder %v3054_v24, 0.0  ;;  %v3060_v2 = vmul.f32 0.2, %v3054_v24  ;;  %v7880_v59 = vld [vmem:[#allocation63_spill] sm:$0xff] }
 0x90f   : > { %v3263_v3 = vsel %vm690_vm15, %v7111_v22, -inf  ;;  %v3010_v15 = vmul.f32 %v7860_v33, %v3002_v43  ;;  %vm3118_vm6 = vcmp.gt.f32.partialorder %v3115_v46, 0.0  ;;  %v3121_v39 = vmul.f32 0.2, %v3115_v46  ;;  %v7882_v43 = vld [vmem:[#allocation30_spill] sm:$0xff] }
 0x910   : > { %3264 = vmax.xlane.f32.xlu1 %v3263_v3  ;;  %v2952_v20 = vadd.f32 %v2949_v53, %v2891_v30  ;;  %v3063_v60 = vsel %vm3057_vm5, %v3054_v24, %v3060_v2  ;;  %v3176_v56 = vadd.f32 %v3173_v13, %v7878_v5  ;;  %v3237_v42 = vadd.f32 %v3234_v26, %v7879_v61 }
 0x911   : > { %v3071_v48 = vmul.f32 %v7862_v18, %v3063_v60  ;;  %v3124_v36 = vsel %vm3118_vm6, %v3115_v46, %v3121_v39  ;;  %v2813_v29 = vadd.f32 %v6973_v16, %v7880_v59  ;;  %v2873_v40 = vadd.f32 %v6979_v1, %v7881_v47  ;;  %v7883_v60 = vld [vmem:[#allocation36_spill] sm:$0xff]  ;;  %v7886_v59 = vld [vmem:[#allocation29_spill] sm:$0xff] }
 0x912   : > { %v3013_v52 = vadd.f32 %v3010_v15, %v2952_v20  ;;  %v3132_v14 = vmul.f32 %v6920_v12, %v3124_v36  ;;  %vm3179_vm7 = vcmp.gt.f32.partialorder %v3176_v56, 0.0  ;;  %v3182_v21 = vmul.f32 0.2, %v3176_v56 }
 0x913   : > { %vm3240_vm8 = vcmp.gt.f32.partialorder %v3237_v42, 0.0  ;;  %v3243_v30 = vmul.f32 0.2, %v3237_v42  ;;  %vm2816_vm12 = vcmp.gt.f32.partialorder %v2813_v29, 0.0  ;;  %v2819_v24 = vmul.f32 0.2, %v2813_v29 }
 0x914   : > { %v3074_v13 = vadd.f32 %v3071_v48, %v3013_v52  ;;  %v3185_v19 = vsel %vm3179_vm7, %v3176_v56, %v3182_v21  ;;  %vm2876_vm10 = vcmp.gt.f32.partialorder %v2873_v40, 0.0  ;;  %v2879_v26 = vmul.f32 0.2, %v2873_v40  ;;  %v7884_v56 = vld [vmem:[#allocation44_spill] sm:$0xff]  ;;  %v7890_v21 = vld [vmem:[#allocation59_spill] sm:$0xff] }
 0x915   : > { %v3193_v46 = vmul.f32 %v6927_v49, %v3185_v19  ;;  %v3246_v53 = vsel %vm3240_vm8, %v3237_v42, %v3243_v30  ;;  %v2822_v16 = vsel %vm2816_vm12, %v2813_v29, %v2819_v24  ;;  %v2931_v1 = vadd.f32 %v6954_v27, %v7882_v43  ;;  %v7885_v48 = vld [vmem:[#allocation32_spill] sm:$0xff]  ;;  %v7887_v27 = vld [vmem:[#allocation21_spill] sm:$0xff]  ;;  %v7892_v19 = vld [vmem:[#allocation15_spill] sm:$0xff] }
 0x916   : > { %v3135_v2 = vadd.f32 %v3132_v14, %v3074_v13  ;;  %v3254_v3 = vmul.f32 %v6949_v11, %v3246_v53  ;;  %v2829_v15 = vmul.f32 %v6792_v41, %v2822_v16  ;;  %v2882_v39 = vsel %vm2876_vm10, %v2873_v40, %v2879_v26  ;;  %v7888_v52 = vld [vmem:[#allocation24_spill] sm:$0xff] }
 0x917   : > { %v2890_v20 = vmul.f32 %v6799_v32, %v2882_v39  ;;  %v2934_v5 = vadd.f32 %v2931_v1, %v7883_v60  ;;  %v2992_v61 = vadd.f32 %v6962_v34, %v7884_v56  ;;  %v3053_v42 = vadd.f32 %v6966_v4, %v7885_v48  ;;  %v7889_v32 = vld [vmem:[#allocation49_spill] sm:$0xff]  ;;  %v7891_v13 = vld [vmem:[#allocation68_spill] sm:$0xff] }
 0x918   : > { %v3196_v36 = vadd.f32 %v3193_v46, %v3135_v2  ;;  %v2832_v29 = vadd.f32 %v2829_v15, %v7886_v59  ;;  %v3114_v47 = vadd.f32 %v6970_v25, %v7887_v27  ;;  %v3175_v41 = vadd.f32 %v7056_v0, %v7888_v52  ;;  %v7894_v48 = vld [vmem:[#allocation76_spill] sm:$0xff]  ;;  %v7895_v27 = vld [vmem:[#allocation14_spill] sm:$0xff]  ;;  %v7896_v52 = vld [vmem:[#allocation71_spill] sm:$0xff] }
 0x919   : > { %vm2937_vm11 = vcmp.gt.f32.partialorder %v2934_v5, 0.0  ;;  %v2940_v40 = vmul.f32 0.2, %v2934_v5  ;;  %v2995_v14 = vadd.f32 %v2992_v61, %v7889_v32  ;;  %v3056_v30 = vadd.f32 %v3053_v42, %v7890_v21 }
 0x91a   : > { %v7147_v24 = vadd.f32 %v3254_v3, %v3196_v36  ;;  %v2893_v34 = vadd.f32 %v2890_v20, %v2832_v29  ;;  %v3117_v4 = vadd.f32 %v3114_v47, %v7891_v13  ;;  %v3178_v26 = vadd.f32 %v3175_v41, %v7892_v19  ;;  %v7893_v20 = vld [vmem:[#allocation73_spill] sm:$0xff] }
 0x91b   : > { %v2943_v46 = vsel %vm2937_vm11, %v2934_v5, %v2940_v40  ;;  %vm2998_vm13 = vcmp.gt.f32.partialorder %v2995_v14, 0.0  ;;  %v3001_v53 = vmul.f32 0.2, %v2995_v14  ;;  %vm3059_vm0 = vcmp.gt.f32.partialorder %v3056_v30, 0.0 }
 0x91c   : > { %v3260_v25 = vsel %vm690_vm15, %v7147_v24, -inf  ;;  %v2951_v0 = vmul.f32 %v6829_v38, %v2943_v46  ;;  %v3062_v16 = vmul.f32 0.2, %v3056_v30  ;;  %vm3120_vm3 = vcmp.gt.f32.partialorder %v3117_v4, 0.0 }
 0x91d   : > { %3261 = vmax.xlane.f32.xlu0 %v3260_v25  ;;  %v3004_v43 = vsel %vm2998_vm13, %v2995_v14, %v3001_v53  ;;  %v3123_v1 = vmul.f32 0.2, %v3117_v4  ;;  %vm3181_vm5 = vcmp.gt.f32.partialorder %v3178_v26, 0.0  ;;  %v3184_v2 = vmul.f32 0.2, %v3178_v26  ;;  %v7898_v14 = vld [vmem:[#allocation48_spill] sm:$0xff] }
 0x91e   : > { %v2954_v3 = vadd.f32 %v2951_v0, %v2893_v34  ;;  %v3012_v15 = vmul.f32 %v7860_v33, %v3004_v43  ;;  %v3065_v39 = vsel %vm3059_vm0, %v3056_v30, %v3062_v16  ;;  %v3236_v60 = vadd.f32 %v7066_v10, %v7893_v20  ;;  %v7897_v10 = vld [vmem:[#allocation38_spill] sm:$0xff]  ;;  %v7902_v43 = vld [vmem:[#allocation87_spill] sm:$0xff] }
 0x91f   : > { %v3073_v5 = vmul.f32 %v7862_v18, %v3065_v39  ;;  %v3126_v56 = vsel %vm3120_vm3, %v3117_v4, %v3123_v1  ;;  %v3187_v61 = vsel %vm3181_vm5, %v3178_v26, %v3184_v2  ;;  %v2291_v38 = vadd.f32 %v6987_v44, %v7894_v48  ;;  %v7900_v4 = vld [vmem:[#allocation43_spill] sm:$0xff] }
 0x920   : > { %v3015_v42 = vadd.f32 %v3012_v15, %v2954_v3  ;;  %v3134_v36 = vmul.f32 %v6920_v12, %v3126_v56  ;;  %v3195_v29 = vmul.f32 %v6927_v49, %v3187_v61  ;;  %v3239_v47 = vadd.f32 %v3236_v60, %v7895_v27  ;;  %v7899_v49 = vld [vmem:[#allocation37_spill] sm:$0xff]  ;;  %v7901_v26 = vld [vmem:[#allocation35_spill] sm:$0xff]  ;;  %v7903_v15 = vld [vmem:[#allocation88_spill] sm:$0xff] }
 0x921   : > { %vm2294_vm6 = vcmp.gt.f32.partialorder %v2291_v38, 0.0  ;;  %v2297_v33 = vmul.f32 0.2, %v2291_v38  ;;  %v2351_v41 = vadd.f32 %v6997_v28, %v7896_v52  ;;  %v2409_v18 = vadd.f32 %v7011_v45, %v7897_v10  ;;  %v7905_v48 = vld [vmem:[#allocation51_spill] sm:$0xff] }
 0x922   : > { %v3076_v40 = vadd.f32 %v3073_v5, %v3015_v42  ;;  %vm3242_vm7 = vcmp.gt.f32.partialorder %v3239_v47, 0.0  ;;  %v3245_v32 = vmul.f32 0.2, %v3239_v47  ;;  %v2470_v44 = vadd.f32 %v7014_v35, %v7898_v14  ;;  %v7910_v14 = vld [vmem:[#allocation53_spill] sm:$0xff] }
 0x923   : > { %v2300_v21 = vsel %vm2294_vm6, %v2291_v38, %v2297_v33  ;;  %vm2354_vm8 = vcmp.gt.f32.partialorder %v2351_v41, 0.0  ;;  %v2357_v12 = vmul.f32 0.2, %v2351_v41  ;;  %v2412_v30 = vadd.f32 %v2409_v18, %v7899_v49  ;;  %v7906_v38 = vld [vmem:[#allocation78_spill] sm:$0xff]  ;;  %v7908_v33 = vld [vmem:[#allocation47_spill] sm:$0xff]  ;;  %v7909_v18 = vld [vmem:[#allocation69_spill] sm:$0xff] }
 0x924   : > { %v3137_v34 = vadd.f32 %v3134_v36, %v3076_v40  ;;  %v3248_v13 = vsel %vm3242_vm7, %v3239_v47, %v3245_v32  ;;  %v2307_v19 = vmul.f32 %v7900_v4, %v2300_v21  ;;  %v2473_v28 = vadd.f32 %v2470_v44, %v7901_v26  ;;  %v7907_v36 = vld [vmem:[#allocation66_spill] sm:$0xff] }
 0x925   : > { %v3256_v46 = vmul.f32 %v6949_v11, %v3248_v13  ;;  %v2360_v53 = vsel %vm2354_vm8, %v2351_v41, %v2357_v12  ;;  %vm2415_vm12 = vcmp.gt.f32.partialorder %v2412_v30, 0.0  ;;  %v2418_v25 = vmul.f32 0.2, %v2412_v30  ;;  %v7904_v11 = vld [vmem:[#allocation46_spill] sm:$0xff]  ;;  %v2402_v12 = vpop.permute.xlu0 %2401 }
 0x926   : > { %v3198_v0 = vadd.f32 %v3195_v29, %v3137_v34  ;;  %v2310_v16 = vadd.f32 %v2307_v19, %v7694_v51  ;;  %v2368_v1 = vmul.f32 %v7902_v43, %v2360_v53  ;;  %vm2476_vm10 = vcmp.gt.f32.partialorder %v2473_v28, 0.0  ;;  %v7911_v44 = vld [vmem:[#allocation62_spill] sm:$0xff]  ;;  %v7913_v34 = vld [vmem:[#allocation33_spill] sm:$0xff] }
 0x927   : > { %v2421_v2 = vsel %vm2415_vm12, %v2412_v30, %v2418_v25  ;;  %v2479_v3 = vmul.f32 0.2, %v2473_v28  ;;  %v2531_v39 = vadd.f32 %v7017_v8, %v7903_v15  ;;  %vm2598_vm11 = vcmp.gt.f32.partialorder %v7050_v9, 0.0  ;;  %v7912_v30 = vld [vmem:[#allocation23_spill] sm:$0xff]  ;;  %v7914_v19 = vld [vmem:[#allocation61_spill] sm:$0xff]  ;;  %v7918_v15 = vld [vmem:[#allocation50_spill] sm:$0xff] }
 0x928   : > { %v7178_v20 = vadd.f32 %v3256_v46, %v3198_v0  ;;  %v2371_v60 = vadd.f32 %v2368_v1, %v2310_v16  ;;  %v2429_v5 = vmul.f32 %v7904_v11, %v2421_v2  ;;  %v2601_v56 = vmul.f32 0.2, %v7050_v9  ;;  %v7917_v16 = vld [vmem:[#allocation52_spill] sm:$0xff] }
 0x929   : > { %v2482_v61 = vsel %vm2476_vm10, %v2473_v28, %v2479_v3  ;;  %v2534_v51 = vadd.f32 %v2531_v39, %v7905_v48  ;;  %v2673_v42 = vmul.f32 %v7906_v38, %v7082_v57  ;;  %v2717_v29 = vadd.f32 %v7021_v37, %v7907_v36  ;;  %v7915_v28 = vld [vmem:[#allocation60_spill] sm:$0xff] }
 0x92a   : > { %v3266_v27 = vsel %vm1270_vm2, %v7178_v20, -inf  ;;  %v2432_v47 = vadd.f32 %v2429_v5, %v2371_v60  ;;  %v2490_v52 = vmul.f32 %v7908_v33, %v2482_v61  ;;  %v2604_v41 = vsel %vm2598_vm11, %v7050_v9, %v2601_v56  ;;  %v7919_v60 = vld [vmem:[#allocation65_spill] sm:$0xff] }
 0x92b   : > { %3267 = vmax.xlane.f32.xlu0 %v3266_v27  ;;  %vm2537_vm13 = vcmp.gt.f32.partialorder %v2534_v51, 0.0  ;;  %v2540_v10 = vmul.f32 0.2, %v2534_v51  ;;  %v2612_v40 = vmul.f32 %v7909_v18, %v2604_v41  ;;  %vm2720_vm0 = vcmp.gt.f32.partialorder %v2717_v29, 0.0  ;;  %v2463_v27 = vpop.permute.xlu0 %2462 }
 0x92c   : > { %vm2719_vm3 = vcmp.gt.f32.partialorder %v7030_v7, 0.0  ;;  %v2493_v57 = vadd.f32 %v2490_v52, %v2432_v47  ;;  %v2723_v32 = vmul.f32 0.2, %v2717_v29  ;;  %v2290_v37 = vadd.f32 %v6984_v23, %v7910_v14  ;;  %v7916_v23 = vld [vmem:[#allocation54_spill] sm:$0xff] }
 0x92d   : > { %v2350_v21 = vadd.f32 %v6994_v54, %v7911_v44  ;;  %v2543_v49 = vsel %vm2537_vm13, %v2534_v51, %v2540_v10  ;;  %v2408_v9 = vadd.f32 %v7011_v45, %v7912_v30  ;;  %v2469_v13 = vadd.f32 %v7014_v35, %v7913_v34  ;;  %v7920_v34 = vld [vmem:[#allocation83_spill] sm:$0xff] }
 0x92e   : > { %v2530_v26 = vadd.f32 %v7017_v8, %v7914_v19  ;;  %v2551_v46 = vmul.f32 %v7915_v28, %v2543_v49  ;;  %v2726_v53 = vsel %vm2720_vm0, %v2717_v29, %v2723_v32  ;;  %vm2293_vm5 = vcmp.gt.f32.partialorder %v2290_v37, 0.0 }
 0x92f   : > { %v2296_v25 = vmul.f32 0.2, %v2290_v37  ;;  %v2734_v0 = vmul.f32 %v7916_v23, %v2726_v53  ;;  %vm2353_vm6 = vcmp.gt.f32.partialorder %v2350_v21, 0.0  ;;  %v2356_v54 = vmul.f32 0.2, %v2350_v21 }
 0x930   : > { %v2411_v1 = vadd.f32 %v2408_v9, %v7917_v16  ;;  %vm2721_vm7 = vcmp.gt.f32.partialorder %v7096_v17, 0.0  ;;  %v2554_v2 = vadd.f32 %v2551_v46, %v2493_v57  ;;  %v2472_v39 = vadd.f32 %v2469_v13, %v7918_v15  ;;  %v7921_v13 = vld [vmem:[#allocation16_spill] sm:$0xff]  ;;  %v7923_v16 = vld [vmem:[#allocation39_spill] sm:$0xff] }
 0x931   : > { %v2299_v3 = vsel %vm2293_vm5, %v2290_v37, %v2296_v25  ;;  %v2533_v5 = vadd.f32 %v2530_v26, %v7919_v60  ;;  %v2359_v61 = vsel %vm2353_vm6, %v2350_v21, %v2356_v54  ;;  %v2724_v10 = vmul.f32 0.2, %v7096_v17 }
 0x932   : > { %v2306_v56 = vmul.f32 %v7900_v4, %v2299_v3  ;;  %vm2414_vm8 = vcmp.gt.f32.partialorder %v2411_v1, 0.0  ;;  %v2417_v48 = vmul.f32 0.2, %v2411_v1  ;;  %v2615_v51 = vadd.f32 %v2612_v40, %v2554_v2 }
 0x933   : > { %v2367_v36 = vmul.f32 %v7902_v43, %v2359_v61  ;;  %vm2475_vm12 = vcmp.gt.f32.partialorder %v2472_v39, 0.0  ;;  %v2478_v29 = vmul.f32 0.2, %v2472_v39  ;;  %vm2536_vm10 = vcmp.gt.f32.partialorder %v2533_v5, 0.0 }
 0x934   : > { %v2309_v47 = vadd.f32 %v2306_v56, %v7873_v31  ;;  %v2420_v52 = vsel %vm2414_vm8, %v2411_v1, %v2417_v48  ;;  %v2539_v41 = vmul.f32 0.2, %v2533_v5  ;;  %v2676_v57 = vadd.f32 %v2673_v42, %v2615_v51  ;;  %v7924_v48 = vld [vmem:[#allocation31_spill] sm:$0xff] }
 0x935   : > { %v2481_v32 = vsel %vm2475_vm12, %v2472_v39, %v2478_v29  ;;  %vm2597_vm11 = vcmp.gt.f32.partialorder %v7047_v62, 0.0  ;;  %v2428_v37 = vmul.f32 %v7904_v11, %v2420_v52  ;;  %v2600_v44 = vmul.f32 0.2, %v7047_v62 }
 0x936   : > { %v2370_v14 = vadd.f32 %v2367_v36, %v2309_v47  ;;  %v2542_v40 = vsel %vm2536_vm10, %v2533_v5, %v2539_v41  ;;  %v7216_v21 = vadd.f32 %v2734_v0, %v2676_v57  ;;  %v2489_v49 = vmul.f32 %v7908_v33, %v2481_v32  ;;  %v2524_v0 = vpop.permute.xlu0 %2523 }
 0x937   : > { %vm2658_vm13 = vcmp.gt.f32.partialorder %v7044_v55, 0.0  ;;  %v2661_v31 = vmul.f32 0.2, %v7044_v55  ;;  %vm2599_vm0 = vcmp.gt.f32.partialorder %v7059_v58, 0.0  ;;  %v2603_v30 = vsel %vm2597_vm11, %v7047_v62, %v2600_v44 }
 0x938   : > { %v2431_v42 = vadd.f32 %v2428_v37, %v2370_v14  ;;  %v2725_v9 = vsel %vm2719_vm3, %v7030_v7, %v7073_v6  ;;  %v2292_v19 = vadd.f32 %v7921_v13, %v7920_v34  ;;  %v2742_v26 = vsel %vm690_vm15, %v7216_v21, -inf  ;;  %v7922_v6 = vld [vmem:[#allocation42_spill] sm:$0xff] }
 0x939   : > { %v2550_v46 = vmul.f32 %v7915_v28, %v2542_v40  ;;  %v2664_v53 = vsel %vm2658_vm13, %v7044_v55, %v2661_v31  ;;  %v2733_v25 = vmul.f32 %v7916_v23, %v2725_v9  ;;  %vm2660_vm5 = vcmp.gt.f32.partialorder %v7093_v50, 0.0  ;;  %2743 = vmax.xlane.f32.xlu1 %v2742_v26 }
 0x93a   : > { %v2492_v62 = vadd.f32 %v2489_v49, %v2431_v42  ;;  %v2611_v54 = vmul.f32 %v7909_v18, %v2603_v30  ;;  %vm2295_vm3 = vcmp.gt.f32.partialorder %v2292_v19, 0.0  ;;  %v2298_v7 = vmul.f32 0.2, %v2292_v19 }
 0x93b   : > { %v2352_v1 = vadd.f32 %v7923_v16, %v7922_v6  ;;  %v2410_v2 = vadd.f32 %v7011_v45, %v2402_v12  ;;  %v2471_v3 = vadd.f32 %v7014_v35, %v2463_v27  ;;  %v2532_v55 = vadd.f32 %v7017_v8, %v2524_v0  ;;  %v7925_v45 = vld [vmem:[#allocation56_spill] sm:$0xff]  ;;  %v7926_v35 = vld [vmem:[#allocation57_spill] sm:$0xff]  ;;  %v7928_v16 = vld [vmem:[#allocation74_spill] sm:$0xff] }
 0x93c   : > { %v2553_v15 = vadd.f32 %v2550_v46, %v2492_v62  ;;  %v2672_v39 = vmul.f32 %v7906_v38, %v2664_v53  ;;  %v2301_v60 = vsel %vm2295_vm3, %v2292_v19, %v2298_v7  ;;  %v2727_v5 = vsel %vm2721_vm7, %v7096_v17, %v2724_v10 }
 0x93d   : > { %v2308_v56 = vmul.f32 %v7900_v4, %v2301_v60  ;;  %vm2355_vm6 = vcmp.gt.f32.partialorder %v2352_v1, 0.0  ;;  %v2358_v61 = vmul.f32 0.2, %v2352_v1  ;;  %v2413_v51 = vadd.f32 %v2410_v2, %v7924_v48 }
 0x93e   : > { %v2614_v36 = vadd.f32 %v2611_v54, %v2553_v15  ;;  %v2474_v12 = vadd.f32 %v2471_v3, %v7925_v45  ;;  %v2535_v29 = vadd.f32 %v2532_v55, %v7926_v35  ;;  %v2735_v8 = vmul.f32 %v7916_v23, %v2727_v5 }
 0x93f   : > { %v2311_v27 = vadd.f32 %v2308_v56, %v7886_v59  ;;  %v2361_v47 = vsel %vm2355_vm6, %v2352_v1, %v2358_v61  ;;  %vm2416_vm8 = vcmp.gt.f32.partialorder %v2413_v51, 0.0  ;;  %v2419_v52 = vmul.f32 0.2, %v2413_v51 }
 0x940   : > { %v2675_v41 = vadd.f32 %v2672_v39, %v2614_v36  ;;  %v2369_v17 = vmul.f32 %v7902_v43, %v2361_v47  ;;  %vm2477_vm7 = vcmp.gt.f32.partialorder %v2474_v12, 0.0  ;;  %v2480_v4 = vmul.f32 0.2, %v2474_v12  ;;  %v7930_v39 = vld [vmem:[#allocation22_spill] sm:$0xff] }
 0x941   : > { %v2663_v10 = vmul.f32 0.2, %v7093_v50  ;;  %v2422_v57 = vsel %vm2416_vm8, %v2413_v51, %v2419_v52  ;;  %vm2538_vm12 = vcmp.gt.f32.partialorder %v2535_v29, 0.0  ;;  %v2541_v32 = vmul.f32 0.2, %v2535_v29 }
 0x942   : > { %v2736_v14 = vadd.f32 %v2733_v25, %v2675_v41  ;;  %v2372_v37 = vadd.f32 %v2369_v17, %v2311_v27  ;;  %v2430_v40 = vmul.f32 %v7904_v11, %v2422_v57  ;;  %v2483_v23 = vsel %vm2477_vm7, %v2474_v12, %v2480_v4 }
 0x943   : > { %v2605_v59 = vsel %vm2599_vm0, %v7059_v58, %v7085_v63  ;;  %v2544_v44 = vsel %vm2538_vm12, %v2535_v29, %v2541_v32  ;;  %v2491_v31 = vmul.f32 %v7908_v33, %v2483_v23  ;;  %v2666_v42 = vsel %vm2660_vm5, %v7093_v50, %v2663_v10 }
 0x944   : > { %v2739_v43 = vsel %vm690_vm15, %v2736_v14, -inf  ;;  %v2433_v49 = vadd.f32 %v2430_v40, %v2372_v37  ;;  %v2613_v30 = vmul.f32 %v7909_v18, %v2605_v59  ;;  %v2552_v9 = vmul.f32 %v7915_v28, %v2544_v44 }
 0x945   : > { %2740 = vmax.xlane.f32.xlu0 %v2739_v43  ;;  %v2674_v13 = vmul.f32 %v7906_v38, %v2666_v42  ;;  %v7931_v41 = vmov 0.0   ;;  %v7932_v59 = vmov 0.0|0.0   ;;  %vm3770_vm10 = vcmask 195584  }
 0x946   : > { %v2494_v11 = vadd.f32 %v2491_v31, %v2433_v49  ;;  %vm4004_vm11 = vcmask 16384  }
 0x948   : > { %v2555_v34 = vadd.f32 %v2552_v9, %v2494_v11 }
 0x94a   : > { %v2616_v58 = vadd.f32 %v2613_v30, %v2555_v34 }
 0x94c   : > { %v2677_v63 = vadd.f32 %v2674_v13, %v2616_v58 }
 0x94e   : > { %v2738_v19 = vadd.f32 %v2735_v8, %v2677_v63 }
 0x950   : > { %v2745_v26 = vsel %vm1270_vm2, %v2738_v19, -inf }
 0x951   : > { %2746 = vmax.xlane.f32.xlu0 %v2745_v26 }
 0x99d   : > { %v3265_v33 = vpop.xlane.xlu1 %3264 }
 0x99e   : > { %v3270_v46 = vsub.f32 %v7111_v22, %v3265_v33  ;;  %v7927_v22 = vld [vmem:[#allocation77_spill] sm:$0xff] }
 0x99f   : > { %v7929_v1 = vpack.i.bf16 %v7927_v22, %v7928_v16  ;;  %v3600_v16 = vld [vmem:[%s7473_s5 + $0x98] sm:$0xff] }
 0x9a0   : > { %v3274_v53 = vmul.f32 1.442695, %v3270_v46 }
 0x9a2   : > { %4879 = vpow2.f32 %v3274_v53 }
 0x9aa   : > { %v3262_v50 = vpop.xlane.xlu0 %3261 }
 0x9ab   : > { %v3269_v18 = vsub.f32 %v7147_v24, %v3262_v50 }
 0x9ac   : > { %v4880_v25 = vpop.eup %4879 }
 0x9ad   : > { %v3272_v0 = vmul.f32 1.442695, %v3269_v18  ;;  %v3281_v28 = vsel %vm690_vm15, %v4880_v25, 0.0 }
 0x9ae   : > { %3282 = vadd.xlane.f32.xlu0 %v3281_v28  ;;  %v3520_v28 = vld [vmem:[%s7473_s5 + $0x68] sm:$0xff] }
 0x9af   : > { %4881 = vpow2.f32 %v3272_v0 }
 0x9b8   : > { %v3268_v38 = vpop.xlane.xlu0 %3267 }
 0x9b9   : > { %v4882_v62 = vpop.eup %4881  ;;  %v3271_v54 = vsub.f32 %v7178_v20, %v3268_v38  ;;  %v3521_v38 = vld [vmem:[%s7473_s5 + $0x70] sm:$0xff] }
 0x9ba   : > { %v3278_v7 = vsel %vm690_vm15, %v4882_v62, 0.0 }
 0x9bb   : > { %v3276_v6 = vmul.f32 1.442695, %v3271_v54  ;;  %3279 = vadd.xlane.f32.xlu1 %v3278_v7  ;;  %v3597_v54 = vld [vmem:[%s7473_s5 + $0x80] sm:$0xff]  ;;  %v3598_v7 = vld [vmem:[%s7473_s5 + $0x88] sm:$0xff] }
 0x9bc   : > { %v4473_v22 = vpack.c.bf16 %v3598_v7, %v3597_v54  ;;  %v3849_v7 = vld [vmem:[%s7473_s5 + $0x108] sm:$0xff] }
 0x9bd   : > { %4883 = vpow2.f32 %v3276_v6  ;;  %v3599_v6 = vld [vmem:[%s7473_s5 + $0x90] sm:$0xff] }
 0x9c4   : > { %4850 = vrot.lane.b32.xlu0 %v7929_v1, %s5004_s7  ;;  %v4476_v1 = vpack.c.bf16 %v3600_v16, %v3599_v6  ;;  %v3769_v6 = vld [vmem:[%s7473_s5 + $0xf0] sm:$0x1] }
 0x9c6   : > { %v2744_v3 = vpop.xlane.xlu1 %2743 }
 0x9c7   : > { %v4884_v24 = vpop.eup %4883  ;;  %v2749_v55 = vsub.f32 %v7216_v21, %v2744_v3 }
 0x9c8   : > { %v3284_v2 = vsel %vm1270_vm2, %v4884_v24, 0.0 }
 0x9c9   : > { %3285 = vadd.xlane.f32.xlu1 %v3284_v2  ;;  %v2753_v15 = vmul.f32 1.442695, %v2749_v55  ;;  %v3602_v2 = vld [vmem:[%s7473_s5 + $0xa8] sm:$0xff] }
 0x9cb   : > { %4885 = vpow2.f32 %v2753_v15 }
 0x9d2   : > { %v2741_v20 = vpop.xlane.xlu0 %2740 }
 0x9d3   : > { %v2748_v51 = vsub.f32 %v2736_v14, %v2741_v20 }
 0x9d5   : > { %v4886_v56 = vpop.eup %4885  ;;  %v2751_v45 = vmul.f32 1.442695, %v2748_v51 }
 0x9d6   : > { %v2760_v48 = vsel %vm690_vm15, %v4886_v56, 0.0 }
 0x9da   : > { %3391 = vrot.lane.b32.xlu1 %v7930_v39, %s5004_s7 }
 0x9de   : > { %v2747_v60 = vpop.xlane.xlu0 %2746 }
 0x9df   : > { %v2750_v5 = vsub.f32 %v2738_v19, %v2747_v60 }
 0x9e1   : > { %v2755_v61 = vmul.f32 1.442695, %v2750_v5 }
 0x9e3   : > { %4887 = vpow2.f32 %v2755_v61  ;;  %2761 = vadd.xlane.f32.xlu0 %v2760_v48  ;;  %v4182_v61 = vld [vmem:[%s7473_s5 + $0x60] ss:$0 sm:$0xff] }
 0x9e4   : > { %4889 = vpow2.f32 %v2751_v45 }
 0x9ed   : > { %v4888_v36 = vpop.eup %4887 }
 0x9ee   : > { %v2763_v12 = vsel %vm1270_vm2, %v4888_v36, 0.0  ;;  %v4890_v21 = vpop.eup %4889  ;;  %vm3683_vm2 = vcmask 48128  }
 0x9ef   : > { %2764 = vadd.xlane.f32.xlu0 %v2763_v12  ;;  %v2757_v35 = vsel %vm690_vm15, %v4890_v21, 0.0 }
 0x9fe   : > { %2758 = vadd.xlane.f32.xlu1 %v2757_v35 }
 0xa3b   : > { %v3283_v29 = vpop.xlane.xlu0 %3282 }
 0xa3c   : > { %v3288_v10 = vmax.f32 %v3283_v29, 1e-30 }
 0xa3f   : > { %v4851_v8 = vpop.permute.xlu0 %4850 }
 0xa40   : > { %v4853_v27 = vunpack.i.h.bf16 %v4851_v8  ;;  %v4852_v47 = vunpack.i.l.bf16 %v4851_v8 }
 0xa42   : > { %v4467_v52 = vpack.c.bf16 %v4853_v27, %v4852_v47 }
 0xa44   : > { %4468 = vmatpush3.bf16.msra.mxu1 %v4467_v52 }
 0xa45   : > { %4381 = vmatprep.subr.mxu1 %v7931_v41 }
 0xa48   : > { %v3280_v17 = vpop.xlane.xlu1 %3279 }
 0xa49   : > { %v3287_v4 = vmax.f32 %v3280_v17, 1e-30 }
 0xa4b   : > { %4891 = vrcp.f32 %v3287_v4 }
 0xa4c   : > { %4893 = vrcp.f32 %v3288_v10 }
 0xa55   : > { %v4892_v57 = vpop.eup %4891 }
 0xa56   : > { %v3286_v32 = vpop.xlane.xlu1 %3285  ;;  %v3293_v37 = vmul.f32 %v4892_v57, %v4882_v62  ;;  %v4894_v23 = vpop.eup %4893  ;;  %v4470_v62 = vpack.c.bf16 %v3521_v38, %v3520_v28  ;;  %v3847_v38 = vld [vmem:[%s7473_s5 + $0xf8] sm:$0xff] }
 0xa57   : > { %v3289_v14 = vmax.f32 %v3286_v32, 1e-30  ;;  %v3294_v44 = vmul.f32 %v4894_v23, %v4880_v25  ;;  %v3680_v23 = vld [vmem:[%s313_s10] sm:$0x1] }
 0xa59   : > { %4895 = vrcp.f32 %v3289_v14 }
 0xa5a   : > { %v3392_v40 = vpop.permute.xlu1 %3391 }
 0xa5b   : > { %4382 = vmatpush3.msk.msra.mxu1 %vm697_vm14, %v3392_v40  ;;  %v3681_v40 = vld [vmem:[%s7473_s5 + $0xc8] sm:$0x3f] }
 0xa5c   : > { %4384 = vmatmul.mubr.msk.f32.vlgmr.msra.gmra.mrb[20].mxu1 %vm690_vm15, %v3293_v37  ;;  %4472 = vmatprep.subr.bf16.mxu1 %v7932_v59 }
 0xa5d   : > { %4386 = vmatprep.mubr.msk.f32.mxu1 %vm4978_vm1, %v7931_v41  ;;  %4474 = vmatpush3.bf16.msra.mxu1 %v4473_v22 }
 0xa5e   : > { %4475 = vmatprep.subr.bf16.mxu1 %v7932_v59 }
 0xa60   : > { %4387 = vmatmul.mubr.msk.f32.gmra.mrb[22].mxu1 %vm690_vm15, %v3294_v44  ;;  %v3603_v44 = vld [vmem:[%s7473_s5 + $0xb0] sm:$0xff] }
 0xa61   : > { %4389 = vmatprep.mubr.msk.f32.mxu1 %vm4978_vm1, %v7931_v41  ;;  %4477 = vmatpush3.bf16.msra.mxu1 %v4476_v1 }
 0xa62   : > { %4478 = vmatprep.subr.bf16.mxu1 %v7932_v59 }
 0xa63   : > { %v4896_v43 = vpop.eup %4895 }
 0xa64   : > { %v3295_v49 = vmul.f32 %v4896_v43, %v4884_v24  ;;  %v3601_v24 = vld [vmem:[%s7473_s5 + $0xa0] sm:$0xff]  ;;  %v3604_v43 = vld [vmem:[%s7473_s5 + $0xb8] sm:$0xff] }
 0xa65   : > { %v4479_v3 = vpack.c.bf16 %v3602_v2, %v3601_v24 }
 0xa66   : > { %4390 = vmatmul.mubr.msk.f32.gmra.mrb[24].mxu1 %vm690_vm15, %v3295_v49  ;;  %v4482_v49 = vpack.c.bf16 %v3604_v43, %v3603_v44 }
 0xa67   : > { %4415 = vmatprep.mubr.msk.f32.mxu1 %vm4978_vm1, %v7931_v41  ;;  %4480 = vmatpush3.bf16.msra.mxu1 %v4479_v3  ;;  %v3850_v3 = vld [vmem:[%s7473_s5 + $0x110] sm:$0x1] }
 0xa68   : > { %4481 = vmatprep.subr.bf16.mxu1 %v7932_v59 }
 0xa6b   : > { %4483 = vmatpush3.bf16.msra.mxu1 %v4482_v49 }
 0xa6c   : > { %4487 = vmatprep.subr.bf16.mxu1 %v7932_v59 }
 0xa70   : > { %v2762_v31 = vpop.xlane.xlu0 %2761 }
 0xa71   : > { %v2767_v30 = vmax.f32 %v2762_v31, 1e-30  ;;  %v3766_v31 = vld [vmem:[%s7473_s5 + $0xd8] sm:$0xff] }
 0xa7c   : > { %v2765_v9 = vpop.xlane.xlu0 %2764 }
 0xa7d   : > { %v2768_v34 = vmax.f32 %v2765_v9, 1e-30 }
 0xa8b   : > { %v2759_v42 = vpop.xlane.xlu1 %2758 }
 0xa8c   : > { %v2766_v11 = vmax.f32 %v2759_v42, 1e-30  ;;  %v3767_v42 = vld [vmem:[%s7473_s5 + $0xe0] sm:$0xff] }
 0xa8e   : > { %4897 = vrcp.f32 %v2766_v11  ;;  %v3522_v11 = vld [vmem:[%s7473_s5 + $0x78] sm:$0x1] }
 0xa8f   : > { %4899 = vrcp.f32 %v2767_v30  ;;  %v4485_v30 = vpack.c.bf16 %v3767_v42, %v3766_v31 }
 0xa90   : > { %4901 = vrcp.f32 %v2768_v34 }
 0xa98   : > { %v4898_v13 = vpop.eup %4897 }
 0xa99   : > { %v2772_v58 = vmul.f32 %v4898_v13, %v4890_v21  ;;  %v4900_v63 = vpop.eup %4899 }
 0xa9a   : > { %v2773_v19 = vmul.f32 %v4900_v63, %v4886_v56  ;;  %v4902_v26 = vpop.eup %4901 }
 0xa9b   : > { %4369 = vmatmul.mubr.msk.f32.vlgmr.msra.gmra.mrb[20].mxu0 %vm690_vm15, %v2772_v58  ;;  %v2774_v33 = vmul.f32 %v4902_v26, %v4888_v36 }
 0xa9c   : > { %4371 = vmatprep.mubr.msk.f32.mxu0 %vm4978_vm1, %v7931_v41  ;;  %4471 = vmatpush3.bf16.msra.mxu0 %v4470_v62  ;;  %v3848_v62 = vld [vmem:[%s7473_s5 + $0x100] sm:$0xff] }
 0xa9d   : > { %4418 = vmatprep.subr.mxu0 %v7931_v41  ;;  %v4488_v54 = vpack.c.bf16 %v3848_v62, %v3847_v38 }
 0xa9f   : > { %4372 = vmatmul.mubr.msk.f32.gmra.mrb[22].mxu0 %vm690_vm15, %v2773_v19 }
 0xaa0   : > { %4374 = vmatprep.mubr.msk.f32.mxu0 %vm4978_vm1, %v7931_v41 }
 0xaa3   : > { %4375 = vmatmul.mubr.msk.f32.gmra.mrb[24].mxu0 %vm690_vm15, %v2774_v33  ;;  %vm3511_vm15 = vcmask 128000  }
 0xaa4   : > { %4396 = vmatprep.mubr.msk.f32.mxu0 %vm4978_vm1, %v7931_v41 }
 0xb2f   : > { %v3472_v46 = vpop.f32.mrb[20].mxu1 }
 0xb30   : > { %3489 = vrot.lane.b32.xlu1 %v3472_v46, %s5005_s12  ;;  %v4385_v53 = vpop.f32.mrb[21].mxu1  ;;  %v3768_v46 = vld [vmem:[%s7473_s5 + $0xe8] sm:$0xff] }
 0xb31   : > { %v3605_v53 = vld [vmem:[%s7473_s5 + $0xc0] sm:$0x1] }
 0xb33   : > { %v3477_v50 = vpop.f32.mrb[22].mxu1 }
 0xb34   : > { %3491 = vrot.lane.b32.xlu0 %v3477_v50, %s5005_s12  ;;  %v4388_v18 = vpop.f32.mrb[23].mxu1 }
 0xb39   : > { %v3482_v25 = vpop.f32.mrb[24].mxu1 }
 0xb3a   : > { %3493 = vrot.lane.b32.xlu1 %v3482_v25, %s5005_s12  ;;  %v4391_v0 = vpop.f32.mrb[25].mxu1  ;;  %s294_s12 = sand.u32 1, %s7934_s27  }
 0xb3b   : > { %s295_s19 = scalar_lea.vmem [#allocation2], %s294_s12  ;;  %s4018_s4 = scalar_lea.sflag [#allocation3], %s294_s12 }
 0xb3c   : > { %s4030_s9 = sshll.u32 %s295_s19, 4  ;;  %s7427_s9 = int_to_ptr.vmem [resolvable:$true] %s4030_s9 }
 0xb3d   : > { %s4913_s16 = scalar_lea.vmem %s7427_s9, 16  ;;  %p4920_p0 = scmp.lt.s32.totalorder %s7427_s9, %s4918_s28 }
 0xb3e   : > { %p4914_p11 = scmp.ne.s32.totalorder %s7427_s9, %s4913_s16  ;;  %p4921_p1 = scmp.lt.s32.totalorder %s4919_s29, %s4913_s16 }
 0xb40   : > { %p4915_p12 = pnand %p4914_p11, %p5081_p5  ;;  %p4922_p2 = por %p4921_p1, %p4920_p0 }
 0xb42   : > { %p4916_p13 = pneg %p4915_p12 }
 0xb44   : > { %p4923_p3 = pnand %p4922_p2, %p4916_p13 }
 0xb6e   : > { %v3373_v55 = vpop.f32.mrb[20].mxu0 }
 0xb6f   : > { %v4370_v15 = vpop.f32.mrb[21].mxu0 }
 0xb72   : > { %v3378_v20 = vpop.f32.mrb[22].mxu0 }
 0xb73   : > { %v4373_v39 = vpop.f32.mrb[23].mxu0 }
 0xb76   : > { %v3383_v60 = vpop.f32.mrb[24].mxu0 }
 0xb77   : > { %v4376_v5 = vpop.f32.mrb[25].mxu0 }
 0xba2   : > { %v3490_v56 = vpop.permute.xlu1 %3489 }
 0xba3   : > { %v3498_v48 = vsel %vm466_vm4, %v3373_v55, %v3490_v56 }
 0xba4   : > { %v3505_v51 = vadd.f32 %v4182_v61, %v3498_v48 }
 0xba6   : > { %v3492_v36 = vpop.permute.xlu0 %3491  ;;  %v3508_v21 = vsel %vm2048_vm9, %v3505_v51, 0.0 }
 0xba7   : > { %v3499_v45 = vsel %vm466_vm4, %v3378_v20, %v3492_v36 }
 0xba8   : > { %v3506_v12 = vadd.f32 %v4182_v61, %v3499_v45 }
 0xbaa   : > { %v3509_v35 = vsel %vm2048_vm9, %v3506_v12, 0.0 }
 0xbab   : > { %v3510_v29 = vadd.f32 %v3509_v35, %v3508_v21 }
 0xbac   : > { %v3494_v8 = vpop.permute.xlu1 %3493 }
 0xbad   : > { %v3500_v27 = vsel %vm466_vm4, %v3383_v60, %v3494_v8  ;;  %v3927_v60 = vld [vmem:[%s316_s0] sm:$0x1] }
 0xbae   : > { %v3507_v47 = vadd.f32 %v4182_v61, %v3500_v27  ;;  %v3930_v61 = vld [vmem:[%s7473_s5 + $0x120] sm:$0x1] }
 0xbb0   : > { %v3512_v52 = vsel %vm3511_vm15, %v3507_v47, 0.0 }
 0xbb1   : > { %v3513_v17 = vadd.f32 %v3512_v52, %v3510_v29 }
 0xbb3   : > { %v3514_v4 = vrot.slane %v3513_v17, 4 }
 0xbb5   : > { %v3515_v10 = vadd.f32 %v3514_v4, %v3513_v17 }
 0xbb7   : > { %v3516_v57 = vrot.slane %v3515_v10, 2 }
 0xbb9   : > { %v3517_v32 = vadd.f32 %v3516_v57, %v3515_v10 }
 0xbbb   : > { %v3518_v14 = vrot.slane %v3517_v32, 1 }
 0xbbd   : > { %v3519_v37 = vadd.f32 %v3518_v14, %v3517_v32 }
 0xbbf   : > { %4397 = vmatmul.mubr.msk.f32.vlgmr.msra.gmra.mrb[26].mxu0 %vm2048_vm9, %v3519_v37 }
 0xbc0   : > { %4419 = vmatpush3.msk.msra.mxu0 %vm697_vm14, %v3681_v40  ;;  %4420 = vmatprep.mubr.msk.f32.mxu0 %vm4978_vm1, %v7931_v41  ;;  %vm3606_vm14 = vcmask 523264  }
 0xbc1   : > { %4484 = vmatprep.subr.bf16.mxu0 %v7932_v59  ;;  %v3682_v59 = vld [vmem:[%s7473_s5 + $0xd0] sm:$0x1] }
 0xbc3   : > { %4421 = vmatmul.mubr.msk.f32.vlgmr.msra.gmra.mrb[28].mxu0 %vm3683_vm2, %v3680_v23 }
 0xbc4   : > { %4429 = vmatprep.mubr.msk.f32.mxu0 %vm4978_vm1, %v7931_v41  ;;  %4486 = vmatpush3.bf16.msra.mxu0 %v4485_v30 }
 0xbc5   : > { %4427 = vmatprep.subr.mxu0 %v7931_v41 }
 0xbc8   : > { %4428 = vmatpush3.msra.mxu0 %v3768_v46 }
 0xbc9   : > { %4441 = vmatprep.subr.mxu0 %v7931_v41 }
 0xc92   : > { %v3592_v9 = vpop.f32.mrb[26].mxu0 }
 0xc93   : > { %v3593_v34 = vadd.f32 %v3592_v9, %v3522_v11  ;;  %v4398_v13 = vpop.f32.mrb[27].mxu0 }
 0xc95   : > { %v3596_v58 = vmax.f32 %v3593_v34, 0.0 }
 0xc96   : > { %v3756_v63 = vpop.f32.mrb[28].mxu0 }
 0xc97   : > { %4416 = vmatmul.mubr.msk.f32.vlgmr.msra.gmra.mrb[26].mxu1 %vm3606_vm14, %v3596_v58  ;;  %v3757_v19 = vadd.f32 %v3756_v63, %v3682_v59  ;;  %v4422_v26 = vpop.f32.mrb[29].mxu0 }
 0xc98   : > { %4438 = vmatprep.mubr.msk.f32.mxu1 %vm4978_vm1, %v7931_v41  ;;  %4489 = vmatpush3.bf16.msra.mxu1 %v4488_v54 }
 0xc99   : > { %v3760_v33 = vmax.f32 %v3757_v19, 0.0  ;;  %4436 = vmatprep.subr.mxu1 %v7931_v41 }
 0xc9b   : > { %3762 = vrot.lane.b32.xlu1 %v3760_v33, %s5006_s18  ;;  %s4190_s18 = sshll.u32 %s7935_s8, 4 }
 0xc9c   : > { %4437 = vmatpush3.msra.mxu1 %v3849_v7  ;;  %s7425_s14 = scalar_lea.hbm %s7937_s23, %s4190_s18 }
 0xd0d   : > { %v3763_v18 = vpop.permute.xlu1 %3762 }
 0xd6a   : > { %v3676_v50 = vpop.f32.mrb[26].mxu1 }
 0xd6b   : > { %v3677_v25 = vadd.f32 %v3676_v50, %v3605_v53  ;;  %v4417_v0 = vpop.f32.mrb[27].mxu1 }
 0xd6d   : > { %v3765_v28 = vsel %vm2048_vm9, %v3677_v25, %v3763_v18 }
 0xd6e   : > { %4430 = vmatmul.mubr.msk.f32.vlgmr.msra.gmra.mrb[30].mxu0 %vm3770_vm10, %v3765_v28 }
 0xd6f   : > { %4443 = vmatprep.mubr.msk.f32.mxu0 %vm4978_vm1, %v7931_v41  ;;  %v3929_v41 = vld [vmem:[%s7473_s5 + $0x118] sm:$0xff] }
 0xd70   : > { %4442 = vmatpush3.msra.mxu0 %v3929_v41 }
 0xe41   : > { %v3840_v22 = vpop.f32.mrb[30].mxu0 }
 0xe42   : > { %v3841_v16 = vadd.f32 %v3840_v22, %v3769_v6  ;;  %v4431_v1 = vpop.f32.mrb[31].mxu0 }
 0xe44   : > { %vm3844_vm1 = vcmp.gt.f32.partialorder %v3841_v16, 0.0  ;;  %v3845_v24 = vmul.f32 0.1, %v3841_v16 }
 0xe46   : > { %v3846_v2 = vsel %vm3844_vm1, %v3841_v16, %v3845_v24 }
 0xe47   : > { %4439 = vmatmul.mubr.msk.f32.vlgmr.msra.gmra.mrb[28].mxu1 %vm3770_vm10, %v3846_v2 }
 0xf1a   : > { %v3920_v55 = vpop.f32.mrb[28].mxu1 }
 0xf1b   : > { %v3921_v15 = vadd.f32 %v3920_v55, %v3850_v3  ;;  %v4440_v20 = vpop.f32.mrb[29].mxu1 }
 0xf1d   : > { %vm3924_vm9 = vcmp.gt.f32.partialorder %v3921_v15, 0.0  ;;  %v3925_v39 = vmul.f32 0.1, %v3921_v15 }
 0xf1f   : > { %v3926_v5 = vsel %vm3924_vm9, %v3921_v15, %v3925_v39 }
 0xf20   : > { %v3928_v56 = vmul.f32 %v3927_v60, %v3926_v5 }
 0xf22   : > { %4444 = vmatmul.mubr.msk.f32.vlgmr.msra.gmra.mrb[32].mxu0 %vm466_vm4, %v3928_v56 }
 0xff5   : > { %v4000_v48 = vpop.f32.mrb[32].mxu0 }
 0xff6   : > { %v4001_v51 = vadd.f32 %v4000_v48, %v3930_v61  ;;  %v4445_v36 = vpop.f32.mrb[33].mxu0 }
 0xff8   : > { %v4005_v45 = vsel %vm4004_vm11, %v4001_v51, -inf }
 0xff9   : > { %4006 = vmax.xlane.f32.xlu0 %v4005_v45 }
0x1086   : > { %v4007_v12 = vpop.xlane.xlu0 %4006 }
0x1087   : > { %v4008_v21 = vsub.f32 %v4001_v51, %v4007_v12 }
0x1089   : > { %v4009_v35 = vmul.f32 1.442695, %v4008_v21 }
0x108b   : > { %4903 = vpow2.f32 %v4009_v35 }
0x1095   : > { %v4904_v29 = vpop.eup %4903 }
0x1096   : > { %v4011_v8 = vsel %vm4004_vm11, %v4904_v29, 0.0 }
0x1097   : > { %4012 = vadd.xlane.f32.xlu1 %v4011_v8 }
0x1124   : > { %v4013_v27 = vpop.xlane.xlu1 %4012 }
0x1125   : > { %4905 = vrcp.f32 %v4013_v27 }
0x112f   : > { %v4906_v47 = vpop.eup %4905 }
0x1130   : > { %v4015_v52 = vmul.f32 %v4906_v47, %v4904_v29 }
0x1132   : > { %4016 = vst.msk [vmem:[%s295_s19] sm:$0x1] %vm4004_vm11, %v4015_v52 }
0x1133   : > { %4926 = shalt.err (!%p4923_p3)
}
0x1134   : > { %s4927_s10 = scalar_lea.hbm %s7425_s14, 16  ;;  %s4931_s26 = scalar_lea.hbm %s7938_s30, 32 }
0x1135   : > { %p4928_p4 = scmp.ne.s32.totalorder %s7425_s14, %s4927_s10  ;;  %p4932_p9 = scmp.lt.u32.totalorder %s7425_s14, %s7938_s30 }
0x1136   : > { %p4933_p10 = scmp.lt.u32.totalorder %s4931_s26, %s4927_s10  ;;  %p4935_p12 = scmp.lt.u32.totalorder %s4927_s10, %s7425_s14 }
0x1137   : > { %p4929_p7 = pnand %p4928_p4, %p5081_p5 }
0x1138   : > { %p4934_p11 = por %p4933_p10, %p4932_p9 }
0x1139   : > { %p4930_p8 = pneg %p4929_p7 }
0x113a   : > { %p4936_p13 = por %p4935_p12, %p4934_p11 }
0x113c   : > { %p4937_p0 = pnand %p4936_p13, %p4930_p8 }
0x113e   : > { %4940 = shalt.err (!%p4937_p0)
}
0x113f   : > { %4684 = dma.vmem_to_hbm [thread:$0]  (%p5081_p5), %s7427_s9, 16, %s7425_s14, %s4018_s4  }
0x1140 PF: > { %s7939_s22 = sld [smem:[#allocation8_spill]]  ;;  %s7940_s0 = sld [smem:[#allocation5_spill]] }
0x1146   : > { %p4690_p1 = scmp.ge.s32.totalorder %s7939_s22, 2  ;;  %s4042_s25 = sand.u32 1, %s7940_s0  }
0x1147   : > { %s4043_s27 = scalar_lea.sflag [#allocation3], %s4042_s25 }
0x1148   : > { %p4687_p2 = pnand %p4690_p1, %p5085_p6 }
0x114a   : > { %4958 = dma.done.wait (!%p4687_p2), %s4043_s27, 16  }
0x114b   : > { %4960 = vsyncadd (!%p4687_p2), %s4043_s27, 4294967280  ;;  %s7942_s24 = sld [smem:[#allocation10_spill]]  ;;  %s7943_s21 = sld [smem:[#allocation6_spill]] }
0x114c   : > { %s7944_s22 = sld [smem:[#allocation7_spill]]  ;;  %s7945_s23 = sld [smem:[#allocation11_spill]] }
0x1151   : > { %p16_p3 = scmp.ge.s32.totalorder %s7942_s24, 4  }
0x1153   :  { %18 = sbr.rel (!%p16_p3) target bundleno = 7 (0x7), region = 92 }
0x115a   :  { %4047 = vsyncpa [#allocation3], 1 }
0x115b   :  { %4049 = vsyncpa [#allocation3 + $0x1], 1 }

</bundles_post_ra>
